<compile_context>
chip_gen: v6e
topology: v6e:2x2x1
jax: 0.10.0
libtpu: 0.0.40
codegen_flags: <defaults>
</compile_context>

<pallas_src>
import functools

import jax
import jax.numpy as jnp
from jax.experimental import pallas as pl
from jax.experimental.pallas import tpu as pltpu

LRELU_SLOPE = 0.1
LT_MAX = 2048          # max Lout tile (lane axis), multiple of 128

# (Cin, Cout, K, stride, padding, groups) for DiscriminatorS.convs
CONV_CFGS = [
    (1, 128, 15, 1, 7, 1),
    (128, 128, 41, 2, 20, 4),
    (128, 256, 41, 2, 20, 16),
    (256, 512, 41, 4, 20, 16),
    (512, 1024, 41, 4, 20, 16),
    (1024, 1024, 41, 1, 20, 16),
    (1024, 1024, 5, 1, 2, 1),
]
POST_CFG = (1024, 1, 3, 1, 1, 1)   # conv_post


def _round_up(x, m):
    return ((x + m - 1) // m) * m


@functools.lru_cache(maxsize=None)
def _vmem_budget():
    """Generation-aware scoped-VMEM request and per-step block budget (bytes)."""
    try:
        cap = int(pltpu.get_tpu_info().vmem_capacity_bytes)  # 64 MiB v7x, 128 MiB v5e/v6e
    except Exception:
        cap = 64 * 2 ** 20
    limit = int(min(64 * 2 ** 20, cap // 2))
    return limit, limit // 2


def _pick_lt(Lout, K, Cig, cin_blk, s, co_t, budget):
    """Largest Lout tile (multiple of 128) whose per-step VMEM footprint fits the budget."""
    lt = max(128, min(LT_MAX, _round_up(Lout, 128)))

    def est(t):
        w_b = co_t * K * Cig * 2          # weight block (bf16)
        x_b = cin_blk * s * t * 2         # one input block (bf16)
        o_b = co_t * t * 2                # output block (bf16)
        patch = K * Cig * t * 2           # in-kernel patch
        acc = co_t * t * 4                # f32 accumulator
        return 2 * (w_b + 2 * x_b + o_b) + 2 * patch + 2 * x_b + acc

    while lt > 128 and est(lt) > budget:
        lt -= 128
    return lt


# ---------------------------------------------------------------------------
# Kernel body factory: one (batch, out-channel tile, Lout tile) block.
# ---------------------------------------------------------------------------
def _make_conv_kernel(*, K, s, Cig, Cog_loc, GB, Lt, path, apply_lrelu, f32_patch):
    def body(w_ref, b_ref, xc_ref, xn_ref, o_ref):
        # Current + next Lout tile of the phase-split input -> halo for the K taps.
        xcat = jnp.concatenate([xc_ref[0], xn_ref[0]], axis=-1)   # (s, cin_blk, 2*Lt)

        def act(y):
            if apply_lrelu:
                return jnp.where(y >= 0.0, y, LRELU_SLOPE * y)
            return y

        if path == "reduce":
            # Cout == 1 (conv_post / avg-pool): VPU multiply + cross-sublane sum.
            cin = xcat.shape[1]
            acc = jnp.zeros((cin, Lt), jnp.float32)
            for k in range(K):
                r, j = k % s, k // s
                tap = xcat[r, :, j:j + Lt].astype(jnp.float32)             # (Cin, Lt)
                wk = w_ref[k * Cig:(k + 1) * Cig, :].astype(jnp.float32)   # (Cin, 1)
                acc = acc + tap * wk
            y = jnp.sum(acc, axis=0, keepdims=True) + b_ref[...].astype(jnp.float32)
            o_ref[0] = act(y).astype(o_ref.dtype)
            return

        if path == "bcast":
            # Cin == 1 (first conv): VPU broadcast multiply-accumulate, no MXU.
            acc = jnp.zeros((Cog_loc, Lt), jnp.float32)
            for k in range(K):
                r, j = k % s, k // s
                tap = xcat[r, 0:1, j:j + Lt].astype(jnp.float32)   # (1, Lt)
                wk = w_ref[:, k:k + 1].astype(jnp.float32)         # (co_t, 1)
                acc = acc + wk * tap
            y = acc + b_ref[...].astype(jnp.float32)
            o_ref[0] = act(y).astype(o_ref.dtype)
            return

        # MXU path: build the (K*Cig, Lt) patch in VMEM (no HBM im2col blow-up)
        # and issue one big matmul per group of this output-channel tile.
        for g in range(GB):
            ch0 = g * Cig
            taps = [xcat[k % s, ch0:ch0 + Cig, (k // s):(k // s) + Lt] for k in range(K)]
            if f32_patch:   # keep sublane concat tile-aligned when Cig % 16 != 0
                taps = [t.astype(jnp.float32) for t in taps]
            patch = jnp.concatenate(taps, axis=0) if K > 1 else taps[0]    # (K*Cig, Lt)
            wg = w_ref[g * Cog_loc:(g + 1) * Cog_loc, :]                   # (Cog_loc, K*Cig)
            if f32_patch:
                wg = wg.astype(jnp.float32)
            acc = jnp.dot(wg, patch, preferred_element_type=jnp.float32)   # f32 accumulate
            y = acc + b_ref[g * Cog_loc:(g + 1) * Cog_loc, :].astype(jnp.float32)
            o_ref[0, g * Cog_loc:(g + 1) * Cog_loc, :] = act(y).astype(o_ref.dtype)

    return body


# ---------------------------------------------------------------------------
# Per-layer builder (cached + jitted): pad / phase-split glue + pallas_call.
# ---------------------------------------------------------------------------
@functools.lru_cache(maxsize=None)
def _build_conv(N, Cin, L, Cout, Cig, K, stride, padding, groups, apply_lrelu):
    s, G = stride, groups
    assert Cin == G * Cig and Cout % G == 0
    Cog = Cout // G
    Lout = (L + 2 * padding - K) // s + 1
    assert Lout >= 1, "input too short for this conv layer"

    # Output-channel tile: pack several groups per grid step (bounded unroll).
    co_t = min(128, Cout, 4 * Cog)
    if Cog >= co_t:                       # tile lies inside a single group
        GB, Cog_loc, cin_blk = 1, co_t, Cig
        tiles_per_group = Cog // co_t
        cin_idx = lambda c: c // tiles_per_group
    else:                                 # tile spans GB whole groups
        GB = co_t // Cog
        Cog_loc, cin_blk = Cog, GB * Cig
        cin_idx = lambda c: c
    assert Cout % co_t == 0 and Cin % cin_blk == 0

    if Cout < 8:
        path = "reduce"                   # conv_post / avg-pool
    elif Cig == 1 and G == 1:
        path = "bcast"                    # first conv (Cin == 1)
    else:
        path = "mxu"
    f32_patch = (path == "mxu") and (Cig % 16 != 0)

    vmem_limit, budget = _vmem_budget()
    Lt = _pick_lt(Lout, K, Cig, cin_blk, s, co_t, budget)
    n_l = _round_up(Lout, Lt) // Lt
    Lout_pad = n_l * Lt                   # lane-dense output (sliced back in wrapper)
    M_pad = (n_l + 1) * Lt                # +1 tile so the "next block" halo stays in range

    kernel = _make_conv_kernel(K=K, s=s, Cig=Cig, Cog_loc=Cog_loc, GB=GB, Lt=Lt,
                               path=path, apply_lrelu=apply_lrelu, f32_patch=f32_patch)

    if path == "reduce":
        w_spec = pl.BlockSpec((K * Cin, 1), lambda n, c, l: (0, 0))
    else:
        w_spec = pl.BlockSpec((co_t, K * Cig), lambda n, c, l: (c, 0))
    in_specs = [
        w_spec,
        pl.BlockSpec((co_t, 1), lambda n, c, l: (c, 0)),
        pl.BlockSpec((1, s, cin_blk, Lt), lambda n, c, l: (n, 0, cin_idx(c), l)),
        pl.BlockSpec((1, s, cin_blk, Lt), lambda n, c, l: (n, 0, cin_idx(c), l + 1)),
    ]
    out_specs = pl.BlockSpec((1, co_t, Lt), lambda n, c, l: (n, c, l))

    call = pl.pallas_call(
        kernel,
        out_shape=jax.ShapeDtypeStruct((N, Cout, Lout_pad), jnp.bfloat16),
        grid=(N, Cout // co_t, n_l),
        in_specs=in_specs,
        out_specs=out_specs,
        compiler_params=pltpu.CompilerParams(
            dimension_semantics=("parallel", "parallel", "parallel"),
            vmem_limit_bytes=vmem_limit),
    )

    def fwd(x, w, b):
        xb = x.astype(jnp.bfloat16)
        total = s * M_pad
        x_pad = jnp.pad(xb, ((0, 0), (0, 0), (padding, total - L - padding)))
        # phase split: x_ph[n, r, c, m] == x_pad[n, c, m*s + r]   (no data duplication)
        x_ph = x_pad.reshape(N, Cin, M_pad, s).transpose(0, 3, 1, 2)

        if path == "reduce":
            w_arr = jnp.transpose(w, (0, 2, 1)).reshape(K * Cin, 1).astype(jnp.float32)
        else:
            w_arr = jnp.transpose(w, (0, 2, 1)).reshape(Cout, K * Cig).astype(jnp.bfloat16)
        b_arr = b.reshape(Cout, 1).astype(jnp.float32)

        out = call(w_arr, b_arr, x_ph, x_ph)   # same array twice: current + next tile
        return out[:, :, :Lout]

    return jax.jit(fwd)


def conv1d_pallas(x, w, b, *, stride, padding, groups, apply_lrelu):
    """Grouped Conv1d + bias (+ optional LeakyReLU).  x: (N, Cin, L)."""
    N, Cin, L = x.shape
    Cout, Cig, K = w.shape
    fn = _build_conv(int(N), int(Cin), int(L), int(Cout), int(Cig), int(K),
                     int(stride), int(padding), int(groups), bool(apply_lrelu))
    return fn(x, w, b)


def avgpool1d_pallas(x):
    """AvgPool1d(kernel_size=4, stride=2, padding=2, count_include_pad=True) on 1-ch audio."""
    N, C, L = x.shape
    assert C == 1
    w = jnp.full((1, 1, 4), 0.25, jnp.float32)
    b = jnp.zeros((1,), jnp.float32)
    return conv1d_pallas(x, w, b, stride=2, padding=2, groups=1, apply_lrelu=False)


# ---------------------------------------------------------------------------
# DiscriminatorS / MultiScaleDiscriminator forward (parameters are plain JAX).
# ---------------------------------------------------------------------------
def init_discriminator_params(key):
    convs = []
    for (ci, co, k, s, p, g) in CONV_CFGS:
        key, wk, bk = jax.random.split(key, 3)
        fan_in = (ci // g) * k
        w = jax.random.normal(wk, (co, ci // g, k), jnp.float32) / jnp.sqrt(float(fan_in))
        b = 0.01 * jax.random.normal(bk, (co,), jnp.float32)
        convs.append((w, b))
    ci, co, k, s, p, g = POST_CFG
    key, wk, bk = jax.random.split(key, 3)
    fan_in = (ci // g) * k
    w_post = jax.random.normal(wk, (co, ci // g, k), jnp.float32) / jnp.sqrt(float(fan_in))
    b_post = 0.01 * jax.random.normal(bk, (co,), jnp.float32)
    return {"convs": convs, "conv_post": (w_post, b_post)}


def discriminator_s(params, x):
    fmap = []
    for (w, b), (ci, co, k, s, p, g) in zip(params["convs"], CONV_CFGS):
        x = conv1d_pallas(x, w, b, stride=s, padding=p, groups=g, apply_lrelu=True)
        fmap.append(x)
    w, b = params["conv_post"]
    ci, co, k, s, p, g = POST_CFG
    x = conv1d_pallas(x, w, b, stride=s, padding=p, groups=g, apply_lrelu=False)
    fmap.append(x)
    x_flat = x.reshape(x.shape[0], -1).astype(jnp.float32)   # torch.flatten(x, 1, -1)
    return x_flat, fmap


def multi_scale_discriminator(all_params, clean_audio, clean_audio_predicted):
    y, y_hat = clean_audio, clean_audio_predicted
    y_d_rs, y_d_gs, fmap_rs, fmap_gs = [], [], [], []
    for i in range(3):
        if i != 0:
            y = avgpool1d_pallas(y)
            y_hat = avgpool1d_pallas(y_hat)
        y_d_r, fmap_r = discriminator_s(all_params[i], y)
        y_d_g, fmap_g = discriminator_s(all_params[i], y_hat)
        y_d_rs.append(y_d_r)
        fmap_rs.append(fmap_r)
        y_d_gs.append(y_d_g)
        fmap_gs.append(fmap_g)
    return {
        "real_estimation": y_d_rs,
        "fake_estimation": y_d_gs,
        "real_fmap": fmap_rs,
        "fake_fmap": fmap_gs,
    }


def _conv_reference(x, w, b, stride, padding, groups):
    """XLA reference conv on bf16-cast inputs (matches kernel's quantization)."""
    xb = x.astype(jnp.bfloat16).astype(jnp.float32)
    wb = w.astype(jnp.bfloat16).astype(jnp.float32)
    out = jax.lax.conv_general_dilated(
        xb, wb, window_strides=(stride,), padding=[(padding, padding)],
        dimension_numbers=("NCH", "OIH", "NCH"), feature_group_count=groups)
    return out + b.astype(jnp.float32)[None, :, None]


if __name__ == "__main__":
    key = jax.random.PRNGKey(0)

    # ---- numeric sanity checks (MXU grouped path + VPU reduce path) ----
    key, kx, kw, kb = jax.random.split(key, 4)
    xt = jax.random.normal(kx, (2, 128, 96), jnp.float32)
    wt = jax.random.normal(kw, (256, 8, 41), jnp.float32) / jnp.sqrt(8.0 * 41.0)
    bt = 0.01 * jax.random.normal(kb, (256,), jnp.float32)
    got = conv1d_pallas(xt, wt, bt, stride=2, padding=20, groups=16,
                        apply_lrelu=False).astype(jnp.float32)
    ref = _conv_reference(xt, wt, bt, 2, 20, 16)
    err = float(jnp.max(jnp.abs(got - ref)))
    assert err < 0.2, f"grouped conv mismatch: max abs err {err}"

    key, kp = jax.random.split(key)
    xa = jax.random.normal(kp, (2, 1, 16), jnp.float32)
    pa = avgpool1d_pallas(xa).astype(jnp.float32)
    xap = jnp.pad(xa, ((0, 0), (0, 0), (2, 2)))
    ref_p = jnp.stack([xap[:, :, 2 * i:2 * i + 4].mean(-1) for i in range(9)], axis=-1)
    err_p = float(jnp.max(jnp.abs(pa - ref_p)))
    assert err_p < 0.05, f"avgpool mismatch: max abs err {err_p}"

    # ---- full MultiScaleDiscriminator forward ----
    key, ka, kg = jax.random.split(key, 3)
    N, L = 2, 128
    clean_audio = jax.random.normal(ka, (N, 1, L), jnp.float32)
    clean_audio_predicted = jax.random.normal(kg, (N, 1, L), jnp.float32)

    all_params = []
    for _ in range(3):
        key, sub = jax.random.split(key)
        all_params.append(init_discriminator_params(sub))

    out = multi_scale_discriminator(all_params, clean_audio, clean_audio_predicted)
    out = jax.block_until_ready(out)

    # light structural sanity checks
    assert len(out["real_estimation"]) == 3
    assert len(out["fake_estimation"]) == 3
    assert len(out["real_fmap"]) == 3 and all(len(f) == 8 for f in out["real_fmap"])
    assert len(out["fake_fmap"]) == 3 and all(len(f) == 8 for f in out["fake_fmap"])
    assert out["real_estimation"][0].shape[0] == N

    print("KERNEL_OK")
</pallas_src>

<mosaic_0001>
module attributes {stable_mosaic.version = 11 : i64} {
  func.func @body(%arg0: i32, %arg1: i32, %arg2: i32, %arg3: memref<64x328xbf16, #tpu.memory_space<vmem>>, %arg4: memref<64x1xf32, #tpu.memory_space<vmem>>, %arg5: memref<1x2x32x128xbf16, #tpu.memory_space<vmem>>, %arg6: memref<1x2x32x128xbf16, #tpu.memory_space<vmem>>, %arg7: memref<1x64x128xbf16, #tpu.memory_space<vmem>>) attributes {dimension_semantics = [#tpu.dimension_semantics<parallel>, #tpu.dimension_semantics<parallel>, #tpu.dimension_semantics<parallel>], iteration_bounds = array<i64: 2, 4, 1>, scalar_prefetch = 0 : i64, scratch_operands = 0 : i64, tpu.core_type = #tpu.core_type<tc>, window_params = [{transform_indices = @transform_0, window_bounds = array<i64: 64, 328>}, {transform_indices = @transform_1, window_bounds = array<i64: 64, 1>}, {transform_indices = @transform_2, window_bounds = array<i64: 1, 2, 32, 128>}, {transform_indices = @transform_3, window_bounds = array<i64: 1, 2, 32, 128>}, {transform_indices = @transform_4, window_bounds = array<i64: 1, 64, 128>}]} {
    %c0 = arith.constant 0 : index
    %c0_0 = arith.constant 0 : index
    %c0_1 = arith.constant 0 : index
    %c0_2 = arith.constant 0 : index
    %0 = vector.load %arg5[%c0, %c0_0, %c0_1, %c0_2] : memref<1x2x32x128xbf16, #tpu.memory_space<vmem>>, vector<1x2x32x128xbf16>
    %1 = vector.shape_cast %0 : vector<1x2x32x128xbf16> to vector<2x32x128xbf16>
    %c0_3 = arith.constant 0 : index
    %c0_4 = arith.constant 0 : index
    %c0_5 = arith.constant 0 : index
    %c0_6 = arith.constant 0 : index
    %2 = vector.load %arg6[%c0_3, %c0_4, %c0_5, %c0_6] : memref<1x2x32x128xbf16, #tpu.memory_space<vmem>>, vector<1x2x32x128xbf16>
    %3 = vector.shape_cast %2 : vector<1x2x32x128xbf16> to vector<2x32x128xbf16>
    %4 = tpu.concatenate %1, %3 in 2 : vector<2x32x128xbf16>, vector<2x32x128xbf16> -> vector<2x32x256xbf16>
    %5 = vector.extract_strided_slice %4 {offsets = [0, 0, 0], sizes = [1, 8, 128], strides = [1, 1, 1]} : vector<2x32x256xbf16> to vector<1x8x128xbf16>
    %6 = vector.shape_cast %5 : vector<1x8x128xbf16> to vector<8x128xbf16>
    %7 = vector.extract_strided_slice %4 {offsets = [1, 0, 0], sizes = [1, 8, 128], strides = [1, 1, 1]} : vector<2x32x256xbf16> to vector<1x8x128xbf16>
    %8 = vector.shape_cast %7 : vector<1x8x128xbf16> to vector<8x128xbf16>
    %9 = vector.extract_strided_slice %4 {offsets = [0, 0, 1], sizes = [1, 8, 128], strides = [1, 1, 1]} : vector<2x32x256xbf16> to vector<1x8x128xbf16>
    %10 = vector.shape_cast %9 : vector<1x8x128xbf16> to vector<8x128xbf16>
    %11 = vector.extract_strided_slice %4 {offsets = [1, 0, 1], sizes = [1, 8, 128], strides = [1, 1, 1]} : vector<2x32x256xbf16> to vector<1x8x128xbf16>
    %12 = vector.shape_cast %11 : vector<1x8x128xbf16> to vector<8x128xbf16>
    %13 = vector.extract_strided_slice %4 {offsets = [0, 0, 2], sizes = [1, 8, 128], strides = [1, 1, 1]} : vector<2x32x256xbf16> to vector<1x8x128xbf16>
    %14 = vector.shape_cast %13 : vector<1x8x128xbf16> to vector<8x128xbf16>
    %15 = vector.extract_strided_slice %4 {offsets = [1, 0, 2], sizes = [1, 8, 128], strides = [1, 1, 1]} : vector<2x32x256xbf16> to vector<1x8x128xbf16>
    %16 = vector.shape_cast %15 : vector<1x8x128xbf16> to vector<8x128xbf16>
    %17 = vector.extract_strided_slice %4 {offsets = [0, 0, 3], sizes = [1, 8, 128], strides = [1, 1, 1]} : vector<2x32x256xbf16> to vector<1x8x128xbf16>
    %18 = vector.shape_cast %17 : vector<1x8x128xbf16> to vector<8x128xbf16>
    %19 = vector.extract_strided_slice %4 {offsets = [1, 0, 3], sizes = [1, 8, 128], strides = [1, 1, 1]} : vector<2x32x256xbf16> to vector<1x8x128xbf16>
    %20 = vector.shape_cast %19 : vector<1x8x128xbf16> to vector<8x128xbf16>
    %21 = vector.extract_strided_slice %4 {offsets = [0, 0, 4], sizes = [1, 8, 128], strides = [1, 1, 1]} : vector<2x32x256xbf16> to vector<1x8x128xbf16>
    %22 = vector.shape_cast %21 : vector<1x8x128xbf16> to vector<8x128xbf16>
    %23 = vector.extract_strided_slice %4 {offsets = [1, 0, 4], sizes = [1, 8, 128], strides = [1, 1, 1]} : vector<2x32x256xbf16> to vector<1x8x128xbf16>
    %24 = vector.shape_cast %23 : vector<1x8x128xbf16> to vector<8x128xbf16>
    %25 = vector.extract_strided_slice %4 {offsets = [0, 0, 5], sizes = [1, 8, 128], strides = [1, 1, 1]} : vector<2x32x256xbf16> to vector<1x8x128xbf16>
    %26 = vector.shape_cast %25 : vector<1x8x128xbf16> to vector<8x128xbf16>
    %27 = vector.extract_strided_slice %4 {offsets = [1, 0, 5], sizes = [1, 8, 128], strides = [1, 1, 1]} : vector<2x32x256xbf16> to vector<1x8x128xbf16>
    %28 = vector.shape_cast %27 : vector<1x8x128xbf16> to vector<8x128xbf16>
    %29 = vector.extract_strided_slice %4 {offsets = [0, 0, 6], sizes = [1, 8, 128], strides = [1, 1, 1]} : vector<2x32x256xbf16> to vector<1x8x128xbf16>
    %30 = vector.shape_cast %29 : vector<1x8x128xbf16> to vector<8x128xbf16>
    %31 = vector.extract_strided_slice %4 {offsets = [1, 0, 6], sizes = [1, 8, 128], strides = [1, 1, 1]} : vector<2x32x256xbf16> to vector<1x8x128xbf16>
    %32 = vector.shape_cast %31 : vector<1x8x128xbf16> to vector<8x128xbf16>
    %33 = vector.extract_strided_slice %4 {offsets = [0, 0, 7], sizes = [1, 8, 128], strides = [1, 1, 1]} : vector<2x32x256xbf16> to vector<1x8x128xbf16>
    %34 = vector.shape_cast %33 : vector<1x8x128xbf16> to vector<8x128xbf16>
    %35 = vector.extract_strided_slice %4 {offsets = [1, 0, 7], sizes = [1, 8, 128], strides = [1, 1, 1]} : vector<2x32x256xbf16> to vector<1x8x128xbf16>
    %36 = vector.shape_cast %35 : vector<1x8x128xbf16> to vector<8x128xbf16>
    %37 = vector.extract_strided_slice %4 {offsets = [0, 0, 8], sizes = [1, 8, 128], strides = [1, 1, 1]} : vector<2x32x256xbf16> to vector<1x8x128xbf16>
    %38 = vector.shape_cast %37 : vector<1x8x128xbf16> to vector<8x128xbf16>
    %39 = vector.extract_strided_slice %4 {offsets = [1, 0, 8], sizes = [1, 8, 128], strides = [1, 1, 1]} : vector<2x32x256xbf16> to vector<1x8x128xbf16>
    %40 = vector.shape_cast %39 : vector<1x8x128xbf16> to vector<8x128xbf16>
    %41 = vector.extract_strided_slice %4 {offsets = [0, 0, 9], sizes = [1, 8, 128], strides = [1, 1, 1]} : vector<2x32x256xbf16> to vector<1x8x128xbf16>
    %42 = vector.shape_cast %41 : vector<1x8x128xbf16> to vector<8x128xbf16>
    %43 = vector.extract_strided_slice %4 {offsets = [1, 0, 9], sizes = [1, 8, 128], strides = [1, 1, 1]} : vector<2x32x256xbf16> to vector<1x8x128xbf16>
    %44 = vector.shape_cast %43 : vector<1x8x128xbf16> to vector<8x128xbf16>
    %45 = vector.extract_strided_slice %4 {offsets = [0, 0, 10], sizes = [1, 8, 128], strides = [1, 1, 1]} : vector<2x32x256xbf16> to vector<1x8x128xbf16>
    %46 = vector.shape_cast %45 : vector<1x8x128xbf16> to vector<8x128xbf16>
    %47 = vector.extract_strided_slice %4 {offsets = [1, 0, 10], sizes = [1, 8, 128], strides = [1, 1, 1]} : vector<2x32x256xbf16> to vector<1x8x128xbf16>
    %48 = vector.shape_cast %47 : vector<1x8x128xbf16> to vector<8x128xbf16>
    %49 = vector.extract_strided_slice %4 {offsets = [0, 0, 11], sizes = [1, 8, 128], strides = [1, 1, 1]} : vector<2x32x256xbf16> to vector<1x8x128xbf16>
    %50 = vector.shape_cast %49 : vector<1x8x128xbf16> to vector<8x128xbf16>
    %51 = vector.extract_strided_slice %4 {offsets = [1, 0, 11], sizes = [1, 8, 128], strides = [1, 1, 1]} : vector<2x32x256xbf16> to vector<1x8x128xbf16>
    %52 = vector.shape_cast %51 : vector<1x8x128xbf16> to vector<8x128xbf16>
    %53 = vector.extract_strided_slice %4 {offsets = [0, 0, 12], sizes = [1, 8, 128], strides = [1, 1, 1]} : vector<2x32x256xbf16> to vector<1x8x128xbf16>
    %54 = vector.shape_cast %53 : vector<1x8x128xbf16> to vector<8x128xbf16>
    %55 = vector.extract_strided_slice %4 {offsets = [1, 0, 12], sizes = [1, 8, 128], strides = [1, 1, 1]} : vector<2x32x256xbf16> to vector<1x8x128xbf16>
    %56 = vector.shape_cast %55 : vector<1x8x128xbf16> to vector<8x128xbf16>
    %57 = vector.extract_strided_slice %4 {offsets = [0, 0, 13], sizes = [1, 8, 128], strides = [1, 1, 1]} : vector<2x32x256xbf16> to vector<1x8x128xbf16>
    %58 = vector.shape_cast %57 : vector<1x8x128xbf16> to vector<8x128xbf16>
    %59 = vector.extract_strided_slice %4 {offsets = [1, 0, 13], sizes = [1, 8, 128], strides = [1, 1, 1]} : vector<2x32x256xbf16> to vector<1x8x128xbf16>
    %60 = vector.shape_cast %59 : vector<1x8x128xbf16> to vector<8x128xbf16>
    %61 = vector.extract_strided_slice %4 {offsets = [0, 0, 14], sizes = [1, 8, 128], strides = [1, 1, 1]} : vector<2x32x256xbf16> to vector<1x8x128xbf16>
    %62 = vector.shape_cast %61 : vector<1x8x128xbf16> to vector<8x128xbf16>
    %63 = vector.extract_strided_slice %4 {offsets = [1, 0, 14], sizes = [1, 8, 128], strides = [1, 1, 1]} : vector<2x32x256xbf16> to vector<1x8x128xbf16>
    %64 = vector.shape_cast %63 : vector<1x8x128xbf16> to vector<8x128xbf16>
    %65 = vector.extract_strided_slice %4 {offsets = [0, 0, 15], sizes = [1, 8, 128], strides = [1, 1, 1]} : vector<2x32x256xbf16> to vector<1x8x128xbf16>
    %66 = vector.shape_cast %65 : vector<1x8x128xbf16> to vector<8x128xbf16>
    %67 = vector.extract_strided_slice %4 {offsets = [1, 0, 15], sizes = [1, 8, 128], strides = [1, 1, 1]} : vector<2x32x256xbf16> to vector<1x8x128xbf16>
    %68 = vector.shape_cast %67 : vector<1x8x128xbf16> to vector<8x128xbf16>
    %69 = vector.extract_strided_slice %4 {offsets = [0, 0, 16], sizes = [1, 8, 128], strides = [1, 1, 1]} : vector<2x32x256xbf16> to vector<1x8x128xbf16>
    %70 = vector.shape_cast %69 : vector<1x8x128xbf16> to vector<8x128xbf16>
    %71 = vector.extract_strided_slice %4 {offsets = [1, 0, 16], sizes = [1, 8, 128], strides = [1, 1, 1]} : vector<2x32x256xbf16> to vector<1x8x128xbf16>
    %72 = vector.shape_cast %71 : vector<1x8x128xbf16> to vector<8x128xbf16>
    %73 = vector.extract_strided_slice %4 {offsets = [0, 0, 17], sizes = [1, 8, 128], strides = [1, 1, 1]} : vector<2x32x256xbf16> to vector<1x8x128xbf16>
    %74 = vector.shape_cast %73 : vector<1x8x128xbf16> to vector<8x128xbf16>
    %75 = vector.extract_strided_slice %4 {offsets = [1, 0, 17], sizes = [1, 8, 128], strides = [1, 1, 1]} : vector<2x32x256xbf16> to vector<1x8x128xbf16>
    %76 = vector.shape_cast %75 : vector<1x8x128xbf16> to vector<8x128xbf16>
    %77 = vector.extract_strided_slice %4 {offsets = [0, 0, 18], sizes = [1, 8, 128], strides = [1, 1, 1]} : vector<2x32x256xbf16> to vector<1x8x128xbf16>
    %78 = vector.shape_cast %77 : vector<1x8x128xbf16> to vector<8x128xbf16>
    %79 = vector.extract_strided_slice %4 {offsets = [1, 0, 18], sizes = [1, 8, 128], strides = [1, 1, 1]} : vector<2x32x256xbf16> to vector<1x8x128xbf16>
    %80 = vector.shape_cast %79 : vector<1x8x128xbf16> to vector<8x128xbf16>
    %81 = vector.extract_strided_slice %4 {offsets = [0, 0, 19], sizes = [1, 8, 128], strides = [1, 1, 1]} : vector<2x32x256xbf16> to vector<1x8x128xbf16>
    %82 = vector.shape_cast %81 : vector<1x8x128xbf16> to vector<8x128xbf16>
    %83 = vector.extract_strided_slice %4 {offsets = [1, 0, 19], sizes = [1, 8, 128], strides = [1, 1, 1]} : vector<2x32x256xbf16> to vector<1x8x128xbf16>
    %84 = vector.shape_cast %83 : vector<1x8x128xbf16> to vector<8x128xbf16>
    %85 = vector.extract_strided_slice %4 {offsets = [0, 0, 20], sizes = [1, 8, 128], strides = [1, 1, 1]} : vector<2x32x256xbf16> to vector<1x8x128xbf16>
    %86 = vector.shape_cast %85 : vector<1x8x128xbf16> to vector<8x128xbf16>
    %87 = arith.extf %6 : vector<8x128xbf16> to vector<8x128xf32>
    %88 = arith.extf %8 : vector<8x128xbf16> to vector<8x128xf32>
    %89 = arith.extf %10 : vector<8x128xbf16> to vector<8x128xf32>
    %90 = arith.extf %12 : vector<8x128xbf16> to vector<8x128xf32>
    %91 = arith.extf %14 : vector<8x128xbf16> to vector<8x128xf32>
    %92 = arith.extf %16 : vector<8x128xbf16> to vector<8x128xf32>
    %93 = arith.extf %18 : vector<8x128xbf16> to vector<8x128xf32>
    %94 = arith.extf %20 : vector<8x128xbf16> to vector<8x128xf32>
    %95 = arith.extf %22 : vector<8x128xbf16> to vector<8x128xf32>
    %96 = arith.extf %24 : vector<8x128xbf16> to vector<8x128xf32>
    %97 = arith.extf %26 : vector<8x128xbf16> to vector<8x128xf32>
    %98 = arith.extf %28 : vector<8x128xbf16> to vector<8x128xf32>
    %99 = arith.extf %30 : vector<8x128xbf16> to vector<8x128xf32>
    %100 = arith.extf %32 : vector<8x128xbf16> to vector<8x128xf32>
    %101 = arith.extf %34 : vector<8x128xbf16> to vector<8x128xf32>
    %102 = arith.extf %36 : vector<8x128xbf16> to vector<8x128xf32>
    %103 = arith.extf %38 : vector<8x128xbf16> to vector<8x128xf32>
    %104 = arith.extf %40 : vector<8x128xbf16> to vector<8x128xf32>
    %105 = arith.extf %42 : vector<8x128xbf16> to vector<8x128xf32>
    %106 = arith.extf %44 : vector<8x128xbf16> to vector<8x128xf32>
    %107 = arith.extf %46 : vector<8x128xbf16> to vector<8x128xf32>
    %108 = arith.extf %48 : vector<8x128xbf16> to vector<8x128xf32>
    %109 = arith.extf %50 : vector<8x128xbf16> to vector<8x128xf32>
    %110 = arith.extf %52 : vector<8x128xbf16> to vector<8x128xf32>
    %111 = arith.extf %54 : vector<8x128xbf16> to vector<8x128xf32>
    %112 = arith.extf %56 : vector<8x128xbf16> to vector<8x128xf32>
    %113 = arith.extf %58 : vector<8x128xbf16> to vector<8x128xf32>
    %114 = arith.extf %60 : vector<8x128xbf16> to vector<8x128xf32>
    %115 = arith.extf %62 : vector<8x128xbf16> to vector<8x128xf32>
    %116 = arith.extf %64 : vector<8x128xbf16> to vector<8x128xf32>
    %117 = arith.extf %66 : vector<8x128xbf16> to vector<8x128xf32>
    %118 = arith.extf %68 : vector<8x128xbf16> to vector<8x128xf32>
    %119 = arith.extf %70 : vector<8x128xbf16> to vector<8x128xf32>
    %120 = arith.extf %72 : vector<8x128xbf16> to vector<8x128xf32>
    %121 = arith.extf %74 : vector<8x128xbf16> to vector<8x128xf32>
    %122 = arith.extf %76 : vector<8x128xbf16> to vector<8x128xf32>
    %123 = arith.extf %78 : vector<8x128xbf16> to vector<8x128xf32>
    %124 = arith.extf %80 : vector<8x128xbf16> to vector<8x128xf32>
    %125 = arith.extf %82 : vector<8x128xbf16> to vector<8x128xf32>
    %126 = arith.extf %84 : vector<8x128xbf16> to vector<8x128xf32>
    %127 = arith.extf %86 : vector<8x128xbf16> to vector<8x128xf32>
    %128 = tpu.concatenate %87, %88, %89, %90, %91, %92, %93, %94, %95, %96, %97, %98, %99, %100, %101, %102 in 0 : vector<8x128xf32>, vector<8x128xf32>, vector<8x128xf32>, vector<8x128xf32>, vector<8x128xf32>, vector<8x128xf32>, vector<8x128xf32>, vector<8x128xf32>, vector<8x128xf32>, vector<8x128xf32>, vector<8x128xf32>, vector<8x128xf32>, vector<8x128xf32>, vector<8x128xf32>, vector<8x128xf32>, vector<8x128xf32> -> vector<128x128xf32>
    %129 = tpu.concatenate %103, %104, %105, %106, %107, %108, %109, %110, %111, %112, %113, %114, %115, %116, %117, %118 in 0 : vector<8x128xf32>, vector<8x128xf32>, vector<8x128xf32>, vector<8x128xf32>, vector<8x128xf32>, vector<8x128xf32>, vector<8x128xf32>, vector<8x128xf32>, vector<8x128xf32>, vector<8x128xf32>, vector<8x128xf32>, vector<8x128xf32>, vector<8x128xf32>, vector<8x128xf32>, vector<8x128xf32>, vector<8x128xf32> -> vector<128x128xf32>
    %130 = tpu.concatenate %119, %120, %121, %122, %123, %124, %125, %126, %127 in 0 : vector<8x128xf32>, vector<8x128xf32>, vector<8x128xf32>, vector<8x128xf32>, vector<8x128xf32>, vector<8x128xf32>, vector<8x128xf32>, vector<8x128xf32>, vector<8x128xf32> -> vector<72x128xf32>
    %131 = tpu.concatenate %128, %129, %130 in 0 : vector<128x128xf32>, vector<128x128xf32>, vector<72x128xf32> -> vector<328x128xf32>
    %c0_7 = arith.constant 0 : index
    %c0_8 = arith.constant 0 : index
    %132 = vector.load %arg3[%c0_7, %c0_8] : memref<64x328xbf16, #tpu.memory_space<vmem>>, vector<16x328xbf16>
    %133 = arith.extf %132 : vector<16x328xbf16> to vector<16x328xf32>
    %cst = arith.constant dense<0.000000e+00> : vector<16x128xf32>
    %134 = tpu.matmul %133, %131, %cst {dimension_numbers = #tpu.dot_dimension_numbers<[1], [0], [0], [1], [0, 0, 1, 1], [], []>} : vector<16x328xf32>, vector<328x128xf32>, vector<16x128xf32> -> vector<16x128xf32>
    %c0_9 = arith.constant 0 : index
    %c0_10 = arith.constant 0 : index
    %135 = vector.load %arg4[%c0_9, %c0_10] : memref<64x1xf32, #tpu.memory_space<vmem>>, vector<16x1xf32>
    %136 = vector.broadcast %135 : vector<16x1xf32> to vector<16x128xf32>
    %137 = arith.addf %134, %136 : vector<16x128xf32>
    %138 = arith.truncf %137 : vector<16x128xf32> to vector<16x128xbf16>
    %c0_11 = arith.constant 0 : index
    %c0_12 = arith.constant 0 : index
    %c0_13 = arith.constant 0 : index
    %139 = vector.load %arg7[%c0_11, %c0_12, %c0_13] : memref<1x64x128xbf16, #tpu.memory_space<vmem>>, vector<1x16x128xbf16>
    %140 = vector.shape_cast %139 : vector<1x16x128xbf16> to vector<16x128xbf16>
    %141 = vector.shape_cast %138 : vector<16x128xbf16> to vector<1x16x128xbf16>
    tpu.vector_store %arg7[%c0_11, %c0_12, %c0_13], %141 {strides = array<i32>} : memref<1x64x128xbf16, #tpu.memory_space<vmem>>, vector<1x16x128xbf16>,
    %142 = vector.extract_strided_slice %4 {offsets = [0, 8, 0], sizes = [1, 8, 128], strides = [1, 1, 1]} : vector<2x32x256xbf16> to vector<1x8x128xbf16>
    %143 = vector.shape_cast %142 : vector<1x8x128xbf16> to vector<8x128xbf16>
    %144 = vector.extract_strided_slice %4 {offsets = [1, 8, 0], sizes = [1, 8, 128], strides = [1, 1, 1]} : vector<2x32x256xbf16> to vector<1x8x128xbf16>
    %145 = vector.shape_cast %144 : vector<1x8x128xbf16> to vector<8x128xbf16>
    %146 = vector.extract_strided_slice %4 {offsets = [0, 8, 1], sizes = [1, 8, 128], strides = [1, 1, 1]} : vector<2x32x256xbf16> to vector<1x8x128xbf16>
    %147 = vector.shape_cast %146 : vector<1x8x128xbf16> to vector<8x128xbf16>
    %148 = vector.extract_strided_slice %4 {offsets = [1, 8, 1], sizes = [1, 8, 128], strides = [1, 1, 1]} : vector<2x32x256xbf16> to vector<1x8x128xbf16>
    %149 = vector.shape_cast %148 : vector<1x8x128xbf16> to vector<8x128xbf16>
    %150 = vector.extract_strided_slice %4 {offsets = [0, 8, 2], sizes = [1, 8, 128], strides = [1, 1, 1]} : vector<2x32x256xbf16> to vector<1x8x128xbf16>
    %151 = vector.shape_cast %150 : vector<1x8x128xbf16> to vector<8x128xbf16>
    %152 = vector.extract_strided_slice %4 {offsets = [1, 8, 2], sizes = [1, 8, 128], strides = [1, 1, 1]} : vector<2x32x256xbf16> to vector<1x8x128xbf16>
    %153 = vector.shape_cast %152 : vector<1x8x128xbf16> to vector<8x128xbf16>
    %154 = vector.extract_strided_slice %4 {offsets = [0, 8, 3], sizes = [1, 8, 128], strides = [1, 1, 1]} : vector<2x32x256xbf16> to vector<1x8x128xbf16>
    %155 = vector.shape_cast %154 : vector<1x8x128xbf16> to vector<8x128xbf16>
    %156 = vector.extract_strided_slice %4 {offsets = [1, 8, 3], sizes = [1, 8, 128], strides = [1, 1, 1]} : vector<2x32x256xbf16> to vector<1x8x128xbf16>
    %157 = vector.shape_cast %156 : vector<1x8x128xbf16> to vector<8x128xbf16>
    %158 = vector.extract_strided_slice %4 {offsets = [0, 8, 4], sizes = [1, 8, 128], strides = [1, 1, 1]} : vector<2x32x256xbf16> to vector<1x8x128xbf16>
    %159 = vector.shape_cast %158 : vector<1x8x128xbf16> to vector<8x128xbf16>
    %160 = vector.extract_strided_slice %4 {offsets = [1, 8, 4], sizes = [1, 8, 128], strides = [1, 1, 1]} : vector<2x32x256xbf16> to vector<1x8x128xbf16>
    %161 = vector.shape_cast %160 : vector<1x8x128xbf16> to vector<8x128xbf16>
    %162 = vector.extract_strided_slice %4 {offsets = [0, 8, 5], sizes = [1, 8, 128], strides = [1, 1, 1]} : vector<2x32x256xbf16> to vector<1x8x128xbf16>
    %163 = vector.shape_cast %162 : vector<1x8x128xbf16> to vector<8x128xbf16>
    %164 = vector.extract_strided_slice %4 {offsets = [1, 8, 5], sizes = [1, 8, 128], strides = [1, 1, 1]} : vector<2x32x256xbf16> to vector<1x8x128xbf16>
    %165 = vector.shape_cast %164 : vector<1x8x128xbf16> to vector<8x128xbf16>
    %166 = vector.extract_strided_slice %4 {offsets = [0, 8, 6], sizes = [1, 8, 128], strides = [1, 1, 1]} : vector<2x32x256xbf16> to vector<1x8x128xbf16>
    %167 = vector.shape_cast %166 : vector<1x8x128xbf16> to vector<8x128xbf16>
    %168 = vector.extract_strided_slice %4 {offsets = [1, 8, 6], sizes = [1, 8, 128], strides = [1, 1, 1]} : vector<2x32x256xbf16> to vector<1x8x128xbf16>
    %169 = vector.shape_cast %168 : vector<1x8x128xbf16> to vector<8x128xbf16>
    %170 = vector.extract_strided_slice %4 {offsets = [0, 8, 7], sizes = [1, 8, 128], strides = [1, 1, 1]} : vector<2x32x256xbf16> to vector<1x8x128xbf16>
    %171 = vector.shape_cast %170 : vector<1x8x128xbf16> to vector<8x128xbf16>
    %172 = vector.extract_strided_slice %4 {offsets = [1, 8, 7], sizes = [1, 8, 128], strides = [1, 1, 1]} : vector<2x32x256xbf16> to vector<1x8x128xbf16>
    %173 = vector.shape_cast %172 : vector<1x8x128xbf16> to vector<8x128xbf16>
    %174 = vector.extract_strided_slice %4 {offsets = [0, 8, 8], sizes = [1, 8, 128], strides = [1, 1, 1]} : vector<2x32x256xbf16> to vector<1x8x128xbf16>
    %175 = vector.shape_cast %174 : vector<1x8x128xbf16> to vector<8x128xbf16>
    %176 = vector.extract_strided_slice %4 {offsets = [1, 8, 8], sizes = [1, 8, 128], strides = [1, 1, 1]} : vector<2x32x256xbf16> to vector<1x8x128xbf16>
    %177 = vector.shape_cast %176 : vector<1x8x128xbf16> to vector<8x128xbf16>
    %178 = vector.extract_strided_slice %4 {offsets = [0, 8, 9], sizes = [1, 8, 128], strides = [1, 1, 1]} : vector<2x32x256xbf16> to vector<1x8x128xbf16>
    %179 = vector.shape_cast %178 : vector<1x8x128xbf16> to vector<8x128xbf16>
    %180 = vector.extract_strided_slice %4 {offsets = [1, 8, 9], sizes = [1, 8, 128], strides = [1, 1, 1]} : vector<2x32x256xbf16> to vector<1x8x128xbf16>
    %181 = vector.shape_cast %180 : vector<1x8x128xbf16> to vector<8x128xbf16>
    %182 = vector.extract_strided_slice %4 {offsets = [0, 8, 10], sizes = [1, 8, 128], strides = [1, 1, 1]} : vector<2x32x256xbf16> to vector<1x8x128xbf16>
    %183 = vector.shape_cast %182 : vector<1x8x128xbf16> to vector<8x128xbf16>
    %184 = vector.extract_strided_slice %4 {offsets = [1, 8, 10], sizes = [1, 8, 128], strides = [1, 1, 1]} : vector<2x32x256xbf16> to vector<1x8x128xbf16>
    %185 = vector.shape_cast %184 : vector<1x8x128xbf16> to vector<8x128xbf16>
    %186 = vector.extract_strided_slice %4 {offsets = [0, 8, 11], sizes = [1, 8, 128], strides = [1, 1, 1]} : vector<2x32x256xbf16> to vector<1x8x128xbf16>
    %187 = vector.shape_cast %186 : vector<1x8x128xbf16> to vector<8x128xbf16>
    %188 = vector.extract_strided_slice %4 {offsets = [1, 8, 11], sizes = [1, 8, 128], strides = [1, 1, 1]} : vector<2x32x256xbf16> to vector<1x8x128xbf16>
    %189 = vector.shape_cast %188 : vector<1x8x128xbf16> to vector<8x128xbf16>
    %190 = vector.extract_strided_slice %4 {offsets = [0, 8, 12], sizes = [1, 8, 128], strides = [1, 1, 1]} : vector<2x32x256xbf16> to vector<1x8x128xbf16>
    %191 = vector.shape_cast %190 : vector<1x8x128xbf16> to vector<8x128xbf16>
    %192 = vector.extract_strided_slice %4 {offsets = [1, 8, 12], sizes = [1, 8, 128], strides = [1, 1, 1]} : vector<2x32x256xbf16> to vector<1x8x128xbf16>
    %193 = vector.shape_cast %192 : vector<1x8x128xbf16> to vector<8x128xbf16>
    %194 = vector.extract_strided_slice %4 {offsets = [0, 8, 13], sizes = [1, 8, 128], strides = [1, 1, 1]} : vector<2x32x256xbf16> to vector<1x8x128xbf16>
    %195 = vector.shape_cast %194 : vector<1x8x128xbf16> to vector<8x128xbf16>
    %196 = vector.extract_strided_slice %4 {offsets = [1, 8, 13], sizes = [1, 8, 128], strides = [1, 1, 1]} : vector<2x32x256xbf16> to vector<1x8x128xbf16>
    %197 = vector.shape_cast %196 : vector<1x8x128xbf16> to vector<8x128xbf16>
    %198 = vector.extract_strided_slice %4 {offsets = [0, 8, 14], sizes = [1, 8, 128], strides = [1, 1, 1]} : vector<2x32x256xbf16> to vector<1x8x128xbf16>
    %199 = vector.shape_cast %198 : vector<1x8x128xbf16> to vector<8x128xbf16>
    %200 = vector.extract_strided_slice %4 {offsets = [1, 8, 14], sizes = [1, 8, 128], strides = [1, 1, 1]} : vector<2x32x256xbf16> to vector<1x8x128xbf16>
    %201 = vector.shape_cast %200 : vector<1x8x128xbf16> to vector<8x128xbf16>
    %202 = vector.extract_strided_slice %4 {offsets = [0, 8, 15], sizes = [1, 8, 128], strides = [1, 1, 1]} : vector<2x32x256xbf16> to vector<1x8x128xbf16>
    %203 = vector.shape_cast %202 : vector<1x8x128xbf16> to vector<8x128xbf16>
    %204 = vector.extract_strided_slice %4 {offsets = [1, 8, 15], sizes = [1, 8, 128], strides = [1, 1, 1]} : vector<2x32x256xbf16> to vector<1x8x128xbf16>
    %205 = vector.shape_cast %204 : vector<1x8x128xbf16> to vector<8x128xbf16>
    %206 = vector.extract_strided_slice %4 {offsets = [0, 8, 16], sizes = [1, 8, 128], strides = [1, 1, 1]} : vector<2x32x256xbf16> to vector<1x8x128xbf16>
    %207 = vector.shape_cast %206 : vector<1x8x128xbf16> to vector<8x128xbf16>
    %208 = vector.extract_strided_slice %4 {offsets = [1, 8, 16], sizes = [1, 8, 128], strides = [1, 1, 1]} : vector<2x32x256xbf16> to vector<1x8x128xbf16>
    %209 = vector.shape_cast %208 : vector<1x8x128xbf16> to vector<8x128xbf16>
    %210 = vector.extract_strided_slice %4 {offsets = [0, 8, 17], sizes = [1, 8, 128], strides = [1, 1, 1]} : vector<2x32x256xbf16> to vector<1x8x128xbf16>
    %211 = vector.shape_cast %210 : vector<1x8x128xbf16> to vector<8x128xbf16>
    %212 = vector.extract_strided_slice %4 {offsets = [1, 8, 17], sizes = [1, 8, 128], strides = [1, 1, 1]} : vector<2x32x256xbf16> to vector<1x8x128xbf16>
    %213 = vector.shape_cast %212 : vector<1x8x128xbf16> to vector<8x128xbf16>
    %214 = vector.extract_strided_slice %4 {offsets = [0, 8, 18], sizes = [1, 8, 128], strides = [1, 1, 1]} : vector<2x32x256xbf16> to vector<1x8x128xbf16>
    %215 = vector.shape_cast %214 : vector<1x8x128xbf16> to vector<8x128xbf16>
    %216 = vector.extract_strided_slice %4 {offsets = [1, 8, 18], sizes = [1, 8, 128], strides = [1, 1, 1]} : vector<2x32x256xbf16> to vector<1x8x128xbf16>
    %217 = vector.shape_cast %216 : vector<1x8x128xbf16> to vector<8x128xbf16>
    %218 = vector.extract_strided_slice %4 {offsets = [0, 8, 19], sizes = [1, 8, 128], strides = [1, 1, 1]} : vector<2x32x256xbf16> to vector<1x8x128xbf16>
    %219 = vector.shape_cast %218 : vector<1x8x128xbf16> to vector<8x128xbf16>
    %220 = vector.extract_strided_slice %4 {offsets = [1, 8, 19], sizes = [1, 8, 128], strides = [1, 1, 1]} : vector<2x32x256xbf16> to vector<1x8x128xbf16>
    %221 = vector.shape_cast %220 : vector<1x8x128xbf16> to vector<8x128xbf16>
    %222 = vector.extract_strided_slice %4 {offsets = [0, 8, 20], sizes = [1, 8, 128], strides = [1, 1, 1]} : vector<2x32x256xbf16> to vector<1x8x128xbf16>
    %223 = vector.shape_cast %222 : vector<1x8x128xbf16> to vector<8x128xbf16>
    %224 = arith.extf %143 : vector<8x128xbf16> to vector<8x128xf32>
    %225 = arith.extf %145 : vector<8x128xbf16> to vector<8x128xf32>
    %226 = arith.extf %147 : vector<8x128xbf16> to vector<8x128xf32>
    %227 = arith.extf %149 : vector<8x128xbf16> to vector<8x128xf32>
    %228 = arith.extf %151 : vector<8x128xbf16> to vector<8x128xf32>
    %229 = arith.extf %153 : vector<8x128xbf16> to vector<8x128xf32>
    %230 = arith.extf %155 : vector<8x128xbf16> to vector<8x128xf32>
    %231 = arith.extf %157 : vector<8x128xbf16> to vector<8x128xf32>
    %232 = arith.extf %159 : vector<8x128xbf16> to vector<8x128xf32>
    %233 = arith.extf %161 : vector<8x128xbf16> to vector<8x128xf32>
    %234 = arith.extf %163 : vector<8x128xbf16> to vector<8x128xf32>
    %235 = arith.extf %165 : vector<8x128xbf16> to vector<8x128xf32>
    %236 = arith.extf %167 : vector<8x128xbf16> to vector<8x128xf32>
    %237 = arith.extf %169 : vector<8x128xbf16> to vector<8x128xf32>
    %238 = arith.extf %171 : vector<8x128xbf16> to vector<8x128xf32>
    %239 = arith.extf %173 : vector<8x128xbf16> to vector<8x128xf32>
    %240 = arith.extf %175 : vector<8x128xbf16> to vector<8x128xf32>
    %241 = arith.extf %177 : vector<8x128xbf16> to vector<8x128xf32>
    %242 = arith.extf %179 : vector<8x128xbf16> to vector<8x128xf32>
    %243 = arith.extf %181 : vector<8x128xbf16> to vector<8x128xf32>
    %244 = arith.extf %183 : vector<8x128xbf16> to vector<8x128xf32>
    %245 = arith.extf %185 : vector<8x128xbf16> to vector<8x128xf32>
    %246 = arith.extf %187 : vector<8x128xbf16> to vector<8x128xf32>
    %247 = arith.extf %189 : vector<8x128xbf16> to vector<8x128xf32>
    %248 = arith.extf %191 : vector<8x128xbf16> to vector<8x128xf32>
    %249 = arith.extf %193 : vector<8x128xbf16> to vector<8x128xf32>
    %250 = arith.extf %195 : vector<8x128xbf16> to vector<8x128xf32>
    %251 = arith.extf %197 : vector<8x128xbf16> to vector<8x128xf32>
    %252 = arith.extf %199 : vector<8x128xbf16> to vector<8x128xf32>
    %253 = arith.extf %201 : vector<8x128xbf16> to vector<8x128xf32>
    %254 = arith.extf %203 : vector<8x128xbf16> to vector<8x128xf32>
    %255 = arith.extf %205 : vector<8x128xbf16> to vector<8x128xf32>
    %256 = arith.extf %207 : vector<8x128xbf16> to vector<8x128xf32>
    %257 = arith.extf %209 : vector<8x128xbf16> to vector<8x128xf32>
    %258 = arith.extf %211 : vector<8x128xbf16> to vector<8x128xf32>
    %259 = arith.extf %213 : vector<8x128xbf16> to vector<8x128xf32>
    %260 = arith.extf %215 : vector<8x128xbf16> to vector<8x128xf32>
    %261 = arith.extf %217 : vector<8x128xbf16> to vector<8x128xf32>
    %262 = arith.extf %219 : vector<8x128xbf16> to vector<8x128xf32>
    %263 = arith.extf %221 : vector<8x128xbf16> to vector<8x128xf32>
    %264 = arith.extf %223 : vector<8x128xbf16> to vector<8x128xf32>
    %265 = tpu.concatenate %224, %225, %226, %227, %228, %229, %230, %231, %232, %233, %234, %235, %236, %237, %238, %239 in 0 : vector<8x128xf32>, vector<8x128xf32>, vector<8x128xf32>, vector<8x128xf32>, vector<8x128xf32>, vector<8x128xf32>, vector<8x128xf32>, vector<8x128xf32>, vector<8x128xf32>, vector<8x128xf32>, vector<8x128xf32>, vector<8x128xf32>, vector<8x128xf32>, vector<8x128xf32>, vector<8x128xf32>, vector<8x128xf32> -> vector<128x128xf32>
    %266 = tpu.concatenate %240, %241, %242, %243, %244, %245, %246, %247, %248, %249, %250, %251, %252, %253, %254, %255 in 0 : vector<8x128xf32>, vector<8x128xf32>, vector<8x128xf32>, vector<8x128xf32>, vector<8x128xf32>, vector<8x128xf32>, vector<8x128xf32>, vector<8x128xf32>, vector<8x128xf32>, vector<8x128xf32>, vector<8x128xf32>, vector<8x128xf32>, vector<8x128xf32>, vector<8x128xf32>, vector<8x128xf32>, vector<8x128xf32> -> vector<128x128xf32>
    %267 = tpu.concatenate %256, %257, %258, %259, %260, %261, %262, %263, %264 in 0 : vector<8x128xf32>, vector<8x128xf32>, vector<8x128xf32>, vector<8x128xf32>, vector<8x128xf32>, vector<8x128xf32>, vector<8x128xf32>, vector<8x128xf32>, vector<8x128xf32> -> vector<72x128xf32>
    %268 = tpu.concatenate %265, %266, %267 in 0 : vector<128x128xf32>, vector<128x128xf32>, vector<72x128xf32> -> vector<328x128xf32>
    %c16 = arith.constant 16 : index
    %c0_14 = arith.constant 0 : index
    %269 = vector.load %arg3[%c16, %c0_14] : memref<64x328xbf16, #tpu.memory_space<vmem>>, vector<16x328xbf16>
    %270 = arith.extf %269 : vector<16x328xbf16> to vector<16x328xf32>
    %cst_15 = arith.constant dense<0.000000e+00> : vector<16x128xf32>
    %271 = tpu.matmul %270, %268, %cst_15 {dimension_numbers = #tpu.dot_dimension_numbers<[1], [0], [0], [1], [0, 0, 1, 1], [], []>} : vector<16x328xf32>, vector<328x128xf32>, vector<16x128xf32> -> vector<16x128xf32>
    %c16_16 = arith.constant 16 : index
    %c0_17 = arith.constant 0 : index
    %272 = vector.load %arg4[%c16_16, %c0_17] : memref<64x1xf32, #tpu.memory_space<vmem>>, vector<16x1xf32>
    %273 = vector.broadcast %272 : vector<16x1xf32> to vector<16x128xf32>
    %274 = arith.addf %271, %273 : vector<16x128xf32>
    %275 = arith.truncf %274 : vector<16x128xf32> to vector<16x128xbf16>
    %c0_18 = arith.constant 0 : index
    %c16_19 = arith.constant 16 : index
    %c0_20 = arith.constant 0 : index
    %276 = vector.load %arg7[%c0_18, %c16_19, %c0_20] : memref<1x64x128xbf16, #tpu.memory_space<vmem>>, vector<1x16x128xbf16>
    %277 = vector.shape_cast %276 : vector<1x16x128xbf16> to vector<16x128xbf16>
    %278 = vector.shape_cast %275 : vector<16x128xbf16> to vector<1x16x128xbf16>
    tpu.vector_store %arg7[%c0_18, %c16_19, %c0_20], %278 {strides = array<i32>} : memref<1x64x128xbf16, #tpu.memory_space<vmem>>, vector<1x16x128xbf16>,
    %279 = vector.extract_strided_slice %4 {offsets = [0, 16, 0], sizes = [1, 8, 128], strides = [1, 1, 1]} : vector<2x32x256xbf16> to vector<1x8x128xbf16>
    %280 = vector.shape_cast %279 : vector<1x8x128xbf16> to vector<8x128xbf16>
    %281 = vector.extract_strided_slice %4 {offsets = [1, 16, 0], sizes = [1, 8, 128], strides = [1, 1, 1]} : vector<2x32x256xbf16> to vector<1x8x128xbf16>
    %282 = vector.shape_cast %281 : vector<1x8x128xbf16> to vector<8x128xbf16>
    %283 = vector.extract_strided_slice %4 {offsets = [0, 16, 1], sizes = [1, 8, 128], strides = [1, 1, 1]} : vector<2x32x256xbf16> to vector<1x8x128xbf16>
    %284 = vector.shape_cast %283 : vector<1x8x128xbf16> to vector<8x128xbf16>
    %285 = vector.extract_strided_slice %4 {offsets = [1, 16, 1], sizes = [1, 8, 128], strides = [1, 1, 1]} : vector<2x32x256xbf16> to vector<1x8x128xbf16>
    %286 = vector.shape_cast %285 : vector<1x8x128xbf16> to vector<8x128xbf16>
    %287 = vector.extract_strided_slice %4 {offsets = [0, 16, 2], sizes = [1, 8, 128], strides = [1, 1, 1]} : vector<2x32x256xbf16> to vector<1x8x128xbf16>
    %288 = vector.shape_cast %287 : vector<1x8x128xbf16> to vector<8x128xbf16>
    %289 = vector.extract_strided_slice %4 {offsets = [1, 16, 2], sizes = [1, 8, 128], strides = [1, 1, 1]} : vector<2x32x256xbf16> to vector<1x8x128xbf16>
    %290 = vector.shape_cast %289 : vector<1x8x128xbf16> to vector<8x128xbf16>
    %291 = vector.extract_strided_slice %4 {offsets = [0, 16, 3], sizes = [1, 8, 128], strides = [1, 1, 1]} : vector<2x32x256xbf16> to vector<1x8x128xbf16>
    %292 = vector.shape_cast %291 : vector<1x8x128xbf16> to vector<8x128xbf16>
    %293 = vector.extract_strided_slice %4 {offsets = [1, 16, 3], sizes = [1, 8, 128], strides = [1, 1, 1]} : vector<2x32x256xbf16> to vector<1x8x128xbf16>
    %294 = vector.shape_cast %293 : vector<1x8x128xbf16> to vector<8x128xbf16>
    %295 = vector.extract_strided_slice %4 {offsets = [0, 16, 4], sizes = [1, 8, 128], strides = [1, 1, 1]} : vector<2x32x256xbf16> to vector<1x8x128xbf16>
    %296 = vector.shape_cast %295 : vector<1x8x128xbf16> to vector<8x128xbf16>
    %297 = vector.extract_strided_slice %4 {offsets = [1, 16, 4], sizes = [1, 8, 128], strides = [1, 1, 1]} : vector<2x32x256xbf16> to vector<1x8x128xbf16>
    %298 = vector.shape_cast %297 : vector<1x8x128xbf16> to vector<8x128xbf16>
    %299 = vector.extract_strided_slice %4 {offsets = [0, 16, 5], sizes = [1, 8, 128], strides = [1, 1, 1]} : vector<2x32x256xbf16> to vector<1x8x128xbf16>
    %300 = vector.shape_cast %299 : vector<1x8x128xbf16> to vector<8x128xbf16>
    %301 = vector.extract_strided_slice %4 {offsets = [1, 16, 5], sizes = [1, 8, 128], strides = [1, 1, 1]} : vector<2x32x256xbf16> to vector<1x8x128xbf16>
    %302 = vector.shape_cast %301 : vector<1x8x128xbf16> to vector<8x128xbf16>
    %303 = vector.extract_strided_slice %4 {offsets = [0, 16, 6], sizes = [1, 8, 128], strides = [1, 1, 1]} : vector<2x32x256xbf16> to vector<1x8x128xbf16>
    %304 = vector.shape_cast %303 : vector<1x8x128xbf16> to vector<8x128xbf16>
    %305 = vector.extract_strided_slice %4 {offsets = [1, 16, 6], sizes = [1, 8, 128], strides = [1, 1, 1]} : vector<2x32x256xbf16> to vector<1x8x128xbf16>
    %306 = vector.shape_cast %305 : vector<1x8x128xbf16> to vector<8x128xbf16>
    %307 = vector.extract_strided_slice %4 {offsets = [0, 16, 7], sizes = [1, 8, 128], strides = [1, 1, 1]} : vector<2x32x256xbf16> to vector<1x8x128xbf16>
    %308 = vector.shape_cast %307 : vector<1x8x128xbf16> to vector<8x128xbf16>
    %309 = vector.extract_strided_slice %4 {offsets = [1, 16, 7], sizes = [1, 8, 128], strides = [1, 1, 1]} : vector<2x32x256xbf16> to vector<1x8x128xbf16>
    %310 = vector.shape_cast %309 : vector<1x8x128xbf16> to vector<8x128xbf16>
    %311 = vector.extract_strided_slice %4 {offsets = [0, 16, 8], sizes = [1, 8, 128], strides = [1, 1, 1]} : vector<2x32x256xbf16> to vector<1x8x128xbf16>
    %312 = vector.shape_cast %311 : vector<1x8x128xbf16> to vector<8x128xbf16>
    %313 = vector.extract_strided_slice %4 {offsets = [1, 16, 8], sizes = [1, 8, 128], strides = [1, 1, 1]} : vector<2x32x256xbf16> to vector<1x8x128xbf16>
    %314 = vector.shape_cast %313 : vector<1x8x128xbf16> to vector<8x128xbf16>
    %315 = vector.extract_strided_slice %4 {offsets = [0, 16, 9], sizes = [1, 8, 128], strides = [1, 1, 1]} : vector<2x32x256xbf16> to vector<1x8x128xbf16>
    %316 = vector.shape_cast %315 : vector<1x8x128xbf16> to vector<8x128xbf16>
    %317 = vector.extract_strided_slice %4 {offsets = [1, 16, 9], sizes = [1, 8, 128], strides = [1, 1, 1]} : vector<2x32x256xbf16> to vector<1x8x128xbf16>
    %318 = vector.shape_cast %317 : vector<1x8x128xbf16> to vector<8x128xbf16>
    %319 = vector.extract_strided_slice %4 {offsets = [0, 16, 10], sizes = [1, 8, 128], strides = [1, 1, 1]} : vector<2x32x256xbf16> to vector<1x8x128xbf16>
    %320 = vector.shape_cast %319 : vector<1x8x128xbf16> to vector<8x128xbf16>
    %321 = vector.extract_strided_slice %4 {offsets = [1, 16, 10], sizes = [1, 8, 128], strides = [1, 1, 1]} : vector<2x32x256xbf16> to vector<1x8x128xbf16>
    %322 = vector.shape_cast %321 : vector<1x8x128xbf16> to vector<8x128xbf16>
    %323 = vector.extract_strided_slice %4 {offsets = [0, 16, 11], sizes = [1, 8, 128], strides = [1, 1, 1]} : vector<2x32x256xbf16> to vector<1x8x128xbf16>
    %324 = vector.shape_cast %323 : vector<1x8x128xbf16> to vector<8x128xbf16>
    %325 = vector.extract_strided_slice %4 {offsets = [1, 16, 11], sizes = [1, 8, 128], strides = [1, 1, 1]} : vector<2x32x256xbf16> to vector<1x8x128xbf16>
    %326 = vector.shape_cast %325 : vector<1x8x128xbf16> to vector<8x128xbf16>
    %327 = vector.extract_strided_slice %4 {offsets = [0, 16, 12], sizes = [1, 8, 128], strides = [1, 1, 1]} : vector<2x32x256xbf16> to vector<1x8x128xbf16>
    %328 = vector.shape_cast %327 : vector<1x8x128xbf16> to vector<8x128xbf16>
    %329 = vector.extract_strided_slice %4 {offsets = [1, 16, 12], sizes = [1, 8, 128], strides = [1, 1, 1]} : vector<2x32x256xbf16> to vector<1x8x128xbf16>
    %330 = vector.shape_cast %329 : vector<1x8x128xbf16> to vector<8x128xbf16>
    %331 = vector.extract_strided_slice %4 {offsets = [0, 16, 13], sizes = [1, 8, 128], strides = [1, 1, 1]} : vector<2x32x256xbf16> to vector<1x8x128xbf16>
    %332 = vector.shape_cast %331 : vector<1x8x128xbf16> to vector<8x128xbf16>
    %333 = vector.extract_strided_slice %4 {offsets = [1, 16, 13], sizes = [1, 8, 128], strides = [1, 1, 1]} : vector<2x32x256xbf16> to vector<1x8x128xbf16>
    %334 = vector.shape_cast %333 : vector<1x8x128xbf16> to vector<8x128xbf16>
    %335 = vector.extract_strided_slice %4 {offsets = [0, 16, 14], sizes = [1, 8, 128], strides = [1, 1, 1]} : vector<2x32x256xbf16> to vector<1x8x128xbf16>
    %336 = vector.shape_cast %335 : vector<1x8x128xbf16> to vector<8x128xbf16>
    %337 = vector.extract_strided_slice %4 {offsets = [1, 16, 14], sizes = [1, 8, 128], strides = [1, 1, 1]} : vector<2x32x256xbf16> to vector<1x8x128xbf16>
    %338 = vector.shape_cast %337 : vector<1x8x128xbf16> to vector<8x128xbf16>
    %339 = vector.extract_strided_slice %4 {offsets = [0, 16, 15], sizes = [1, 8, 128], strides = [1, 1, 1]} : vector<2x32x256xbf16> to vector<1x8x128xbf16>
    %340 = vector.shape_cast %339 : vector<1x8x128xbf16> to vector<8x128xbf16>
    %341 = vector.extract_strided_slice %4 {offsets = [1, 16, 15], sizes = [1, 8, 128], strides = [1, 1, 1]} : vector<2x32x256xbf16> to vector<1x8x128xbf16>
    %342 = vector.shape_cast %341 : vector<1x8x128xbf16> to vector<8x128xbf16>
    %343 = vector.extract_strided_slice %4 {offsets = [0, 16, 16], sizes = [1, 8, 128], strides = [1, 1, 1]} : vector<2x32x256xbf16> to vector<1x8x128xbf16>
    %344 = vector.shape_cast %343 : vector<1x8x128xbf16> to vector<8x128xbf16>
    %345 = vector.extract_strided_slice %4 {offsets = [1, 16, 16], sizes = [1, 8, 128], strides = [1, 1, 1]} : vector<2x32x256xbf16> to vector<1x8x128xbf16>
    %346 = vector.shape_cast %345 : vector<1x8x128xbf16> to vector<8x128xbf16>
    %347 = vector.extract_strided_slice %4 {offsets = [0, 16, 17], sizes = [1, 8, 128], strides = [1, 1, 1]} : vector<2x32x256xbf16> to vector<1x8x128xbf16>
    %348 = vector.shape_cast %347 : vector<1x8x128xbf16> to vector<8x128xbf16>
    %349 = vector.extract_strided_slice %4 {offsets = [1, 16, 17], sizes = [1, 8, 128], strides = [1, 1, 1]} : vector<2x32x256xbf16> to vector<1x8x128xbf16>
    %350 = vector.shape_cast %349 : vector<1x8x128xbf16> to vector<8x128xbf16>
    %351 = vector.extract_strided_slice %4 {offsets = [0, 16, 18], sizes = [1, 8, 128], strides = [1, 1, 1]} : vector<2x32x256xbf16> to vector<1x8x128xbf16>
    %352 = vector.shape_cast %351 : vector<1x8x128xbf16> to vector<8x128xbf16>
    %353 = vector.extract_strided_slice %4 {offsets = [1, 16, 18], sizes = [1, 8, 128], strides = [1, 1, 1]} : vector<2x32x256xbf16> to vector<1x8x128xbf16>
    %354 = vector.shape_cast %353 : vector<1x8x128xbf16> to vector<8x128xbf16>
    %355 = vector.extract_strided_slice %4 {offsets = [0, 16, 19], sizes = [1, 8, 128], strides = [1, 1, 1]} : vector<2x32x256xbf16> to vector<1x8x128xbf16>
    %356 = vector.shape_cast %355 : vector<1x8x128xbf16> to vector<8x128xbf16>
    %357 = vector.extract_strided_slice %4 {offsets = [1, 16, 19], sizes = [1, 8, 128], strides = [1, 1, 1]} : vector<2x32x256xbf16> to vector<1x8x128xbf16>
    %358 = vector.shape_cast %357 : vector<1x8x128xbf16> to vector<8x128xbf16>
    %359 = vector.extract_strided_slice %4 {offsets = [0, 16, 20], sizes = [1, 8, 128], strides = [1, 1, 1]} : vector<2x32x256xbf16> to vector<1x8x128xbf16>
    %360 = vector.shape_cast %359 : vector<1x8x128xbf16> to vector<8x128xbf16>
    %361 = arith.extf %280 : vector<8x128xbf16> to vector<8x128xf32>
    %362 = arith.extf %282 : vector<8x128xbf16> to vector<8x128xf32>
    %363 = arith.extf %284 : vector<8x128xbf16> to vector<8x128xf32>
    %364 = arith.extf %286 : vector<8x128xbf16> to vector<8x128xf32>
    %365 = arith.extf %288 : vector<8x128xbf16> to vector<8x128xf32>
    %366 = arith.extf %290 : vector<8x128xbf16> to vector<8x128xf32>
    %367 = arith.extf %292 : vector<8x128xbf16> to vector<8x128xf32>
    %368 = arith.extf %294 : vector<8x128xbf16> to vector<8x128xf32>
    %369 = arith.extf %296 : vector<8x128xbf16> to vector<8x128xf32>
    %370 = arith.extf %298 : vector<8x128xbf16> to vector<8x128xf32>
    %371 = arith.extf %300 : vector<8x128xbf16> to vector<8x128xf32>
    %372 = arith.extf %302 : vector<8x128xbf16> to vector<8x128xf32>
    %373 = arith.extf %304 : vector<8x128xbf16> to vector<8x128xf32>
    %374 = arith.extf %306 : vector<8x128xbf16> to vector<8x128xf32>
    %375 = arith.extf %308 : vector<8x128xbf16> to vector<8x128xf32>
    %376 = arith.extf %310 : vector<8x128xbf16> to vector<8x128xf32>
    %377 = arith.extf %312 : vector<8x128xbf16> to vector<8x128xf32>
    %378 = arith.extf %314 : vector<8x128xbf16> to vector<8x128xf32>
    %379 = arith.extf %316 : vector<8x128xbf16> to vector<8x128xf32>
    %380 = arith.extf %318 : vector<8x128xbf16> to vector<8x128xf32>
    %381 = arith.extf %320 : vector<8x128xbf16> to vector<8x128xf32>
    %382 = arith.extf %322 : vector<8x128xbf16> to vector<8x128xf32>
    %383 = arith.extf %324 : vector<8x128xbf16> to vector<8x128xf32>
    %384 = arith.extf %326 : vector<8x128xbf16> to vector<8x128xf32>
    %385 = arith.extf %328 : vector<8x128xbf16> to vector<8x128xf32>
    %386 = arith.extf %330 : vector<8x128xbf16> to vector<8x128xf32>
    %387 = arith.extf %332 : vector<8x128xbf16> to vector<8x128xf32>
    %388 = arith.extf %334 : vector<8x128xbf16> to vector<8x128xf32>
    %389 = arith.extf %336 : vector<8x128xbf16> to vector<8x128xf32>
    %390 = arith.extf %338 : vector<8x128xbf16> to vector<8x128xf32>
    %391 = arith.extf %340 : vector<8x128xbf16> to vector<8x128xf32>
    %392 = arith.extf %342 : vector<8x128xbf16> to vector<8x128xf32>
    %393 = arith.extf %344 : vector<8x128xbf16> to vector<8x128xf32>
    %394 = arith.extf %346 : vector<8x128xbf16> to vector<8x128xf32>
    %395 = arith.extf %348 : vector<8x128xbf16> to vector<8x128xf32>
    %396 = arith.extf %350 : vector<8x128xbf16> to vector<8x128xf32>
    %397 = arith.extf %352 : vector<8x128xbf16> to vector<8x128xf32>
    %398 = arith.extf %354 : vector<8x128xbf16> to vector<8x128xf32>
    %399 = arith.extf %356 : vector<8x128xbf16> to vector<8x128xf32>
    %400 = arith.extf %358 : vector<8x128xbf16> to vector<8x128xf32>
    %401 = arith.extf %360 : vector<8x128xbf16> to vector<8x128xf32>
    %402 = tpu.concatenate %361, %362, %363, %364, %365, %366, %367, %368, %369, %370, %371, %372, %373, %374, %375, %376 in 0 : vector<8x128xf32>, vector<8x128xf32>, vector<8x128xf32>, vector<8x128xf32>, vector<8x128xf32>, vector<8x128xf32>, vector<8x128xf32>, vector<8x128xf32>, vector<8x128xf32>, vector<8x128xf32>, vector<8x128xf32>, vector<8x128xf32>, vector<8x128xf32>, vector<8x128xf32>, vector<8x128xf32>, vector<8x128xf32> -> vector<128x128xf32>
    %403 = tpu.concatenate %377, %378, %379, %380, %381, %382, %383, %384, %385, %386, %387, %388, %389, %390, %391, %392 in 0 : vector<8x128xf32>, vector<8x128xf32>, vector<8x128xf32>, vector<8x128xf32>, vector<8x128xf32>, vector<8x128xf32>, vector<8x128xf32>, vector<8x128xf32>, vector<8x128xf32>, vector<8x128xf32>, vector<8x128xf32>, vector<8x128xf32>, vector<8x128xf32>, vector<8x128xf32>, vector<8x128xf32>, vector<8x128xf32> -> vector<128x128xf32>
    %404 = tpu.concatenate %393, %394, %395, %396, %397, %398, %399, %400, %401 in 0 : vector<8x128xf32>, vector<8x128xf32>, vector<8x128xf32>, vector<8x128xf32>, vector<8x128xf32>, vector<8x128xf32>, vector<8x128xf32>, vector<8x128xf32>, vector<8x128xf32> -> vector<72x128xf32>
    %405 = tpu.concatenate %402, %403, %404 in 0 : vector<128x128xf32>, vector<128x128xf32>, vector<72x128xf32> -> vector<328x128xf32>
    %c32 = arith.constant 32 : index
    %c0_21 = arith.constant 0 : index
    %406 = vector.load %arg3[%c32, %c0_21] : memref<64x328xbf16, #tpu.memory_space<vmem>>, vector<16x328xbf16>
    %407 = arith.extf %406 : vector<16x328xbf16> to vector<16x328xf32>
    %cst_22 = arith.constant dense<0.000000e+00> : vector<16x128xf32>
    %408 = tpu.matmul %407, %405, %cst_22 {dimension_numbers = #tpu.dot_dimension_numbers<[1], [0], [0], [1], [0, 0, 1, 1], [], []>} : vector<16x328xf32>, vector<328x128xf32>, vector<16x128xf32> -> vector<16x128xf32>
    %c32_23 = arith.constant 32 : index
    %c0_24 = arith.constant 0 : index
    %409 = vector.load %arg4[%c32_23, %c0_24] : memref<64x1xf32, #tpu.memory_space<vmem>>, vector<16x1xf32>
    %410 = vector.broadcast %409 : vector<16x1xf32> to vector<16x128xf32>
    %411 = arith.addf %408, %410 : vector<16x128xf32>
    %412 = arith.truncf %411 : vector<16x128xf32> to vector<16x128xbf16>
    %c0_25 = arith.constant 0 : index
    %c32_26 = arith.constant 32 : index
    %c0_27 = arith.constant 0 : index
    %413 = vector.load %arg7[%c0_25, %c32_26, %c0_27] : memref<1x64x128xbf16, #tpu.memory_space<vmem>>, vector<1x16x128xbf16>
    %414 = vector.shape_cast %413 : vector<1x16x128xbf16> to vector<16x128xbf16>
    %415 = vector.shape_cast %412 : vector<16x128xbf16> to vector<1x16x128xbf16>
    tpu.vector_store %arg7[%c0_25, %c32_26, %c0_27], %415 {strides = array<i32>} : memref<1x64x128xbf16, #tpu.memory_space<vmem>>, vector<1x16x128xbf16>,
    %416 = vector.extract_strided_slice %4 {offsets = [0, 24, 0], sizes = [1, 8, 128], strides = [1, 1, 1]} : vector<2x32x256xbf16> to vector<1x8x128xbf16>
    %417 = vector.shape_cast %416 : vector<1x8x128xbf16> to vector<8x128xbf16>
    %418 = vector.extract_strided_slice %4 {offsets = [1, 24, 0], sizes = [1, 8, 128], strides = [1, 1, 1]} : vector<2x32x256xbf16> to vector<1x8x128xbf16>
    %419 = vector.shape_cast %418 : vector<1x8x128xbf16> to vector<8x128xbf16>
    %420 = vector.extract_strided_slice %4 {offsets = [0, 24, 1], sizes = [1, 8, 128], strides = [1, 1, 1]} : vector<2x32x256xbf16> to vector<1x8x128xbf16>
    %421 = vector.shape_cast %420 : vector<1x8x128xbf16> to vector<8x128xbf16>
    %422 = vector.extract_strided_slice %4 {offsets = [1, 24, 1], sizes = [1, 8, 128], strides = [1, 1, 1]} : vector<2x32x256xbf16> to vector<1x8x128xbf16>
    %423 = vector.shape_cast %422 : vector<1x8x128xbf16> to vector<8x128xbf16>
    %424 = vector.extract_strided_slice %4 {offsets = [0, 24, 2], sizes = [1, 8, 128], strides = [1, 1, 1]} : vector<2x32x256xbf16> to vector<1x8x128xbf16>
    %425 = vector.shape_cast %424 : vector<1x8x128xbf16> to vector<8x128xbf16>
    %426 = vector.extract_strided_slice %4 {offsets = [1, 24, 2], sizes = [1, 8, 128], strides = [1, 1, 1]} : vector<2x32x256xbf16> to vector<1x8x128xbf16>
    %427 = vector.shape_cast %426 : vector<1x8x128xbf16> to vector<8x128xbf16>
    %428 = vector.extract_strided_slice %4 {offsets = [0, 24, 3], sizes = [1, 8, 128], strides = [1, 1, 1]} : vector<2x32x256xbf16> to vector<1x8x128xbf16>
    %429 = vector.shape_cast %428 : vector<1x8x128xbf16> to vector<8x128xbf16>
    %430 = vector.extract_strided_slice %4 {offsets = [1, 24, 3], sizes = [1, 8, 128], strides = [1, 1, 1]} : vector<2x32x256xbf16> to vector<1x8x128xbf16>
    %431 = vector.shape_cast %430 : vector<1x8x128xbf16> to vector<8x128xbf16>
    %432 = vector.extract_strided_slice %4 {offsets = [0, 24, 4], sizes = [1, 8, 128], strides = [1, 1, 1]} : vector<2x32x256xbf16> to vector<1x8x128xbf16>
    %433 = vector.shape_cast %432 : vector<1x8x128xbf16> to vector<8x128xbf16>
    %434 = vector.extract_strided_slice %4 {offsets = [1, 24, 4], sizes = [1, 8, 128], strides = [1, 1, 1]} : vector<2x32x256xbf16> to vector<1x8x128xbf16>
    %435 = vector.shape_cast %434 : vector<1x8x128xbf16> to vector<8x128xbf16>
    %436 = vector.extract_strided_slice %4 {offsets = [0, 24, 5], sizes = [1, 8, 128], strides = [1, 1, 1]} : vector<2x32x256xbf16> to vector<1x8x128xbf16>
    %437 = vector.shape_cast %436 : vector<1x8x128xbf16> to vector<8x128xbf16>
    %438 = vector.extract_strided_slice %4 {offsets = [1, 24, 5], sizes = [1, 8, 128], strides = [1, 1, 1]} : vector<2x32x256xbf16> to vector<1x8x128xbf16>
    %439 = vector.shape_cast %438 : vector<1x8x128xbf16> to vector<8x128xbf16>
    %440 = vector.extract_strided_slice %4 {offsets = [0, 24, 6], sizes = [1, 8, 128], strides = [1, 1, 1]} : vector<2x32x256xbf16> to vector<1x8x128xbf16>
    %441 = vector.shape_cast %440 : vector<1x8x128xbf16> to vector<8x128xbf16>
    %442 = vector.extract_strided_slice %4 {offsets = [1, 24, 6], sizes = [1, 8, 128], strides = [1, 1, 1]} : vector<2x32x256xbf16> to vector<1x8x128xbf16>
    %443 = vector.shape_cast %442 : vector<1x8x128xbf16> to vector<8x128xbf16>
    %444 = vector.extract_strided_slice %4 {offsets = [0, 24, 7], sizes = [1, 8, 128], strides = [1, 1, 1]} : vector<2x32x256xbf16> to vector<1x8x128xbf16>
    %445 = vector.shape_cast %444 : vector<1x8x128xbf16> to vector<8x128xbf16>
    %446 = vector.extract_strided_slice %4 {offsets = [1, 24, 7], sizes = [1, 8, 128], strides = [1, 1, 1]} : vector<2x32x256xbf16> to vector<1x8x128xbf16>
    %447 = vector.shape_cast %446 : vector<1x8x128xbf16> to vector<8x128xbf16>
    %448 = vector.extract_strided_slice %4 {offsets = [0, 24, 8], sizes = [1, 8, 128], strides = [1, 1, 1]} : vector<2x32x256xbf16> to vector<1x8x128xbf16>
    %449 = vector.shape_cast %448 : vector<1x8x128xbf16> to vector<8x128xbf16>
    %450 = vector.extract_strided_slice %4 {offsets = [1, 24, 8], sizes = [1, 8, 128], strides = [1, 1, 1]} : vector<2x32x256xbf16> to vector<1x8x128xbf16>
    %451 = vector.shape_cast %450 : vector<1x8x128xbf16> to vector<8x128xbf16>
    %452 = vector.extract_strided_slice %4 {offsets = [0, 24, 9], sizes = [1, 8, 128], strides = [1, 1, 1]} : vector<2x32x256xbf16> to vector<1x8x128xbf16>
    %453 = vector.shape_cast %452 : vector<1x8x128xbf16> to vector<8x128xbf16>
    %454 = vector.extract_strided_slice %4 {offsets = [1, 24, 9], sizes = [1, 8, 128], strides = [1, 1, 1]} : vector<2x32x256xbf16> to vector<1x8x128xbf16>
    %455 = vector.shape_cast %454 : vector<1x8x128xbf16> to vector<8x128xbf16>
    %456 = vector.extract_strided_slice %4 {offsets = [0, 24, 10], sizes = [1, 8, 128], strides = [1, 1, 1]} : vector<2x32x256xbf16> to vector<1x8x128xbf16>
    %457 = vector.shape_cast %456 : vector<1x8x128xbf16> to vector<8x128xbf16>
    %458 = vector.extract_strided_slice %4 {offsets = [1, 24, 10], sizes = [1, 8, 128], strides = [1, 1, 1]} : vector<2x32x256xbf16> to vector<1x8x128xbf16>
    %459 = vector.shape_cast %458 : vector<1x8x128xbf16> to vector<8x128xbf16>
    %460 = vector.extract_strided_slice %4 {offsets = [0, 24, 11], sizes = [1, 8, 128], strides = [1, 1, 1]} : vector<2x32x256xbf16> to vector<1x8x128xbf16>
    %461 = vector.shape_cast %460 : vector<1x8x128xbf16> to vector<8x128xbf16>
    %462 = vector.extract_strided_slice %4 {offsets = [1, 24, 11], sizes = [1, 8, 128], strides = [1, 1, 1]} : vector<2x32x256xbf16> to vector<1x8x128xbf16>
    %463 = vector.shape_cast %462 : vector<1x8x128xbf16> to vector<8x128xbf16>
    %464 = vector.extract_strided_slice %4 {offsets = [0, 24, 12], sizes = [1, 8, 128], strides = [1, 1, 1]} : vector<2x32x256xbf16> to vector<1x8x128xbf16>
    %465 = vector.shape_cast %464 : vector<1x8x128xbf16> to vector<8x128xbf16>
    %466 = vector.extract_strided_slice %4 {offsets = [1, 24, 12], sizes = [1, 8, 128], strides = [1, 1, 1]} : vector<2x32x256xbf16> to vector<1x8x128xbf16>
    %467 = vector.shape_cast %466 : vector<1x8x128xbf16> to vector<8x128xbf16>
    %468 = vector.extract_strided_slice %4 {offsets = [0, 24, 13], sizes = [1, 8, 128], strides = [1, 1, 1]} : vector<2x32x256xbf16> to vector<1x8x128xbf16>
    %469 = vector.shape_cast %468 : vector<1x8x128xbf16> to vector<8x128xbf16>
    %470 = vector.extract_strided_slice %4 {offsets = [1, 24, 13], sizes = [1, 8, 128], strides = [1, 1, 1]} : vector<2x32x256xbf16> to vector<1x8x128xbf16>
    %471 = vector.shape_cast %470 : vector<1x8x128xbf16> to vector<8x128xbf16>
    %472 = vector.extract_strided_slice %4 {offsets = [0, 24, 14], sizes = [1, 8, 128], strides = [1, 1, 1]} : vector<2x32x256xbf16> to vector<1x8x128xbf16>
    %473 = vector.shape_cast %472 : vector<1x8x128xbf16> to vector<8x128xbf16>
    %474 = vector.extract_strided_slice %4 {offsets = [1, 24, 14], sizes = [1, 8, 128], strides = [1, 1, 1]} : vector<2x32x256xbf16> to vector<1x8x128xbf16>
    %475 = vector.shape_cast %474 : vector<1x8x128xbf16> to vector<8x128xbf16>
    %476 = vector.extract_strided_slice %4 {offsets = [0, 24, 15], sizes = [1, 8, 128], strides = [1, 1, 1]} : vector<2x32x256xbf16> to vector<1x8x128xbf16>
    %477 = vector.shape_cast %476 : vector<1x8x128xbf16> to vector<8x128xbf16>
    %478 = vector.extract_strided_slice %4 {offsets = [1, 24, 15], sizes = [1, 8, 128], strides = [1, 1, 1]} : vector<2x32x256xbf16> to vector<1x8x128xbf16>
    %479 = vector.shape_cast %478 : vector<1x8x128xbf16> to vector<8x128xbf16>
    %480 = vector.extract_strided_slice %4 {offsets = [0, 24, 16], sizes = [1, 8, 128], strides = [1, 1, 1]} : vector<2x32x256xbf16> to vector<1x8x128xbf16>
    %481 = vector.shape_cast %480 : vector<1x8x128xbf16> to vector<8x128xbf16>
    %482 = vector.extract_strided_slice %4 {offsets = [1, 24, 16], sizes = [1, 8, 128], strides = [1, 1, 1]} : vector<2x32x256xbf16> to vector<1x8x128xbf16>
    %483 = vector.shape_cast %482 : vector<1x8x128xbf16> to vector<8x128xbf16>
    %484 = vector.extract_strided_slice %4 {offsets = [0, 24, 17], sizes = [1, 8, 128], strides = [1, 1, 1]} : vector<2x32x256xbf16> to vector<1x8x128xbf16>
    %485 = vector.shape_cast %484 : vector<1x8x128xbf16> to vector<8x128xbf16>
    %486 = vector.extract_strided_slice %4 {offsets = [1, 24, 17], sizes = [1, 8, 128], strides = [1, 1, 1]} : vector<2x32x256xbf16> to vector<1x8x128xbf16>
    %487 = vector.shape_cast %486 : vector<1x8x128xbf16> to vector<8x128xbf16>
    %488 = vector.extract_strided_slice %4 {offsets = [0, 24, 18], sizes = [1, 8, 128], strides = [1, 1, 1]} : vector<2x32x256xbf16> to vector<1x8x128xbf16>
    %489 = vector.shape_cast %488 : vector<1x8x128xbf16> to vector<8x128xbf16>
    %490 = vector.extract_strided_slice %4 {offsets = [1, 24, 18], sizes = [1, 8, 128], strides = [1, 1, 1]} : vector<2x32x256xbf16> to vector<1x8x128xbf16>
    %491 = vector.shape_cast %490 : vector<1x8x128xbf16> to vector<8x128xbf16>
    %492 = vector.extract_strided_slice %4 {offsets = [0, 24, 19], sizes = [1, 8, 128], strides = [1, 1, 1]} : vector<2x32x256xbf16> to vector<1x8x128xbf16>
    %493 = vector.shape_cast %492 : vector<1x8x128xbf16> to vector<8x128xbf16>
    %494 = vector.extract_strided_slice %4 {offsets = [1, 24, 19], sizes = [1, 8, 128], strides = [1, 1, 1]} : vector<2x32x256xbf16> to vector<1x8x128xbf16>
    %495 = vector.shape_cast %494 : vector<1x8x128xbf16> to vector<8x128xbf16>
    %496 = vector.extract_strided_slice %4 {offsets = [0, 24, 20], sizes = [1, 8, 128], strides = [1, 1, 1]} : vector<2x32x256xbf16> to vector<1x8x128xbf16>
    %497 = vector.shape_cast %496 : vector<1x8x128xbf16> to vector<8x128xbf16>
    %498 = arith.extf %417 : vector<8x128xbf16> to vector<8x128xf32>
    %499 = arith.extf %419 : vector<8x128xbf16> to vector<8x128xf32>
    %500 = arith.extf %421 : vector<8x128xbf16> to vector<8x128xf32>
    %501 = arith.extf %423 : vector<8x128xbf16> to vector<8x128xf32>
    %502 = arith.extf %425 : vector<8x128xbf16> to vector<8x128xf32>
    %503 = arith.extf %427 : vector<8x128xbf16> to vector<8x128xf32>
    %504 = arith.extf %429 : vector<8x128xbf16> to vector<8x128xf32>
    %505 = arith.extf %431 : vector<8x128xbf16> to vector<8x128xf32>
    %506 = arith.extf %433 : vector<8x128xbf16> to vector<8x128xf32>
    %507 = arith.extf %435 : vector<8x128xbf16> to vector<8x128xf32>
    %508 = arith.extf %437 : vector<8x128xbf16> to vector<8x128xf32>
    %509 = arith.extf %439 : vector<8x128xbf16> to vector<8x128xf32>
    %510 = arith.extf %441 : vector<8x128xbf16> to vector<8x128xf32>
    %511 = arith.extf %443 : vector<8x128xbf16> to vector<8x128xf32>
    %512 = arith.extf %445 : vector<8x128xbf16> to vector<8x128xf32>
    %513 = arith.extf %447 : vector<8x128xbf16> to vector<8x128xf32>
    %514 = arith.extf %449 : vector<8x128xbf16> to vector<8x128xf32>
    %515 = arith.extf %451 : vector<8x128xbf16> to vector<8x128xf32>
    %516 = arith.extf %453 : vector<8x128xbf16> to vector<8x128xf32>
    %517 = arith.extf %455 : vector<8x128xbf16> to vector<8x128xf32>
    %518 = arith.extf %457 : vector<8x128xbf16> to vector<8x128xf32>
    %519 = arith.extf %459 : vector<8x128xbf16> to vector<8x128xf32>
    %520 = arith.extf %461 : vector<8x128xbf16> to vector<8x128xf32>
    %521 = arith.extf %463 : vector<8x128xbf16> to vector<8x128xf32>
    %522 = arith.extf %465 : vector<8x128xbf16> to vector<8x128xf32>
    %523 = arith.extf %467 : vector<8x128xbf16> to vector<8x128xf32>
    %524 = arith.extf %469 : vector<8x128xbf16> to vector<8x128xf32>
    %525 = arith.extf %471 : vector<8x128xbf16> to vector<8x128xf32>
    %526 = arith.extf %473 : vector<8x128xbf16> to vector<8x128xf32>
    %527 = arith.extf %475 : vector<8x128xbf16> to vector<8x128xf32>
    %528 = arith.extf %477 : vector<8x128xbf16> to vector<8x128xf32>
    %529 = arith.extf %479 : vector<8x128xbf16> to vector<8x128xf32>
    %530 = arith.extf %481 : vector<8x128xbf16> to vector<8x128xf32>
    %531 = arith.extf %483 : vector<8x128xbf16> to vector<8x128xf32>
    %532 = arith.extf %485 : vector<8x128xbf16> to vector<8x128xf32>
    %533 = arith.extf %487 : vector<8x128xbf16> to vector<8x128xf32>
    %534 = arith.extf %489 : vector<8x128xbf16> to vector<8x128xf32>
    %535 = arith.extf %491 : vector<8x128xbf16> to vector<8x128xf32>
    %536 = arith.extf %493 : vector<8x128xbf16> to vector<8x128xf32>
    %537 = arith.extf %495 : vector<8x128xbf16> to vector<8x128xf32>
    %538 = arith.extf %497 : vector<8x128xbf16> to vector<8x128xf32>
    %539 = tpu.concatenate %498, %499, %500, %501, %502, %503, %504, %505, %506, %507, %508, %509, %510, %511, %512, %513 in 0 : vector<8x128xf32>, vector<8x128xf32>, vector<8x128xf32>, vector<8x128xf32>, vector<8x128xf32>, vector<8x128xf32>, vector<8x128xf32>, vector<8x128xf32>, vector<8x128xf32>, vector<8x128xf32>, vector<8x128xf32>, vector<8x128xf32>, vector<8x128xf32>, vector<8x128xf32>, vector<8x128xf32>, vector<8x128xf32> -> vector<128x128xf32>
    %540 = tpu.concatenate %514, %515, %516, %517, %518, %519, %520, %521, %522, %523, %524, %525, %526, %527, %528, %529 in 0 : vector<8x128xf32>, vector<8x128xf32>, vector<8x128xf32>, vector<8x128xf32>, vector<8x128xf32>, vector<8x128xf32>, vector<8x128xf32>, vector<8x128xf32>, vector<8x128xf32>, vector<8x128xf32>, vector<8x128xf32>, vector<8x128xf32>, vector<8x128xf32>, vector<8x128xf32>, vector<8x128xf32>, vector<8x128xf32> -> vector<128x128xf32>
    %541 = tpu.concatenate %530, %531, %532, %533, %534, %535, %536, %537, %538 in 0 : vector<8x128xf32>, vector<8x128xf32>, vector<8x128xf32>, vector<8x128xf32>, vector<8x128xf32>, vector<8x128xf32>, vector<8x128xf32>, vector<8x128xf32>, vector<8x128xf32> -> vector<72x128xf32>
    %542 = tpu.concatenate %539, %540, %541 in 0 : vector<128x128xf32>, vector<128x128xf32>, vector<72x128xf32> -> vector<328x128xf32>
    %c48 = arith.constant 48 : index
    %c0_28 = arith.constant 0 : index
    %543 = vector.load %arg3[%c48, %c0_28] : memref<64x328xbf16, #tpu.memory_space<vmem>>, vector<16x328xbf16>
    %544 = arith.extf %543 : vector<16x328xbf16> to vector<16x328xf32>
    %cst_29 = arith.constant dense<0.000000e+00> : vector<16x128xf32>
    %545 = tpu.matmul %544, %542, %cst_29 {dimension_numbers = #tpu.dot_dimension_numbers<[1], [0], [0], [1], [0, 0, 1, 1], [], []>} : vector<16x328xf32>, vector<328x128xf32>, vector<16x128xf32> -> vector<16x128xf32>
    %c48_30 = arith.constant 48 : index
    %c0_31 = arith.constant 0 : index
    %546 = vector.load %arg4[%c48_30, %c0_31] : memref<64x1xf32, #tpu.memory_space<vmem>>, vector<16x1xf32>
    %547 = vector.broadcast %546 : vector<16x1xf32> to vector<16x128xf32>
    %548 = arith.addf %545, %547 : vector<16x128xf32>
    %549 = arith.truncf %548 : vector<16x128xf32> to vector<16x128xbf16>
    %c0_32 = arith.constant 0 : index
    %c48_33 = arith.constant 48 : index
    %c0_34 = arith.constant 0 : index
    %550 = vector.load %arg7[%c0_32, %c48_33, %c0_34] : memref<1x64x128xbf16, #tpu.memory_space<vmem>>, vector<1x16x128xbf16>
    %551 = vector.shape_cast %550 : vector<1x16x128xbf16> to vector<16x128xbf16>
    %552 = vector.shape_cast %549 : vector<16x128xbf16> to vector<1x16x128xbf16>
    tpu.vector_store %arg7[%c0_32, %c48_33, %c0_34], %552 {strides = array<i32>} : memref<1x64x128xbf16, #tpu.memory_space<vmem>>, vector<1x16x128xbf16>,
    return
  }
  func.func @transform_0(%arg0: i32, %arg1: i32, %arg2: i32) -> (i32, i32) {
    %c0_i32 = arith.constant 0 : i32
    %c0_i32_0 = arith.constant 0 : i32
    return %arg1, %c0_i32 : i32, i32
  }
  func.func @transform_1(%arg0: i32, %arg1: i32, %arg2: i32) -> (i32, i32) {
    %c0_i32 = arith.constant 0 : i32
    %c0_i32_0 = arith.constant 0 : i32
    return %arg1, %c0_i32 : i32, i32
  }
  func.func @transform_2(%arg0: i32, %arg1: i32, %arg2: i32) -> (i32, i32, i32, i32) {
    %c0_i32 = arith.constant 0 : i32
    %c0_i32_0 = arith.constant 0 : i32
    return %arg0, %c0_i32, %arg1, %arg2 : i32, i32, i32, i32
  }
  func.func @transform_3(%arg0: i32, %arg1: i32, %arg2: i32) -> (i32, i32, i32, i32) {
    %c1_i32 = arith.constant 1 : i32
    %0 = arith.addi %arg2, %c1_i32 : i32
    %c0_i32 = arith.constant 0 : i32
    %c0_i32_0 = arith.constant 0 : i32
    return %arg0, %c0_i32, %arg1, %0 : i32, i32, i32, i32
  }
  func.func @transform_4(%arg0: i32, %arg1: i32, %arg2: i32) -> (i32, i32, i32) {
    %c0_i32 = arith.constant 0 : i32
    return %arg0, %arg1, %arg2 : i32, i32, i32
  }
}

</mosaic_0001>

<bundles_post_ra>
// kernel: fwd.1
= control target key start
LH: loop header
LB: loop body
LE: loop exit
PB: predicated region body
PF: predicated region fallthrough
CT: control target
= control target key end

     0   :  { %s3750_s15 = smov 0   ;;  %s3752_s16 = smov 0   ;;  %s4830_s0 = inlined_call_operand.vmem [shape: bf16[256,328], index: 0, kind: input, shape index: {}]   ;;  %s4831_s1 = inlined_call_operand.vmem [shape: f32[256,1], index: 1, kind: input, shape index: {}]   ;;  %s4832_s2 = inlined_call_operand.vmem [shape: bf16[2,2,128,256], index: 2, kind: input, shape index: {}, may-alias: {2,3}]   ;;  %s4833_s3 = inlined_call_operand.vmem [shape: bf16[2,2,128,256], index: 3, kind: input, shape index: {}, may-alias: {2,3}]   ;;  %s4834_s4 = inlined_call_operand.vmem [shape: bf16[2,256,128], index: 4, kind: output, shape index: {}]  }
   0x1   :  { %s3754_s17 = smov 0   ;;  %s3756_s18 = smov 0  }
   0x2   :  { %s3758_s19 = smov 0   ;;  %s3760_s20 = smov 0  }
   0x3   :  { %s3762_s21 = smov 0  }
   0x4 LB: > { %s29_s22 = sadd.s32 1, %s3705_s19  ;;  %s33_s23 = sadd.s32 1, %s3709_s20  ;;  %s3713_s21 = sphi %s3762_s21, %s14_s21   ;;  %s3709_s20 = sphi %s3760_s20, %s4902_s20   ;;  %s3705_s19 = sphi %s3758_s19, %s4901_s19   ;;  %s3701_s18 = sphi %s3756_s18, %s4900_s18   ;;  %s3697_s17 = sphi %s3754_s17, %s4899_s17   ;;  %s3693_s16 = sphi %s3752_s16, %s4898_s16   ;;  %s3689_s15 = sphi %s3750_s15, %s4897_s15  }
   0x5   : > { %p31_p0 = scmp.ge.s32.totalorder %s29_s22, 4  ;;  %p103_p1 = scmp.ne.s32.totalorder %s3693_s16, %s3689_s15 }
   0x6   : > { %p104_p2 = scmp.eq.s32.totalorder %s3713_s21, 0  ;;  %s96_s28 = sadd.s32 1, %s3693_s16 }
   0x7   : > { %s4904_s22 = smov (%p31_p0, %s29_s22), 0  ;;  %s4906_s23 = smov (!%p31_p0, %s33_s23), %s3709_s20 }
   0x8   : > { %p3793_p3 = por %p104_p2, %p103_p1  ;;  %p35_p4 = scmp.ge.s32.totalorder %s4906_s23, 2 }
   0x9   : > { %s90_s25 = ssub.s32 %s3705_s19, %s4904_s22  ;;  %p2436_p6 = scmp.ge.s32.totalorder %s3713_s21, 8 }
   0xa   : > { %s4908_s23 = smov (%p35_p4, %s4906_s23), 0 }
   0xb   : > { %s89_s26 = ssub.s32 %s3709_s20, %s4908_s23  ;;  %191 = sbr.rel (%p2436_p6) target bundleno = 40 (0x28), region = 16 }
   0xc   : > { %s91_s27 = sor.u32 %s90_s25, %s89_s26 }
   0xd   : > { %p94_p5 = scmp.eq.s32.totalorder %s91_s27, 0 }
   0xf   : > { %s3805_s29 = scalar_select %p94_p5, %s3693_s16, %s96_s28  }
  0x10   : > { %213 = sbr.rel (!%p3793_p3) target bundleno = 28 (0x1c), region = 28  ;;  %s215_s30 = sand.u32 (%p3793_p3), 1, %s3693_s16  }
  0x11   : > { %s2490_s5 = sshll.u32 (%p3793_p3), %s3705_s19, 3  ;;  %s2437_s6 = sshll.u32 (%p3793_p3), %s215_s30, 5 }
  0x12   : > { %s2440_s7 = sshll.u32 (%p3793_p3), %s3709_s20, 6  ;;  %s217_s13 = scalar_lea.vmem (%p3793_p3), [#allocation2], %s2437_s6 }
  0x13   : > { %s222_s8 = sadd.s32 (%p3793_p3), %s2490_s5, %s2440_s7 }
  0x14   : > { %s2441_s9 = sshll.u32 (%p3793_p3), %s222_s8, 2 }
  0x15   : > { %s224_s12 = scalar_lea.vmem %s4832_s2, %s2441_s9 }
  0x16   : > { %v241_v0 = vld [vmem:[%s224_s12] sm:$0xf]  ;;  %v243_v1 = vld [vmem:[%s224_s12 + $0x8] sm:$0xf]  ;;  %v245_v2 = vld [vmem:[%s224_s12 + $0x10] sm:$0xf] }
  0x17   : > { %242 = vst [vmem:[%s217_s13] sm:$0xf] %v241_v0  ;;  %244 = vst [vmem:[%s217_s13 + $0x4] sm:$0xf] %v243_v1  ;;  %v247_v3 = vld [vmem:[%s224_s12 + $0x18] sm:$0xf] }
  0x18   : > { %246 = vst [vmem:[%s217_s13 + $0x8] sm:$0xf] %v245_v2  ;;  %v249_v4 = vld [vmem:[%s224_s12 + $0x80] sm:$0xf]  ;;  %v251_v5 = vld [vmem:[%s224_s12 + $0x88] sm:$0xf] }
  0x19   : > { %248 = vst [vmem:[%s217_s13 + $0xc] sm:$0xf] %v247_v3  ;;  %250 = vst [vmem:[%s217_s13 + $0x10] sm:$0xf] %v249_v4  ;;  %v253_v6 = vld [vmem:[%s224_s12 + $0x90] sm:$0xf] }
  0x1a   : > { %252 = vst [vmem:[%s217_s13 + $0x14] sm:$0xf] %v251_v5  ;;  %v255_v7 = vld [vmem:[%s224_s12 + $0x98] sm:$0xf]  ;;  %254 = vst [vmem:[%s217_s13 + $0x18] sm:$0xf] %v253_v6 }
  0x1b   : > { %256 = vst [vmem:[%s217_s13 + $0x1c] sm:$0xf] %v255_v7 }
  0x1c PF: > { %296 = sbr.rel (!%p3793_p3) target bundleno = 40 (0x28), region = 69  ;;  %s298_s14 = sand.u32 (%p3793_p3), 1, %s3693_s16  }
  0x1d   : > { %s2443_s25 = sshll.u32 (%p3793_p3), %s3705_s19, 3  ;;  %s2442_s26 = sshll.u32 (%p3793_p3), %s298_s14, 5 }
  0x1e   : > { %s2444_s27 = sshll.u32 (%p3793_p3), %s3709_s20, 6  ;;  %s300_s8 = scalar_lea.vmem (%p3793_p3), [#allocation3], %s2442_s26 }
  0x1f   : > { %s2332_s28 = sadd.s32 (%p3793_p3), %s2444_s27, %s2443_s25 }
  0x20   : > { %s2445_s30 = sshll.u32 (%p3793_p3), %s2332_s28, 2 }
  0x21   : > { %s2334_s7 = scalar_lea.vmem %s4833_s3, %s2445_s30 }
  0x22   : > { %v2446_v8 = vld [vmem:[%s2334_s7 + $0x4] sm:$0xf]  ;;  %v2447_v9 = vld [vmem:[%s2334_s7 + $0xc] sm:$0xf]  ;;  %v2448_v10 = vld [vmem:[%s2334_s7 + $0x14] sm:$0xf] }
  0x23   : > { %326 = vst [vmem:[%s300_s8] sm:$0xf] %v2446_v8  ;;  %328 = vst [vmem:[%s300_s8 + $0x4] sm:$0xf] %v2447_v9  ;;  %v2449_v11 = vld [vmem:[%s2334_s7 + $0x1c] sm:$0xf] }
  0x24   : > { %330 = vst [vmem:[%s300_s8 + $0x8] sm:$0xf] %v2448_v10  ;;  %v2450_v12 = vld [vmem:[%s2334_s7 + $0x84] sm:$0xf]  ;;  %v2451_v13 = vld [vmem:[%s2334_s7 + $0x8c] sm:$0xf] }
  0x25   : > { %332 = vst [vmem:[%s300_s8 + $0xc] sm:$0xf] %v2449_v11  ;;  %334 = vst [vmem:[%s300_s8 + $0x10] sm:$0xf] %v2450_v12  ;;  %v2452_v14 = vld [vmem:[%s2334_s7 + $0x94] sm:$0xf] }
  0x26   : > { %336 = vst [vmem:[%s300_s8 + $0x14] sm:$0xf] %v2451_v13  ;;  %v2453_v15 = vld [vmem:[%s2334_s7 + $0x9c] sm:$0xf]  ;;  %338 = vst [vmem:[%s300_s8 + $0x18] sm:$0xf] %v2452_v14 }
  0x27   : > { %340 = vst [vmem:[%s300_s8 + $0x1c] sm:$0xf] %v2453_v15 }
  0x28 PF: > { %p2454_p7 = scmp.ge.s32.totalorder %s3713_s21, 1  ;;  %p379_p8 = scmp.lt.s32.totalorder %s3713_s21, 9 }
  0x2a   : > { %p380_p9 = pnand %p2454_p7, %p379_p8 }
  0x2c   : > { %383 = sbr.rel (%p380_p9) target bundleno = 800 (0x320), region = 110 }
  0x31   : > { %s386_s24 = sand.u32 1, %s3689_s15   ;;  %v3715_v16 = vmov 0   ;;  %s3716_s15 = smov 126   ;;  %vm543_vm0 = vcmask 1039360   ;;  %vm558_vm1 = vcmask 1031168   ;;  %vm571_vm2 = vcmask 1022976  }
  0x32   : > { %s2455_s9 = sshll.u32 %s386_s24, 5  ;;  %2959 = vset.pattern.permute.xlu1 %v3715_v16  ;;  %2960 = vset.pattern.permute.xlu0 %v3715_v16  ;;  %s3717_s12 = smov 127   ;;  %vm584_vm3 = vcmask 1014784   ;;  %vm597_vm4 = vcmask 1006592   ;;  %vm610_vm5 = vcmask 998400   ;;  %vm623_vm6 = vcmask 990208  }
  0x33   : > { %s3827_s10 = scalar_lea.vmem [#allocation2], %s2455_s9  ;;  %s3829_s11 = scalar_lea.vmem [#allocation3], %s2455_s9  ;;  %vm806_vm7 = vcmask 588800   ;;  %vm696_vm8 = vcmask 982016   ;;  %vm765_vm9 = vcmask 916480  }
  0x34   : > { %v3832_v17 = vld [vmem:[%s3827_s10] sm:$0xff]   ;;  %v3837_v21 = vld [vmem:[%s3827_s10 + $0x10] sm:$0xff]   ;;  %s3718_s13 = smov 125   ;;  %s3719_s14 = smov 124  }
  0x35   : > { %v3652_v18 = vld [vmem:[%s3829_s11] sm:$0xff]   ;;  %v4835_v19 = vunpack.c.l.bf16 %v3832_v17  ;;  %v3654_v22 = vld [vmem:[%s3829_s11 + $0x10] sm:$0xff]   ;;  %v4836_v24 = vunpack.c.l.bf16 %v3837_v21  ;;  %s3720_s25 = smov 123   ;;  %s2457_s26 = sshll.u32 %s3697_s17, 3  ;;  %v973_v27 = vrot.slane %v3832_v17, 4  ;;  %v976_v31 = vrot.slane %v3837_v21, 4 }
  0x36   : > { %v535_v20 = vunpack.c.l.bf16 %v3652_v18  ;;  %v536_v25 = vunpack.c.l.bf16 %v3654_v22  ;;  %p441_p10 = scmp.lt.s32.totalorder %s2457_s26, 31  ;;  %s3721_s27 = smov 122   ;;  %v979_v28 = vrot.slane %v3652_v18, 4  ;;  %v982_v32 = vrot.slane %v3654_v22, 4 }
  0x37   : > { %s3722_s28 = smov 121   ;;  %s3723_s5 = smov 120   ;;  %v3873_v29 = vunpack.c.l.bf16 %v973_v27  ;;  %v3881_v36 = vunpack.c.l.bf16 %v976_v31 }
  0x38   : > { %v2879_v23 = vpack.i.bf16 %v535_v20, %v4835_v19  ;;  %v2884_v26 = vpack.i.bf16 %v536_v25, %v4836_v24  ;;  %s4910_s26 = smov (!%p441_p10, %s2457_s26), 31  ;;  %s3724_s8 = smov 112   ;;  %v981_v30 = vunpack.c.l.bf16 %v979_v28  ;;  %v984_v37 = vunpack.c.l.bf16 %v982_v32 }
  0x39   : > { %s2460_s30 = sshll.u32 %s4910_s26, 3  ;;  %4859 = vst [vmem:[#allocation4_spill] sm:$0xff] %v3873_v29  ;;  %4860 = vst [vmem:[#allocation5_spill] sm:$0xff] %v3881_v36  ;;  %s2802_s24 = smul.u32 12, %s4910_s26 }
  0x3a   : > { %2880 = vrot.lane.b32.xlu1 %v2879_v23, %s3716_s15  ;;  %2870 = vrot.lane.b32.xlu0 %v2879_v23, %s3717_s12  ;;  %s3869_s7 = scalar_lea.vmem %s4831_s1, %s2460_s30  ;;  %v3879_v35 = vpack.i.bf16 %v981_v30, %v3873_v29  ;;  %v3888_v38 = vpack.i.bf16 %v984_v37, %v3881_v36  ;;  %p457_p11 = scmp.lt.s32.totalorder %s3701_s18, 1 }
  0x3b   : > { %v794_v33 = vld [vmem:[%s3869_s7] sm:$0xff]  ;;  %v795_v34 = vld [vmem:[%s3869_s7 + $0x8] sm:$0xff]  ;;  %s4031_s17 = scalar_lea.vmem %s4830_s0, %s2802_s24 }
  0x3c   : > { %s4912_s18 = smov (!%p457_p11, %s3701_s18), 1 }
  0x3e   : > { %2885 = vrot.lane.b32.xlu1 %v2884_v26, %s3716_s15  ;;  %2875 = vrot.lane.b32.xlu0 %v2884_v26, %s3717_s12 }
  0x42   : > { %2895 = vrot.lane.b32.xlu1 %v2884_v26, %s3718_s13  ;;  %2890 = vrot.lane.b32.xlu0 %v2879_v23, %s3718_s13 }
  0x46   : > { %2905 = vrot.lane.b32.xlu1 %v2884_v26, %s3719_s14  ;;  %2900 = vrot.lane.b32.xlu0 %v2879_v23, %s3719_s14 }
  0x4a   : > { %2915 = vrot.lane.b32.xlu1 %v2884_v26, %s3720_s25  ;;  %2910 = vrot.lane.b32.xlu0 %v2879_v23, %s3720_s25 }
  0x4e   : > { %2925 = vrot.lane.b32.xlu1 %v2884_v26, %s3721_s27  ;;  %2920 = vrot.lane.b32.xlu0 %v2879_v23, %s3721_s27 }
  0x52   : > { %2935 = vrot.lane.b32.xlu1 %v2884_v26, %s3722_s28  ;;  %2930 = vrot.lane.b32.xlu0 %v2879_v23, %s3722_s28 }
  0x56   : > { %2945 = vrot.lane.b32.xlu1 %v2884_v26, %s3723_s5  ;;  %2940 = vrot.lane.b32.xlu0 %v2879_v23, %s3723_s5 }
  0x5a   : > { %2955 = vrot.lane.b32.xlu1 %v2884_v26, %s3724_s8  ;;  %2950 = vrot.lane.b32.xlu0 %v2879_v23, %s3724_s8 }
  0x5e   : > { %798 = vperm.xlu1 %2959, %v794_v33   ;;  %803 = vperm.xlu0 %2960, %v795_v34  }
  0x62   : > { %2962 = vrot.lane.b32.xlu1 %v3879_v35, %s3717_s12  ;;  %2972 = vrot.lane.b32.xlu0 %v3879_v35, %s3716_s15 }
  0x66   : > { %2967 = vrot.lane.b32.xlu1 %v3888_v38, %s3717_s12  ;;  %2982 = vrot.lane.b32.xlu0 %v3879_v35, %s3718_s13 }
  0x6a   : > { %2977 = vrot.lane.b32.xlu1 %v3888_v38, %s3716_s15  ;;  %2992 = vrot.lane.b32.xlu0 %v3879_v35, %s3719_s14 }
  0x6e   : > { %2987 = vrot.lane.b32.xlu1 %v3888_v38, %s3718_s13  ;;  %3002 = vrot.lane.b32.xlu0 %v3879_v35, %s3720_s25 }
  0x72   : > { %2997 = vrot.lane.b32.xlu1 %v3888_v38, %s3719_s14  ;;  %3012 = vrot.lane.b32.xlu0 %v3879_v35, %s3721_s27 }
  0x76   : > { %3007 = vrot.lane.b32.xlu1 %v3888_v38, %s3720_s25  ;;  %3022 = vrot.lane.b32.xlu0 %v3879_v35, %s3722_s28 }
  0x7a   : > { %3017 = vrot.lane.b32.xlu1 %v3888_v38, %s3721_s27  ;;  %3032 = vrot.lane.b32.xlu0 %v3879_v35, %s3723_s5 }
  0x7e   : > { %3027 = vrot.lane.b32.xlu1 %v3888_v38, %s3722_s28 }
  0x82   : > { %3037 = vrot.lane.b32.xlu1 %v3888_v38, %s3723_s5 }
  0xac   : > { %v2881_v39 = vpop.permute.xlu1 %2880  ;;  %v2871_v40 = vpop.permute.xlu0 %2870 }
  0xad   : > { %v2883_v41 = vunpack.i.h.bf16 %v2881_v39  ;;  %v2882_v42 = vunpack.i.l.bf16 %v2881_v39  ;;  %v2873_v43 = vunpack.i.h.bf16 %v2871_v40  ;;  %v2872_v44 = vunpack.i.l.bf16 %v2871_v40 }
  0xaf   : > { %v3919_v45 = vsel %vm543_vm0, %v2872_v44, %v2873_v43  ;;  %v3925_v49 = vsel %vm558_vm1, %v2882_v42, %v2883_v41 }
  0xb0   : > { %v2886_v46 = vpop.permute.xlu1 %2885  ;;  %v2876_v47 = vpop.permute.xlu0 %2875  ;;  %v3922_v48 = vpack.i.bf16 %v2873_v43, %v3919_v45  ;;  %v3936_v58 = vpack.i.bf16 %v2883_v41, %v3925_v49 }
  0xb1   : > { %v2888_v50 = vunpack.i.h.bf16 %v2886_v46  ;;  %v2887_v51 = vunpack.i.l.bf16 %v2886_v46  ;;  %v2878_v52 = vunpack.i.h.bf16 %v2876_v47  ;;  %v2877_v53 = vunpack.i.l.bf16 %v2876_v47 }
  0xb2   : > { %3042 = vrot.lane.b32.xlu0 %v3922_v48, %s3723_s5 }
  0xb3   : > { %v3930_v54 = vsel %vm543_vm0, %v2877_v53, %v2878_v52  ;;  %v3939_v59 = vsel %vm558_vm1, %v2887_v51, %v2888_v50 }
  0xb4   : > { %v2896_v55 = vpop.permute.xlu1 %2895  ;;  %v2891_v56 = vpop.permute.xlu0 %2890  ;;  %v3933_v57 = vpack.i.bf16 %v2878_v52, %v3930_v54  ;;  %v3949_v3 = vpack.i.bf16 %v2888_v50, %v3939_v59 }
  0xb5   : > { %v2898_v60 = vunpack.i.h.bf16 %v2896_v55  ;;  %v2897_v61 = vunpack.i.l.bf16 %v2896_v55  ;;  %v2893_v62 = vunpack.i.h.bf16 %v2891_v56  ;;  %v2892_v63 = vunpack.i.l.bf16 %v2891_v56 }
  0xb6   : > { %3047 = vrot.lane.b32.xlu1 %v3933_v57, %s3723_s5  ;;  %3052 = vrot.lane.b32.xlu0 %v3936_v58, %s3723_s5 }
  0xb7   : > { %v3946_v0 = vsel %vm571_vm2, %v2892_v63, %v2893_v62  ;;  %v3955_v5 = vsel %vm571_vm2, %v2897_v61, %v2898_v60 }
  0xb8   : > { %v2906_v1 = vpop.permute.xlu1 %2905  ;;  %v2901_v2 = vpop.permute.xlu0 %2900  ;;  %v3952_v4 = vpack.i.bf16 %v2893_v62, %v3946_v0  ;;  %v3066_v13 = vpack.i.bf16 %v2898_v60, %v3955_v5 }
  0xb9   : > { %v2908_v6 = vunpack.i.h.bf16 %v2906_v1  ;;  %v2907_v7 = vunpack.i.l.bf16 %v2906_v1  ;;  %v2903_v8 = vunpack.i.h.bf16 %v2901_v2  ;;  %v2902_v9 = vunpack.i.l.bf16 %v2901_v2 }
  0xba   : > { %3057 = vrot.lane.b32.xlu1 %v3949_v3, %s3723_s5  ;;  %3062 = vrot.lane.b32.xlu0 %v3952_v4, %s3723_s5 }
  0xbb   : > { %v3962_v10 = vsel %vm584_vm3, %v2902_v9, %v2903_v8  ;;  %v3967_v15 = vsel %vm584_vm3, %v2907_v7, %v2908_v6  ;;  %v4040_v9 = vld [vmem:[%s4031_s17] sm:$0xff] }
  0xbc   : > { %v2916_v11 = vpop.permute.xlu1 %2915  ;;  %v2911_v12 = vpop.permute.xlu0 %2910  ;;  %v3071_v14 = vpack.i.bf16 %v2903_v8, %v3962_v10  ;;  %v3076_v27 = vpack.i.bf16 %v2908_v6, %v3967_v15 }
  0xbd   : > { %v2918_v16 = vunpack.i.h.bf16 %v2916_v11  ;;  %v2917_v18 = vunpack.i.l.bf16 %v2916_v11  ;;  %v2913_v20 = vunpack.i.h.bf16 %v2911_v12  ;;  %v2912_v22 = vunpack.i.l.bf16 %v2911_v12 }
  0xbe   : > { %3067 = vrot.lane.b32.xlu1 %v3066_v13, %s3723_s5  ;;  %3072 = vrot.lane.b32.xlu0 %v3071_v14, %s3723_s5 }
  0xbf   : > { %v3972_v23 = vsel %vm597_vm4, %v2912_v22, %v2913_v20  ;;  %v3977_v30 = vsel %vm597_vm4, %v2917_v18, %v2918_v16 }
  0xc0   : > { %v2926_v25 = vpop.permute.xlu1 %2925  ;;  %v2921_v26 = vpop.permute.xlu0 %2920  ;;  %v3081_v28 = vpack.i.bf16 %v2913_v20, %v3972_v23  ;;  %v3086_v41 = vpack.i.bf16 %v2918_v16, %v3977_v30 }
  0xc1   : > { %v2928_v31 = vunpack.i.h.bf16 %v2926_v25  ;;  %v2927_v32 = vunpack.i.l.bf16 %v2926_v25  ;;  %v2923_v33 = vunpack.i.h.bf16 %v2921_v26  ;;  %v2922_v34 = vunpack.i.l.bf16 %v2921_v26 }
  0xc2   : > { %3077 = vrot.lane.b32.xlu1 %v3076_v27, %s3723_s5  ;;  %3082 = vrot.lane.b32.xlu0 %v3081_v28, %s3723_s5  ;;  %v789_v25 = vunpack.c.h.bf16 %v4040_v9  ;;  %v4058_v28 = vld [vmem:[%s4031_s17 + $0x8] ss:$12 sps:$4 sm:$0xff]  }
  0xc3   : > { %v3982_v37 = vsel %vm610_vm5, %v2922_v34, %v2923_v33  ;;  %v3987_v43 = vsel %vm610_vm5, %v2927_v32, %v2928_v31 }
  0xc4   : > { %v2936_v39 = vpop.permute.xlu1 %2935  ;;  %v2931_v40 = vpop.permute.xlu0 %2930  ;;  %v3091_v42 = vpack.i.bf16 %v2923_v33, %v3982_v37  ;;  %v3096_v52 = vpack.i.bf16 %v2928_v31, %v3987_v43  ;;  %877 = vmatprep.mubr.f32.mxu0 %v789_v25 }
  0xc5   : > { %v2938_v44 = vunpack.i.h.bf16 %v2936_v39  ;;  %v2937_v46 = vunpack.i.l.bf16 %v2936_v39  ;;  %v2933_v47 = vunpack.i.h.bf16 %v2931_v40  ;;  %v2932_v50 = vunpack.i.l.bf16 %v2931_v40 }
  0xc6   : > { %3087 = vrot.lane.b32.xlu1 %v3086_v41, %s3723_s5  ;;  %3092 = vrot.lane.b32.xlu0 %v3091_v42, %s3723_s5 }
  0xc7   : > { %v3992_v51 = vsel %vm623_vm6, %v2932_v50, %v2933_v47  ;;  %v3997_v55 = vsel %vm623_vm6, %v2937_v46, %v2938_v44 }
  0xc8   : > { %v3101_v53 = vpack.i.bf16 %v2933_v47, %v3992_v51  ;;  %v3106_v56 = vpack.i.bf16 %v2938_v44, %v3997_v55  ;;  %v4005_v60 = vpop.permute.xlu1 %2945  ;;  %v4007_v61 = vpop.permute.xlu0 %2940  ;;  %v790_v44 = vunpack.c.l.bf16 %v4058_v28 }
  0xca   : > { %3097 = vrot.lane.b32.xlu1 %v3096_v52, %s3723_s5  ;;  %3102 = vrot.lane.b32.xlu0 %v3101_v53, %s3723_s5 }
  0xcb   : > { %2736 = vmatprep.mubr.msk.f32.mxu1 %vm806_vm7, %v790_v44 }
  0xcc   : > { %v4013_v62 = vpop.permute.xlu1 %2955  ;;  %v4015_v63 = vpop.permute.xlu0 %2950 }
  0xce   : > { %3107 = vrot.lane.b32.xlu1 %v3106_v56, %s3723_s5  ;;  %3112 = vrot.lane.b32.xlu0 %v3922_v48, %s3724_s8 }
  0xd2   : > { %3117 = vrot.lane.b32.xlu1 %v3933_v57, %s3724_s8  ;;  %3122 = vrot.lane.b32.xlu0 %v3936_v58, %s3724_s8 }
  0xd6   : > { %3127 = vrot.lane.b32.xlu1 %v3949_v3, %s3724_s8  ;;  %3132 = vrot.lane.b32.xlu0 %v3952_v4, %s3724_s8 }
  0xd9   : > { %v4022_v48 = vpop.permute.xlu1 %798  ;;  %v4024_v1 = vpop.permute.xlu0 %803 }
  0xda   : > { %4861 = vst [vmem:[#allocation6_spill] sm:$0xff] %v4022_v48  ;;  %4862 = vst [vmem:[#allocation7_spill] sm:$0xff] %v4024_v1  ;;  %3137 = vrot.lane.b32.xlu1 %v3066_v13, %s3724_s8  ;;  %3142 = vrot.lane.b32.xlu0 %v3071_v14, %s3724_s8 }
  0xdd   : > { %v2963_v57 = vpop.permute.xlu1 %2962  ;;  %v2973_v58 = vpop.permute.xlu0 %2972 }
  0xde   : > { %v2965_v2 = vunpack.i.h.bf16 %v2963_v57  ;;  %v2964_v3 = vunpack.i.l.bf16 %v2963_v57  ;;  %v2975_v4 = vunpack.i.h.bf16 %v2973_v58  ;;  %v2974_v6 = vunpack.i.l.bf16 %v2973_v58 }
  0xe0   : > { %v4034_v7 = vsel %vm543_vm0, %v2964_v3, %v2965_v2  ;;  %v4037_v8 = vsel %vm558_vm1, %v2974_v6, %v2975_v4 }
  0xe1   : > { %4863 = vst [vmem:[#allocation8_spill] sm:$0xff] %v4034_v7  ;;  %4864 = vst [vmem:[#allocation9_spill] sm:$0xff] %v4037_v8  ;;  %v2968_v11 = vpop.permute.xlu1 %2967  ;;  %v4043_v12 = vpack.i.bf16 %v2965_v2, %v4034_v7  ;;  %v2983_v13 = vpop.permute.xlu0 %2982  ;;  %v4048_v22 = vpack.i.bf16 %v2975_v4, %v4037_v8 }
  0xe2   : > { %v2970_v14 = vunpack.i.h.bf16 %v2968_v11  ;;  %v2969_v16 = vunpack.i.l.bf16 %v2968_v11  ;;  %v2985_v18 = vunpack.i.h.bf16 %v2983_v13  ;;  %v2984_v20 = vunpack.i.l.bf16 %v2983_v13 }
  0xe3   : > { %3147 = vrot.lane.b32.xlu0 %v4043_v12, %s3723_s5 }
  0xe4   : > { %v4052_v26 = vsel %vm543_vm0, %v2969_v16, %v2970_v14  ;;  %v4055_v27 = vsel %vm571_vm2, %v2984_v20, %v2985_v18 }
  0xe5   : > { %4865 = vst [vmem:[#allocation10_spill] sm:$0xff] %v4052_v26  ;;  %v2978_v31 = vpop.permute.xlu1 %2977  ;;  %v4061_v32 = vpack.i.bf16 %v2970_v14, %v4052_v26  ;;  %v2993_v33 = vpop.permute.xlu0 %2992  ;;  %v4068_v42 = vpack.i.bf16 %v2985_v18, %v4055_v27 }
  0xe6   : > { %v2980_v34 = vunpack.i.h.bf16 %v2978_v31  ;;  %v2979_v39 = vunpack.i.l.bf16 %v2978_v31  ;;  %v2995_v40 = vunpack.i.h.bf16 %v2993_v33  ;;  %v2994_v41 = vunpack.i.l.bf16 %v2993_v33 }
  0xe7   : > { %3152 = vrot.lane.b32.xlu1 %v4061_v32, %s3723_s5  ;;  %3157 = vrot.lane.b32.xlu0 %v4048_v22, %s3723_s5 }
  0xe8   : > { %v4072_v46 = vsel %vm558_vm1, %v2979_v39, %v2980_v34  ;;  %v4075_v47 = vsel %vm584_vm3, %v2994_v41, %v2995_v40 }
  0xe9   : > { %v2988_v50 = vpop.permute.xlu1 %2987  ;;  %v4078_v52 = vpack.i.bf16 %v2980_v34, %v4072_v46  ;;  %v3003_v53 = vpop.permute.xlu0 %3002  ;;  %v4086_v3 = vpack.i.bf16 %v2995_v40, %v4075_v47 }
  0xea   : > { %v2990_v56 = vunpack.i.h.bf16 %v2988_v50  ;;  %v2989_v57 = vunpack.i.l.bf16 %v2988_v50  ;;  %v3005_v58 = vunpack.i.h.bf16 %v3003_v53  ;;  %v3004_v2 = vunpack.i.l.bf16 %v3003_v53 }
  0xeb   : > { %3162 = vrot.lane.b32.xlu1 %v4078_v52, %s3723_s5  ;;  %3167 = vrot.lane.b32.xlu0 %v4068_v42, %s3723_s5 }
  0xec   : > { %v4089_v4 = vsel %vm571_vm2, %v2989_v57, %v2990_v56  ;;  %v4092_v6 = vsel %vm597_vm4, %v3004_v2, %v3005_v58  ;;  %v3656_v2 = vld [vmem:[%s3829_s11 + $0x8] sm:$0xff]  }
  0xed   : > { %v2998_v11 = vpop.permute.xlu1 %2997  ;;  %v4095_v13 = vpack.i.bf16 %v2990_v56, %v4089_v4  ;;  %v3013_v14 = vpop.permute.xlu0 %3012  ;;  %v3186_v31 = vpack.i.bf16 %v3005_v58, %v4092_v6  ;;  %v4113_v58 = vld [vmem:[%s3827_s10 + $0x8] sm:$0xff]  }
  0xee   : > { %v3000_v16 = vunpack.i.h.bf16 %v2998_v11  ;;  %v2999_v18 = vunpack.i.l.bf16 %v2998_v11  ;;  %v3015_v20 = vunpack.i.h.bf16 %v3013_v14  ;;  %v3014_v25 = vunpack.i.l.bf16 %v3013_v14  ;;  %4866 = vst [vmem:[#allocation11_spill] sm:$0xff] %v4113_v58 }
  0xef   : > { %3172 = vrot.lane.b32.xlu1 %v4095_v13, %s3723_s5  ;;  %3177 = vrot.lane.b32.xlu0 %v4086_v3, %s3723_s5 }
  0xf0   : > { %v4103_v33 = vsel %vm584_vm3, %v2999_v18, %v3000_v16  ;;  %v4106_v34 = vsel %vm610_vm5, %v3014_v25, %v3015_v20 }
  0xf1   : > { %v3008_v39 = vpop.permute.xlu1 %3007  ;;  %v3181_v40 = vpack.i.bf16 %v3000_v16, %v4103_v33  ;;  %v3023_v41 = vpop.permute.xlu0 %3022  ;;  %v3196_v57 = vpack.i.bf16 %v3015_v20, %v4106_v34 }
  0xf2   : > { %v3010_v44 = vunpack.i.h.bf16 %v3008_v39  ;;  %v3009_v50 = vunpack.i.l.bf16 %v3008_v39  ;;  %v3025_v53 = vunpack.i.h.bf16 %v3023_v41  ;;  %v3024_v56 = vunpack.i.l.bf16 %v3023_v41  ;;  %v4128_v41 = vld [vmem:[%s3827_s10 + $0x18] sm:$0xff]   ;;  %s2462_s10 = sshll.u32 %s4912_s18, 5 }
  0xf3   : > { %3182 = vrot.lane.b32.xlu1 %v3181_v40, %s3723_s5  ;;  %3187 = vrot.lane.b32.xlu0 %v3186_v31, %s3723_s5  ;;  %v4837_v31 = vunpack.c.l.bf16 %v4113_v58  ;;  %v1413_v40 = vunpack.c.l.bf16 %v3656_v2  ;;  %4867 = vst [vmem:[#allocation12_spill] sm:$0xff] %v4128_v41 }
  0xf4   : > { %v4117_v11 = vsel %vm597_vm4, %v3009_v50, %v3010_v44  ;;  %v4120_v14 = vsel %vm623_vm6, %v3024_v56, %v3025_v53  ;;  %v3658_v50 = vld [vmem:[%s3829_s11 + $0x18] sm:$0xff]   ;;  %s465_s11 = sadd.s32 %s2462_s10, %s4910_s26 }
  0xf5   : > { %v3018_v16 = vpop.permute.xlu1 %3017  ;;  %v3191_v18 = vpack.i.bf16 %v3010_v44, %v4117_v11  ;;  %v3206_v20 = vpack.i.bf16 %v3025_v53, %v4120_v14  ;;  %v4139_v53 = vpack.i.bf16 %v1413_v40, %v4837_v31  ;;  %s2463_s18 = sshll.u32 %s465_s11, 2 }
  0xf6   : > { %v3020_v25 = vunpack.i.h.bf16 %v3018_v16  ;;  %v3019_v39 = vunpack.i.l.bf16 %v3018_v16 }
  0xf7   : > { %3192 = vrot.lane.b32.xlu1 %v3191_v18, %s3723_s5  ;;  %3197 = vrot.lane.b32.xlu0 %v3196_v57, %s3723_s5  ;;  %4868 = vst [vmem:[#allocation13_spill] sm:$0xff] %v4139_v53  ;;  %v4838_v57 = vunpack.c.l.bf16 %v4128_v41  ;;  %v1414_v18 = vunpack.c.l.bf16 %v3658_v50 }
  0xf8   : > { %v4132_v56 = vsel %vm610_vm5, %v3019_v39, %v3020_v25 }
  0xf9   : > { %v3028_v19 = vpop.permute.xlu1 %3027  ;;  %v3201_v44 = vpack.i.bf16 %v3020_v25, %v4132_v56  ;;  %v1850_v25 = vrot.slane %v3658_v50, 4 }
  0xfa   : > { %v3030_v24 = vunpack.i.h.bf16 %v3028_v19  ;;  %v3029_v16 = vunpack.i.l.bf16 %v3028_v19  ;;  %v4151_v19 = vpack.i.bf16 %v1414_v18, %v4838_v57 }
  0xfb   : > { %3202 = vrot.lane.b32.xlu1 %v3201_v44, %s3723_s5  ;;  %3207 = vrot.lane.b32.xlu0 %v3206_v20, %s3723_s5  ;;  %v1852_v40 = vunpack.c.l.bf16 %v1850_v25  ;;  %v1841_v44 = vrot.slane %v4113_v58, 4 }
  0xfc   : > { %v4143_v1 = vsel %vm623_vm6, %v3029_v16, %v3030_v24  ;;  %4869 = vst [vmem:[#allocation14_spill] sm:$0xff] %v4151_v19  ;;  %v1847_v16 = vrot.slane %v3656_v2, 4 }
  0xfd   : > { %v3211_v39 = vpack.i.bf16 %v3030_v24, %v4143_v1  ;;  %v1844_v24 = vrot.slane %v4128_v41, 4  ;;  %v4184_v18 = vunpack.c.l.bf16 %v1841_v44  ;;  %v4199_v25 = vpop.permute.xlu1 %3037 }
  0xfe   : > { %4875 = vst [vmem:[#allocation20_spill] sm:$0xff] %v4199_v25 }
  0xff   : > { %3212 = vrot.lane.b32.xlu1 %v3211_v39, %s3723_s5  ;;  %3217 = vrot.lane.b32.xlu0 %v4139_v53, %s3719_s14  ;;  %v4174_v20 = vunpack.c.l.bf16 %v1844_v24  ;;  %4872 = vst [vmem:[#allocation17_spill] sm:$0xff] %v4184_v18  ;;  %v1849_v39 = vunpack.c.l.bf16 %v1847_v16  ;;  %v4193_v24 = vpop.permute.xlu0 %3032 }
 0x100   : > { %4874 = vst [vmem:[#allocation19_spill] sm:$0xff] %v4193_v24 }
 0x101   : > { %4870 = vst [vmem:[#allocation15_spill] sm:$0xff] %v4174_v20  ;;  %v4182_v50 = vpack.i.bf16 %v1852_v40, %v4174_v20  ;;  %v4191_v2 = vpack.i.bf16 %v1849_v39, %v4184_v18 }
 0x103   : > { %3222 = vrot.lane.b32.xlu1 %v4151_v19, %s3718_s13  ;;  %3227 = vrot.lane.b32.xlu0 %v4139_v53, %s3718_s13  ;;  %4871 = vst [vmem:[#allocation16_spill] sm:$0xff] %v4182_v50  ;;  %4873 = vst [vmem:[#allocation18_spill] sm:$0xff] %v4191_v2 }
 0x107   : > { %3232 = vrot.lane.b32.xlu1 %v4151_v19, %s3716_s15  ;;  %3237 = vrot.lane.b32.xlu0 %v4139_v53, %s3716_s15 }
 0x10b   : > { %3242 = vrot.lane.b32.xlu1 %v4151_v19, %s3722_s28  ;;  %3247 = vrot.lane.b32.xlu0 %v4151_v19, %s3717_s12 }
 0x10f   : > { %3252 = vrot.lane.b32.xlu1 %v4139_v53, %s3722_s28  ;;  %3257 = vrot.lane.b32.xlu0 %v4139_v53, %s3717_s12 }
 0x113   : > { %3262 = vrot.lane.b32.xlu1 %v4151_v19, %s3721_s27  ;;  %3267 = vrot.lane.b32.xlu0 %v4139_v53, %s3721_s27 }
 0x117   : > { %3272 = vrot.lane.b32.xlu1 %v4151_v19, %s3720_s25  ;;  %3277 = vrot.lane.b32.xlu0 %v4139_v53, %s3720_s25 }
 0x11b   : > { %3282 = vrot.lane.b32.xlu1 %v4182_v50, %s3722_s28  ;;  %3287 = vrot.lane.b32.xlu0 %v4151_v19, %s3719_s14 }
 0x11f   : > { %3292 = vrot.lane.b32.xlu1 %v4191_v2, %s3722_s28  ;;  %3297 = vrot.lane.b32.xlu0 %v4182_v50, %s3721_s27 }
 0x123   : > { %3302 = vrot.lane.b32.xlu1 %v4191_v2, %s3721_s27  ;;  %3307 = vrot.lane.b32.xlu0 %v4182_v50, %s3720_s25 }
 0x124   : > { %v4205_v40 = vpop.permute.xlu0 %3042 }
 0x127   : > { %3312 = vrot.lane.b32.xlu1 %v4191_v2, %s3720_s25  ;;  %3317 = vrot.lane.b32.xlu0 %v4182_v50, %s3719_s14 }
 0x128   : > { %v4211_v44 = vpop.permute.xlu1 %3047  ;;  %v4213_v16 = vpop.permute.xlu0 %3052 }
 0x12b   : > { %3322 = vrot.lane.b32.xlu1 %v4191_v2, %s3719_s14  ;;  %3327 = vrot.lane.b32.xlu0 %v4182_v50, %s3718_s13 }
 0x12c   : > { %v4219_v39 = vpop.permute.xlu1 %3057  ;;  %v4221_v31 = vpop.permute.xlu0 %3062 }
 0x12f   : > { %3332 = vrot.lane.b32.xlu1 %v4191_v2, %s3718_s13  ;;  %3337 = vrot.lane.b32.xlu0 %v4182_v50, %s3716_s15  ;;  %s4761_s13 = scalar_lea.vmem %s4834_s4, %s2463_s18 }
 0x130   : > { %v4227_v57 = vpop.permute.xlu1 %3067  ;;  %v4229_v18 = vpop.permute.xlu0 %3072 }
 0x133   : > { %3342 = vrot.lane.b32.xlu1 %v4191_v2, %s3716_s15  ;;  %3347 = vrot.lane.b32.xlu0 %v4182_v50, %s3717_s12 }
 0x134   : > { %v4235_v20 = vpop.permute.xlu1 %3077  ;;  %v3083_v58 = vpop.permute.xlu0 %3082 }
 0x137   : > { %3352 = vrot.lane.b32.xlu1 %v4191_v2, %s3717_s12  ;;  %3357 = vrot.lane.b32.xlu0 %v4086_v3, %s3724_s8 }
 0x138   : > { %v3088_v41 = vpop.permute.xlu1 %3087  ;;  %v3093_v48 = vpop.permute.xlu0 %3092 }
 0x139   : > { %v3094_v8 = vunpack.i.l.bf16 %v3093_v48  ;;  %v3089_v25 = vunpack.i.l.bf16 %v3088_v41 }
 0x13b   : > { %3362 = vrot.lane.b32.xlu1 %v4095_v13, %s3724_s8  ;;  %3367 = vrot.lane.b32.xlu0 %v4068_v42, %s3724_s8 }
 0x13c   : > { %v3098_v53 = vpop.permute.xlu1 %3097  ;;  %v3103_v29 = vpop.permute.xlu0 %3102 }
 0x13d   : > { %v3105_v3 = vunpack.i.h.bf16 %v3103_v29  ;;  %v3104_v19 = vunpack.i.l.bf16 %v3103_v29  ;;  %v3100_v13 = vunpack.i.h.bf16 %v3098_v53  ;;  %v3099_v26 = vunpack.i.l.bf16 %v3098_v53 }
 0x13f   : > { %3372 = vrot.lane.b32.xlu1 %v4078_v52, %s3724_s8  ;;  %3377 = vrot.lane.b32.xlu0 %v4048_v22, %s3724_s8  ;;  %v3095_v22 = vunpack.i.h.bf16 %v3093_v48  ;;  %v711_v29 = vsel %vm696_vm8, %v3104_v19, %v3105_v3  ;;  %v3080_v48 = vunpack.i.h.bf16 %v4235_v20 }
 0x140   : > { %v3108_v2 = vpop.permute.xlu1 %3107  ;;  %v4249_v50 = vpop.permute.xlu0 %3112 }
 0x141   : > { %v3110_v36 = vunpack.i.h.bf16 %v3108_v2  ;;  %v3109_v7 = vunpack.i.l.bf16 %v3108_v2  ;;  %v3090_v2 = vunpack.i.h.bf16 %v3088_v41  ;;  %v3079_v41 = vunpack.i.l.bf16 %v4235_v20 }
 0x143   : > { %3382 = vrot.lane.b32.xlu1 %v4061_v32, %s3724_s8  ;;  %v712_v42 = vsel %vm696_vm8, %v3109_v7, %v3110_v36  ;;  %v710_v36 = vsel %vm696_vm8, %v3099_v26, %v3100_v13  ;;  %v3085_v7 = vunpack.i.h.bf16 %v3083_v58  ;;  %v3084_v32 = vunpack.i.l.bf16 %v3083_v58 }
 0x144   : > { %v4254_v24 = vpop.permute.xlu1 %3117  ;;  %2522 = vmatprep.subr.mxu0 %v712_v42  ;;  %v4256_v52 = vpop.permute.xlu0 %3122  ;;  %v3074_v26 = vunpack.i.l.bf16 %v4229_v18 }
 0x145   : > { %2523 = vmatpush3.msra.mxu0 %v3997_v55  ;;  %v709_v55 = vsel %vm696_vm8, %v3094_v8, %v3095_v22  ;;  %v707_v8 = vsel %vm696_vm8, %v3084_v32, %v3085_v7  ;;  %v3060_v7 = vunpack.i.h.bf16 %v4219_v39  ;;  %v3059_v32 = vunpack.i.l.bf16 %v4219_v39 }
 0x146   : > { %2524 = vmatprep.subr.mxu0 %v711_v29  ;;  %v3120_v39 = vunpack.i.h.bf16 %v4254_v24 }
 0x147   : > { %3392 = vrot.lane.b32.xlu1 %v4043_v12, %s3724_s8  ;;  %2525 = vmatpush3.msra.mxu0 %v3992_v51  ;;  %v708_v51 = vsel %vm696_vm8, %v3089_v25, %v3090_v2  ;;  %v3075_v12 = vunpack.i.h.bf16 %v4229_v18  ;;  %v706_v18 = vsel %vm696_vm8, %v3079_v41, %v3080_v48  ;;  %v3065_v2 = vunpack.i.h.bf16 %v4221_v31 }
 0x148   : > { %v4264_v53 = vpop.permute.xlu1 %3127  ;;  %v3133_v42 = vpop.permute.xlu0 %3132  ;;  %2526 = vmatprep.subr.mxu0 %v710_v36  ;;  %v3054_v48 = vunpack.i.l.bf16 %v4213_v16  ;;  %v3119_v41 = vunpack.i.l.bf16 %v4254_v24 }
 0x149   : > { %2527 = vmatpush3.msra.mxu0 %v3987_v43  ;;  %v3135_v25 = vunpack.i.h.bf16 %v3133_v42  ;;  %v3134_v22 = vunpack.i.l.bf16 %v3133_v42  ;;  %v3129_v36 = vunpack.i.l.bf16 %v4264_v53  ;;  %v3124_v42 = vunpack.i.l.bf16 %v4256_v52 }
 0x14a   : > { %2528 = vmatprep.subr.mxu0 %v709_v55  ;;  %v3055_v55 = vunpack.i.h.bf16 %v4213_v16  ;;  %v3115_v16 = vunpack.i.h.bf16 %v4249_v50 }
 0x14b   : > { %3402 = vrot.lane.b32.xlu1 %v3888_v38, %s3724_s8  ;;  %2529 = vmatpush3.msra.mxu0 %v3982_v37  ;;  %v3070_v38 = vunpack.i.h.bf16 %v4227_v57  ;;  %v3069_v37 = vunpack.i.l.bf16 %v4227_v57  ;;  %v3130_v57 = vunpack.i.h.bf16 %v4264_v53  ;;  %v772_v53 = vsel %vm765_vm9, %v3134_v22, %v3135_v25  ;;  %v4334_v25 = vld [vmem:[%s4031_s17 + $0x18] sm:$0xff] }
 0x14c   : > { %v3138_v58 = vpop.permute.xlu1 %3137  ;;  %v3143_v43 = vpop.permute.xlu0 %3142  ;;  %2530 = vmatprep.subr.mxu0 %v708_v51  ;;  %v2942_v22 = vunpack.i.l.bf16 %v4007_v61 }
 0x14d   : > { %v3140_v19 = vunpack.i.h.bf16 %v3138_v58  ;;  %v3139_v3 = vunpack.i.l.bf16 %v3138_v58  ;;  %v3145_v13 = vunpack.i.h.bf16 %v3143_v43  ;;  %v3144_v20 = vunpack.i.l.bf16 %v3143_v43  ;;  %2531 = vmatpush3.msra.mxu0 %v3977_v30 }
 0x14e   : > { %2532 = vmatprep.subr.mxu0 %v707_v8  ;;  %v3064_v30 = vunpack.i.l.bf16 %v4221_v31  ;;  %v3125_v31 = vunpack.i.h.bf16 %v4256_v52  ;;  %v771_v52 = vsel %vm765_vm9, %v3129_v36, %v3130_v57  ;;  %v3114_v58 = vunpack.i.l.bf16 %v4249_v50 }
 0x14f   : > { %3412 = vrot.lane.b32.xlu1 %v3879_v35, %s3724_s8  ;;  %2533 = vmatpush3.msra.mxu0 %v3972_v23  ;;  %v774_v29 = vsel %vm765_vm9, %v3144_v20, %v3145_v13  ;;  %v705_v35 = vsel %vm696_vm8, %v3074_v26, %v3075_v12  ;;  %v773_v23 = vsel %vm765_vm9, %v3139_v3, %v3140_v19  ;;  %v3050_v12 = vunpack.i.h.bf16 %v4211_v44 }
 0x150   : > { %2534 = vmatprep.subr.mxu0 %v706_v18  ;;  %2718 = vmatprep.subr.mxu1 %v774_v29  ;;  %v3049_v26 = vunpack.i.l.bf16 %v4211_v44  ;;  %v770_v24 = vsel %vm765_vm9, %v3124_v42, %v3125_v31  ;;  %v2958_v43 = vunpack.i.h.bf16 %v4013_v62  ;;  %v2957_v8 = vunpack.i.l.bf16 %v4013_v62 }
 0x151   : > { %2535 = vmatpush3.msra.mxu0 %v3967_v15  ;;  %2719 = vmatpush3.msra.mxu1 %v774_v29  ;;  %v704_v15 = vsel %vm696_vm8, %v3069_v37, %v3070_v38  ;;  %v3045_v44 = vunpack.i.h.bf16 %v4205_v40  ;;  %v3044_v19 = vunpack.i.l.bf16 %v4205_v40  ;;  %v769_v13 = vsel %vm765_vm9, %v3119_v41, %v3120_v39 }
 0x152   : > { %2536 = vmatprep.subr.mxu0 %v705_v35  ;;  %2720 = vmatprep.subr.mxu1 %v773_v23  ;;  %v2948_v62 = vunpack.i.h.bf16 %v4005_v60  ;;  %v2947_v20 = vunpack.i.l.bf16 %v4005_v60  ;;  %v2953_v40 = vunpack.i.h.bf16 %v4015_v63  ;;  %v2952_v38 = vunpack.i.l.bf16 %v4015_v63 }
 0x153   : > { %2537 = vmatpush3.msra.mxu0 %v3962_v10  ;;  %2721 = vmatpush3.msra.mxu1 %v773_v23  ;;  %v703_v10 = vsel %vm696_vm8, %v3064_v30, %v3065_v2  ;;  %v768_v37 = vsel %vm765_vm9, %v3114_v58, %v3115_v16  ;;  %v2943_v60 = vunpack.i.h.bf16 %v4007_v61  ;;  %v767_v63 = vsel %vm765_vm9, %v2957_v8, %v2958_v43  ;;  %v786_v2 = vld [vmem:[%s4031_s17 + $0xc] sm:$0xff] }
 0x154   : > { %2538 = vmatprep.subr.mxu0 %v704_v15  ;;  %2722 = vmatprep.subr.mxu1 %v772_v53  ;;  %v793_v30 = vunpack.c.h.bf16 %v4058_v28  ;;  %v698_v61 = vsel %vm696_vm8, %v2947_v20, %v2948_v62  ;;  %v766_v57 = vsel %vm765_vm9, %v2952_v38, %v2953_v40  ;;  %v788_v36 = vunpack.c.l.bf16 %v4040_v9 }
 0x155   : > { %v4303_v51 = vpop.permute.xlu0 %3147  ;;  %2539 = vmatpush3.msra.mxu0 %v3955_v5  ;;  %2723 = vmatpush3.msra.mxu1 %v772_v53  ;;  %v702_v5 = vsel %vm696_vm8, %v3059_v32, %v3060_v7  ;;  %v4876_v28 = vunpack.c.l.bf16 %v3837_v21  ;;  %v792_v7 = vunpack.c.h.bf16 %v786_v2  ;;  %v4361_v32 = vld [vmem:[%s4031_s17 + $0x20] ss:$12 sps:$4 sm:$0xff]   ;;  %v4877_v31 = vunpack.c.l.bf16 %v3832_v17 }
 0x156   : > { %2540 = vmatprep.subr.mxu0 %v703_v10  ;;  %2724 = vmatprep.subr.mxu1 %v771_v52  ;;  %v791_v9 = vunpack.c.l.bf16 %v786_v2  ;;  %v1229_v21 = vunpack.c.l.bf16 %v4361_v32 }
 0x157   : > { %2541 = vmatpush3.msra.mxu0 %v3946_v0  ;;  %2725 = vmatpush3.msra.mxu1 %v771_v52  ;;  %v701_v0 = vsel %vm696_vm8, %v3054_v48, %v3055_v55 }
 0x158   : > { %2542 = vmatprep.subr.mxu0 %v702_v5  ;;  %2726 = vmatprep.subr.mxu1 %v770_v24 }
 0x159   : > { %v4319_v3 = vpop.permute.xlu1 %3152  ;;  %v4321_v50 = vpop.permute.xlu0 %3157  ;;  %2543 = vmatpush3.msra.mxu0 %v3939_v59  ;;  %2727 = vmatpush3.msra.mxu1 %v770_v24  ;;  %v700_v59 = vsel %vm696_vm8, %v3049_v26, %v3050_v12 }
 0x15a   : > { %2544 = vmatprep.subr.mxu0 %v701_v0  ;;  %2728 = vmatprep.subr.mxu1 %v769_v13 }
 0x15b   : > { %2545 = vmatpush3.msra.mxu0 %v3925_v49  ;;  %2729 = vmatpush3.msra.mxu1 %v769_v13  ;;  %v699_v49 = vsel %vm696_vm8, %v3044_v19, %v3045_v44 }
 0x15c   : > { %2546 = vmatprep.subr.mxu0 %v700_v59  ;;  %2730 = vmatprep.subr.mxu1 %v768_v37 }
 0x15d   : > { %v4338_v18 = vpop.permute.xlu1 %3162  ;;  %v4340_v29 = vpop.permute.xlu0 %3167  ;;  %2547 = vmatpush3.msra.mxu0 %v3930_v54  ;;  %2731 = vmatpush3.msra.mxu1 %v768_v37  ;;  %v1228_v54 = vunpack.c.h.bf16 %v4334_v25 }
 0x15e   : > { %2548 = vmatprep.subr.mxu0 %v699_v49  ;;  %2732 = vmatprep.subr.mxu1 %v767_v63 }
 0x15f   : > { %2549 = vmatpush3.msra.mxu0 %v3919_v45  ;;  %2733 = vmatpush3.msra.mxu1 %v767_v63  ;;  %v697_v45 = vsel %vm696_vm8, %v2942_v22, %v2943_v60 }
 0x160   : > { %2550 = vmatprep.subr.mxu0 %v698_v61  ;;  %2734 = vmatprep.subr.mxu1 %v766_v57 }
 0x161   : > { %v4352_v35 = vpop.permute.xlu1 %3172  ;;  %v4354_v23 = vpop.permute.xlu0 %3177  ;;  %2551 = vmatpush3.msra.mxu0 %v4876_v28  ;;  %2735 = vmatpush3.msra.mxu1 %v766_v57 }
 0x162   : > { %2552 = vmatprep.subr.mxu0 %v697_v45  ;;  %2737 = vmatmul.mubr.msk.f32.vlgmr.msra.gmra.mxu1 %vm806_vm7, %v793_v30 }
 0x163   : > { %2553 = vmatpush3.msra.mxu0 %v4877_v31  ;;  %1315 = vmatprep.mubr.f32.mxu1 %v1228_v54 }
 0x164   : > { %878 = vmatmul.mubr.f32.vlgmr.msra.gmra.mxu0 %v788_v36 }
 0x165   : > { %v4365_v42 = vpop.permute.xlu1 %3182  ;;  %v4367_v15 = vpop.permute.xlu0 %3187  ;;  %882 = vmatprep.mubr.f32.mxu0 %v792_v7 }
 0x166   : > { %v3190_v30 = vunpack.i.h.bf16 %v4367_v15  ;;  %v3185_v7 = vunpack.i.h.bf16 %v4365_v42  ;;  %v3184_v31 = vunpack.i.l.bf16 %v4365_v42  ;;  %v3180_v42 = vunpack.i.h.bf16 %v4354_v23 }
 0x168   : > { %883 = vmatmul.mubr.f32.gmra.mxu0 %v791_v9 }
 0x169   : > { %v3193_v53 = vpop.permute.xlu1 %3192  ;;  %v3198_v55 = vpop.permute.xlu0 %3197  ;;  %2757 = vmatprep.mubr.msk.f32.mxu0 %vm806_vm7, %v1229_v21 }
 0x16a   : > { %v3200_v44 = vunpack.i.h.bf16 %v3198_v55  ;;  %v3199_v19 = vunpack.i.l.bf16 %v3198_v55  ;;  %v3195_v60 = vunpack.i.h.bf16 %v3193_v53  ;;  %v3194_v22 = vunpack.i.l.bf16 %v3193_v53 }
 0x16c   : > { %v1149_v45 = vsel %vm696_vm8, %v3199_v19, %v3200_v44  ;;  %v1148_v9 = vsel %vm696_vm8, %v3194_v22, %v3195_v60 }
 0x16d   : > { %v3203_v48 = vpop.permute.xlu1 %3202  ;;  %v3208_v39 = vpop.permute.xlu0 %3207 }
 0x16e   : > { %v3210_v41 = vunpack.i.h.bf16 %v3208_v39  ;;  %v3209_v17 = vunpack.i.l.bf16 %v3208_v39  ;;  %v3205_v5 = vunpack.i.h.bf16 %v3203_v48  ;;  %v3204_v24 = vunpack.i.l.bf16 %v3203_v48 }
 0x170   : > { %v1151_v20 = vsel %vm696_vm8, %v3209_v17, %v3210_v41  ;;  %v1150_v2 = vsel %vm696_vm8, %v3204_v24, %v3205_v5 }
 0x171   : > { %v3213_v10 = vpop.permute.xlu1 %3212  ;;  %v3218_v52 = vpop.permute.xlu0 %3217 }
 0x172   : > { %v3215_v12 = vunpack.i.h.bf16 %v3213_v10  ;;  %v3214_v26 = vunpack.i.l.bf16 %v3213_v10  ;;  %v3220_v16 = vunpack.i.h.bf16 %v3218_v52  ;;  %v3219_v58 = vunpack.i.l.bf16 %v3218_v52 }
 0x173   : > { %v1146_v10 = vsel %vm696_vm8, %v3184_v31, %v3185_v7  ;;  %v3175_v52 = vunpack.i.h.bf16 %v4352_v35 }
 0x174   : > { %v4372_v43 = vsel %vm584_vm3, %v3219_v58, %v3220_v16  ;;  %v1152_v8 = vsel %vm696_vm8, %v3214_v26, %v3215_v12  ;;  %v3174_v12 = vunpack.i.l.bf16 %v4352_v35  ;;  %v3170_v58 = vunpack.i.h.bf16 %v4340_v29 }
 0x175   : > { %v4376_v0 = vpack.i.bf16 %v3220_v16, %v4372_v43  ;;  %v3223_v13 = vpop.permute.xlu1 %3222  ;;  %v3228_v62 = vpop.permute.xlu0 %3227  ;;  %2571 = vmatprep.subr.mxu1 %v1152_v8  ;;  %v3169_v35 = vunpack.i.l.bf16 %v4340_v29  ;;  %v3164_v29 = vunpack.i.l.bf16 %v4338_v18 }
 0x176   : > { %v3225_v40 = vunpack.i.h.bf16 %v3223_v13  ;;  %v3224_v38 = vunpack.i.l.bf16 %v3223_v13  ;;  %v3230_v59 = vunpack.i.h.bf16 %v3228_v62  ;;  %v3229_v37 = vunpack.i.l.bf16 %v3228_v62  ;;  %2572 = vmatpush3.msra.mxu1 %v4143_v1 }
 0x177   : > { %3387 = vrot.lane.b32.xlu0 %v4376_v0, %s3724_s8  ;;  %2573 = vmatprep.subr.mxu1 %v1151_v20  ;;  %v3189_v1 = vunpack.i.l.bf16 %v4367_v15  ;;  %v3160_v13 = vunpack.i.h.bf16 %v4321_v50  ;;  %v3159_v62 = vunpack.i.l.bf16 %v4321_v50  ;;  %v3165_v20 = vunpack.i.h.bf16 %v4338_v18 }
 0x178   : > { %v4383_v49 = vsel %vm571_vm2, %v3224_v38, %v3225_v40  ;;  %v4386_v63 = vsel %vm571_vm2, %v3229_v37, %v3230_v59  ;;  %2574 = vmatpush3.msra.mxu1 %v4120_v14  ;;  %v1144_v60 = vsel %vm696_vm8, %v3174_v12, %v3175_v52  ;;  %v4879_v12 = vld [vmem:[#allocation9_spill] sm:$0xff] }
 0x179   : > { %v4393_v61 = vpack.i.bf16 %v3225_v40, %v4383_v49  ;;  %v3233_v57 = vpop.permute.xlu1 %3232  ;;  %v3238_v54 = vpop.permute.xlu0 %3237  ;;  %2575 = vmatprep.subr.mxu1 %v1150_v2  ;;  %v4398_v14 = vpack.i.bf16 %v3230_v59, %v4386_v63  ;;  %v1147_v53 = vsel %vm696_vm8, %v3189_v1, %v3190_v30 }
 0x17a   : > { %v3235_v36 = vunpack.i.h.bf16 %v3233_v57  ;;  %v3234_v28 = vunpack.i.l.bf16 %v3233_v57  ;;  %2576 = vmatpush3.msra.mxu1 %v4132_v56  ;;  %v3240_v15 = vunpack.i.h.bf16 %v3238_v54  ;;  %v3239_v48 = vunpack.i.l.bf16 %v3238_v54 }
 0x17b   : > { %3397 = vrot.lane.b32.xlu0 %v4393_v61, %s3724_s8  ;;  %2577 = vmatprep.subr.mxu1 %v1149_v45  ;;  %v3154_v45 = vunpack.i.l.bf16 %v4319_v3 }
 0x17c   : > { %2578 = vmatpush3.msra.mxu1 %v4106_v34  ;;  %v4410_v55 = vsel %vm558_vm1, %v3234_v28, %v3235_v36  ;;  %v3179_v34 = vunpack.i.l.bf16 %v4354_v23  ;;  %v4432_v5 = vsel %vm558_vm1, %v3239_v48, %v3240_v15  ;;  %v3155_v28 = vunpack.i.h.bf16 %v4319_v3 }
 0x17d   : > { %v3243_v21 = vpop.permute.xlu1 %3242  ;;  %v4406_v56 = vpop.permute.xlu0 %3247  ;;  %2579 = vmatprep.subr.mxu1 %v1148_v9  ;;  %v4450_v40 = vpack.i.bf16 %v3240_v15, %v4432_v5  ;;  %v1142_v9 = vsel %vm696_vm8, %v3164_v29, %v3165_v20  ;;  %v3150_v15 = vunpack.i.h.bf16 %v4303_v51  ;;  %v3149_v48 = vunpack.i.l.bf16 %v4303_v51  ;;  %v4878_v51 = vld [vmem:[#allocation20_spill] sm:$0xff] }
 0x17e   : > { %v3245_v39 = vunpack.i.h.bf16 %v3243_v21  ;;  %v3244_v41 = vunpack.i.l.bf16 %v3243_v21  ;;  %2580 = vmatpush3.msra.mxu1 %v4117_v11  ;;  %v4425_v11 = vpack.i.bf16 %v3235_v36, %v4410_v55  ;;  %v3250_v8 = vunpack.i.h.bf16 %v4406_v56  ;;  %v1225_v20 = vld [vmem:[%s4031_s17 + $0x24] sm:$0xff] }
 0x17f   : > { %3407 = vrot.lane.b32.xlu0 %v4398_v14, %s3724_s8  ;;  %2581 = vmatprep.subr.mxu1 %v1147_v53  ;;  %v3249_v44 = vunpack.i.l.bf16 %v4406_v56  ;;  %v1145_v19 = vsel %vm696_vm8, %v3179_v34, %v3180_v42  ;;  %v3039_v52 = vunpack.i.l.bf16 %v4878_v51 }
 0x180   : > { %v4418_v17 = vsel %vm623_vm6, %v3244_v41, %v3245_v39  ;;  %2582 = vmatpush3.msra.mxu1 %v4092_v6 }
 0x181   : > { %v3421_v23 = vpack.i.bf16 %v3245_v39, %v4418_v17  ;;  %v3253_v26 = vpop.permute.xlu1 %3252  ;;  %v4428_v16 = vpop.permute.xlu0 %3257  ;;  %2583 = vmatprep.subr.mxu1 %v1146_v10  ;;  %v4456_v1 = vsel %vm543_vm0, %v3249_v44, %v3250_v8  ;;  %v3040_v10 = vunpack.i.h.bf16 %v4878_v51  ;;  %v1139_v44 = vsel %vm696_vm8, %v3149_v48, %v3150_v15  ;;  %v4885_v15 = vld [vmem:[#allocation4_spill] sm:$0xff] }
 0x182   : > { %v3255_v6 = vunpack.i.h.bf16 %v3253_v26  ;;  %v3254_v24 = vunpack.i.l.bf16 %v3253_v26  ;;  %2584 = vmatpush3.msra.mxu1 %v4103_v33  ;;  %v3260_v18 = vunpack.i.h.bf16 %v4428_v16  ;;  %v3259_v57 = vunpack.i.l.bf16 %v4428_v16 }
 0x183   : > { %3422 = vrot.lane.b32.xlu1 %v3421_v23, %s3723_s5  ;;  %3417 = vrot.lane.b32.xlu0 %v4425_v11, %s3724_s8  ;;  %v4478_v21 = vpack.i.bf16 %v3250_v8, %v4456_v1  ;;  %v1140_v26 = vsel %vm696_vm8, %v3154_v45, %v3155_v28  ;;  %v4881_v8 = vld [vmem:[#allocation10_spill] sm:$0xff]  ;;  %v4525_v45 = vld [vmem:[%s4031_s17 + $0x38] ss:$12 sps:$4 sm:$0xff]  }
 0x184   : > { %v4446_v33 = vsel %vm623_vm6, %v3254_v24, %v3255_v6  ;;  %2585 = vmatprep.subr.mxu1 %v1145_v19  ;;  %v4482_v3 = vsel %vm543_vm0, %v3259_v57, %v3260_v18  ;;  %v1231_v57 = vunpack.c.h.bf16 %v1225_v20  ;;  %v4884_v28 = vld [vmem:[#allocation14_spill] sm:$0xff]  ;;  %v1659_v48 = vunpack.c.l.bf16 %v4525_v45 }
 0x185   : > { %v3431_v38 = vpack.i.bf16 %v3255_v6, %v4446_v33  ;;  %2586 = vmatpush3.msra.mxu1 %v4075_v47  ;;  %v3263_v59 = vpop.permute.xlu1 %3262  ;;  %v3268_v37 = vpop.permute.xlu0 %3267  ;;  %v1143_v47 = vsel %vm696_vm8, %v3169_v35, %v3170_v58  ;;  %v4498_v16 = vpack.i.bf16 %v3260_v18, %v4482_v3  ;;  %v4880_v58 = vld [vmem:[#allocation19_spill] sm:$0xff] }
 0x186   : > { %v3265_v50 = vunpack.i.h.bf16 %v3263_v59  ;;  %v3264_v22 = vunpack.i.l.bf16 %v3263_v59  ;;  %v3270_v2 = vunpack.i.h.bf16 %v3268_v37  ;;  %v3269_v30 = vunpack.i.l.bf16 %v3268_v37  ;;  %2587 = vmatprep.subr.mxu1 %v1144_v60  ;;  %v4882_v59 = vld [vmem:[#allocation8_spill] sm:$0xff] }
 0x187   : > { %2588 = vmatpush3.msra.mxu1 %v4089_v4  ;;  %3432 = vrot.lane.b32.xlu1 %v3431_v38, %s3723_s5  ;;  %v3035_v6 = vunpack.i.h.bf16 %v4880_v58  ;;  %v3034_v24 = vunpack.i.l.bf16 %v4880_v58 }
 0x188   : > { %v4464_v54 = vsel %vm610_vm5, %v3264_v22, %v3265_v50  ;;  %v4467_v36 = vsel %vm610_vm5, %v3269_v30, %v3270_v2  ;;  %3427 = vrot.lane.b32.xlu0 %v4450_v40, %s3724_s8  ;;  %2589 = vmatprep.subr.mxu1 %v1143_v47  ;;  %v1227_v22 = vunpack.c.l.bf16 %v4334_v25  ;;  %v4883_v30 = vld [vmem:[#allocation5_spill] sm:$0xff] }
 0x189   : > { %v3441_v4 = vpack.i.bf16 %v3265_v50, %v4464_v54  ;;  %2590 = vmatpush3.msra.mxu1 %v4055_v27  ;;  %v3273_v7 = vpop.permute.xlu1 %3272  ;;  %v3278_v31 = vpop.permute.xlu0 %3277  ;;  %v3451_v39 = vpack.i.bf16 %v3270_v2, %v4467_v36  ;;  %v1141_v27 = vsel %vm696_vm8, %v3159_v62, %v3160_v13  ;;  %v1138_v50 = vsel %vm696_vm8, %v3039_v52, %v3040_v10 }
 0x18a   : > { %v3275_v56 = vunpack.i.h.bf16 %v3273_v7  ;;  %v3274_v53 = vunpack.i.l.bf16 %v3273_v7  ;;  %2591 = vmatprep.subr.mxu1 %v1142_v9  ;;  %v3280_v42 = vunpack.i.h.bf16 %v3278_v31  ;;  %v3279_v34 = vunpack.i.l.bf16 %v3278_v31 }
 0x18b   : > { %2592 = vmatpush3.msra.mxu1 %v4072_v46  ;;  %3442 = vrot.lane.b32.xlu1 %v3441_v4, %s3723_s5  ;;  %v1137_v18 = vsel %vm696_vm8, %v3034_v24, %v3035_v6 }
 0x18c   : > { %v4489_v41 = vsel %vm597_vm4, %v3274_v53, %v3275_v56  ;;  %3437 = vrot.lane.b32.xlu0 %v4478_v21, %s3724_s8  ;;  %2593 = vmatprep.subr.mxu1 %v1141_v27  ;;  %v4507_v19 = vsel %vm597_vm4, %v3279_v34, %v3280_v42  ;;  %v4886_v27 = vld [vmem:[#allocation13_spill] sm:$0xff] }
 0x18d   : > { %2594 = vmatpush3.msra.mxu1 %v4879_v12  ;;  %v3283_v46 = vpop.permute.xlu1 %3282  ;;  %v3288_v23 = vpop.permute.xlu0 %3287  ;;  %v3461_v35 = vpack.i.bf16 %v3275_v56, %v4489_v41  ;;  %v3471_v2 = vpack.i.bf16 %v3280_v42, %v4507_v19  ;;  %v1230_v56 = vunpack.c.l.bf16 %v1225_v20 }
 0x18e   : > { %2595 = vmatprep.subr.mxu1 %v1140_v26  ;;  %v3290_v13 = vunpack.i.h.bf16 %v3288_v23  ;;  %v3289_v62 = vunpack.i.l.bf16 %v3288_v23  ;;  %v3285_v29 = vunpack.i.h.bf16 %v3283_v46  ;;  %v3284_v38 = vunpack.i.l.bf16 %v3283_v46 }
 0x18f   : > { %2596 = vmatpush3.msra.mxu1 %v4881_v8  ;;  %3452 = vrot.lane.b32.xlu1 %v3451_v39, %s3723_s5 }
 0x190   : > { %3447 = vrot.lane.b32.xlu0 %v4498_v16, %s3724_s8  ;;  %2597 = vmatprep.subr.mxu1 %v1139_v44  ;;  %v4520_v47 = vsel %vm584_vm3, %v3289_v62, %v3290_v13  ;;  %v4528_v25 = vsel %vm623_vm6, %v3284_v38, %v3285_v29 }
 0x191   : > { %2598 = vmatpush3.msra.mxu1 %v4882_v59  ;;  %v3293_v37 = vpop.permute.xlu1 %3292  ;;  %v3298_v60 = vpop.permute.xlu0 %3297  ;;  %v3481_v53 = vpack.i.bf16 %v3290_v13, %v4520_v47  ;;  %v3476_v39 = vpack.i.bf16 %v3285_v29, %v4528_v25 }
 0x192   : > { %2599 = vmatprep.subr.mxu1 %v1138_v50  ;;  %v3295_v4 = vunpack.i.h.bf16 %v3293_v37  ;;  %v3294_v7 = vunpack.i.l.bf16 %v3293_v37  ;;  %v3300_v34 = vunpack.i.h.bf16 %v3298_v60  ;;  %v3299_v51 = vunpack.i.l.bf16 %v3298_v60 }
 0x193   : > { %2600 = vmatpush3.msra.mxu1 %v4883_v30  ;;  %3462 = vrot.lane.b32.xlu1 %v3461_v35, %s3723_s5 }
 0x194   : > { %3457 = vrot.lane.b32.xlu0 %v4884_v28, %s3724_s8  ;;  %2601 = vmatprep.subr.mxu1 %v1137_v18  ;;  %v4538_v42 = vsel %vm623_vm6, %v3294_v7, %v3295_v4  ;;  %v4545_v46 = vsel %vm610_vm5, %v3299_v51, %v3300_v34 }
 0x195   : > { %v3303_v31 = vpop.permute.xlu1 %3302  ;;  %v3308_v9 = vpop.permute.xlu0 %3307  ;;  %2602 = vmatpush3.msra.mxu1 %v4885_v15  ;;  %v3486_v12 = vpack.i.bf16 %v3295_v4, %v4538_v42  ;;  %v3496_v24 = vpack.i.bf16 %v3300_v34, %v4545_v46 }
 0x196   : > { %1316 = vmatmul.mubr.f32.vlgmr.msra.gmra.mxu1 %v1227_v22  ;;  %v3305_v23 = vunpack.i.h.bf16 %v3303_v31  ;;  %v3304_v26 = vunpack.i.l.bf16 %v3303_v31  ;;  %v3310_v8 = vunpack.i.h.bf16 %v3308_v9  ;;  %v3309_v44 = vunpack.i.l.bf16 %v3308_v9 }
 0x197   : > { %3472 = vrot.lane.b32.xlu1 %v3471_v2, %s3723_s5  ;;  %1320 = vmatprep.mubr.f32.mxu1 %v1231_v57 }
 0x198   : > { %3467 = vrot.lane.b32.xlu0 %v4886_v27, %s3724_s8  ;;  %v4556_v35 = vsel %vm610_vm5, %v3304_v26, %v3305_v23 }
 0x199   : > { %v3313_v10 = vpop.permute.xlu1 %3312  ;;  %v3318_v52 = vpop.permute.xlu0 %3317  ;;  %v3506_v20 = vpack.i.bf16 %v3305_v23, %v4556_v35 }
 0x19a   : > { %1321 = vmatmul.mubr.f32.gmra.mxu1 %v1230_v56  ;;  %v3315_v29 = vunpack.i.h.bf16 %v3313_v10  ;;  %v3314_v38 = vunpack.i.l.bf16 %v3313_v10  ;;  %v3320_v50 = vunpack.i.h.bf16 %v3318_v52  ;;  %v3319_v22 = vunpack.i.l.bf16 %v3318_v52 }
 0x19b   : > { %3482 = vrot.lane.b32.xlu1 %v3481_v53, %s3723_s5  ;;  %2778 = vmatprep.mubr.msk.f32.mxu1 %vm806_vm7, %v1659_v48 }
 0x19c   : > { %3477 = vrot.lane.b32.xlu0 %v3476_v39, %s3723_s5  ;;  %v4588_v7 = vsel %vm584_vm3, %v3319_v22, %v3320_v50 }
 0x19d   : > { %v4547_v58 = vpop.permute.xlu1 %3322  ;;  %v4549_v6 = vpop.permute.xlu0 %3327  ;;  %v3536_v10 = vpack.i.bf16 %v3320_v50, %v4588_v7 }
 0x19e   : > { %v3325_v31 = vunpack.i.h.bf16 %v4547_v58  ;;  %v3324_v9 = vunpack.i.l.bf16 %v4547_v58  ;;  %v3330_v34 = vunpack.i.h.bf16 %v4549_v6  ;;  %v3329_v51 = vunpack.i.l.bf16 %v4549_v6 }
 0x19f   : > { %3492 = vrot.lane.b32.xlu1 %v4376_v0, %s3723_s5  ;;  %v4567_v0 = vsel %vm597_vm4, %v3309_v44, %v3310_v8 }
 0x1a0   : > { %3487 = vrot.lane.b32.xlu0 %v3486_v12, %s3723_s5  ;;  %v3516_v60 = vpack.i.bf16 %v3310_v8, %v4567_v0  ;;  %v4600_v12 = vsel %vm584_vm3, %v3324_v9, %v3325_v31 }
 0x1a1   : > { %v4558_v13 = vpop.permute.xlu1 %3332  ;;  %v4560_v62 = vpop.permute.xlu0 %3337 }
 0x1a3   : > { %3502 = vrot.lane.b32.xlu1 %v4393_v61, %s3723_s5  ;;  %v4578_v61 = vsel %vm597_vm4, %v3314_v38, %v3315_v29  ;;  %v3334_v38 = vunpack.i.l.bf16 %v4558_v13 }
 0x1a4   : > { %3497 = vrot.lane.b32.xlu0 %v3496_v24, %s3723_s5  ;;  %v3526_v4 = vpack.i.bf16 %v3315_v29, %v4578_v61  ;;  %v3335_v29 = vunpack.i.h.bf16 %v4558_v13 }
 0x1a5   : > { %v4569_v59 = vpop.permute.xlu1 %3342  ;;  %v4571_v37 = vpop.permute.xlu0 %3347 }
 0x1a6   : > { %v4622_v13 = vsel %vm571_vm2, %v3334_v38, %v3335_v29 }
 0x1a7   : > { %3512 = vrot.lane.b32.xlu1 %v4398_v14, %s3723_s5 }
 0x1a8   : > { %3507 = vrot.lane.b32.xlu0 %v3506_v20, %s3723_s5  ;;  %v4609_v20 = vpack.i.bf16 %v3325_v31, %v4600_v12  ;;  %v3344_v31 = vunpack.i.l.bf16 %v4569_v59 }
 0x1a9   : > { %v4580_v2 = vpop.permute.xlu1 %3352  ;;  %v3358_v30 = vpop.permute.xlu0 %3357 }
 0x1aa   : > { %v3360_v18 = vunpack.i.h.bf16 %v3358_v30  ;;  %v3359_v57 = vunpack.i.l.bf16 %v3358_v30 }
 0x1ab   : > { %3522 = vrot.lane.b32.xlu1 %v4425_v11, %s3723_s5 }
 0x1ac   : > { %3517 = vrot.lane.b32.xlu0 %v3516_v60, %s3723_s5  ;;  %v1213_v14 = vsel %vm765_vm9, %v3359_v57, %v3360_v18  ;;  %v3340_v57 = vunpack.i.h.bf16 %v4560_v62 }
 0x1ad   : > { %v3363_v15 = vpop.permute.xlu1 %3362  ;;  %v3368_v56 = vpop.permute.xlu0 %3367  ;;  %2739 = vmatprep.subr.mxu0 %v1213_v14 }
 0x1ae   : > { %v3365_v53 = vunpack.i.h.bf16 %v3363_v15  ;;  %v3364_v48 = vunpack.i.l.bf16 %v3363_v15  ;;  %v3370_v39 = vunpack.i.h.bf16 %v3368_v56  ;;  %v3369_v11 = vunpack.i.l.bf16 %v3368_v56  ;;  %2740 = vmatpush3.msra.mxu0 %v1213_v14 }
 0x1af   : > { %3532 = vrot.lane.b32.xlu1 %v4450_v40, %s3723_s5  ;;  %v4604_v40 = vsel %vm571_vm2, %v3329_v51, %v3330_v34  ;;  %v3345_v14 = vunpack.i.h.bf16 %v4569_v59 }
 0x1b0   : > { %3527 = vrot.lane.b32.xlu0 %v3526_v4, %s3723_s5  ;;  %v1212_v52 = vsel %vm765_vm9, %v3364_v48, %v3365_v53  ;;  %v1211_v58 = vsel %vm765_vm9, %v3369_v11, %v3370_v39  ;;  %v3556_v18 = vpack.i.bf16 %v3330_v34, %v4604_v40  ;;  %v3339_v4 = vunpack.i.l.bf16 %v4560_v62 }
 0x1b1   : > { %v3373_v23 = vpop.permute.xlu1 %3372  ;;  %v3378_v26 = vpop.permute.xlu0 %3377  ;;  %2741 = vmatprep.subr.mxu0 %v1212_v52  ;;  %v4636_v59 = vsel %vm558_vm1, %v3344_v31, %v3345_v14  ;;  %v3350_v48 = vunpack.i.h.bf16 %v4571_v37  ;;  %v3349_v39 = vunpack.i.l.bf16 %v4571_v37  ;;  %v3355_v37 = vunpack.i.h.bf16 %v4580_v2 }
 0x1b2   : > { %v3375_v24 = vunpack.i.h.bf16 %v3373_v23  ;;  %v3374_v8 = vunpack.i.l.bf16 %v3373_v23  ;;  %v3380_v6 = vunpack.i.h.bf16 %v3378_v26  ;;  %v3379_v44 = vunpack.i.l.bf16 %v3378_v26  ;;  %2742 = vmatpush3.msra.mxu0 %v1212_v52 }
 0x1b3   : > { %3542 = vrot.lane.b32.xlu1 %v4478_v21, %s3723_s5  ;;  %2743 = vmatprep.subr.mxu0 %v1211_v58  ;;  %v4631_v53 = vsel %vm558_vm1, %v3339_v4, %v3340_v57  ;;  %v4647_v23 = vsel %vm543_vm0, %v3349_v39, %v3350_v48  ;;  %v3354_v26 = vunpack.i.l.bf16 %v4580_v2 }
 0x1b4   : > { %3537 = vrot.lane.b32.xlu0 %v3536_v10, %s3723_s5  ;;  %2744 = vmatpush3.msra.mxu0 %v1211_v58  ;;  %v1210_v60 = vsel %vm765_vm9, %v3374_v8, %v3375_v24  ;;  %v1209_v21 = vsel %vm765_vm9, %v3379_v44, %v3380_v6  ;;  %v3576_v52 = vpack.i.bf16 %v3340_v57, %v4631_v53  ;;  %v4654_v8 = vld [vmem:[%s4031_s17 + $0x30] sm:$0xff]  ;;  %v1664_v57 = vld [vmem:[%s3869_s7 + $0x28] sm:$0xff] }
 0x1b5   : > { %v3383_v50 = vpop.permute.xlu1 %3382  ;;  %2745 = vmatprep.subr.mxu0 %v1210_v60  ;;  %v4660_v38 = vsel %vm543_vm0, %v3354_v26, %v3355_v37 }
 0x1b6   : > { %v3385_v22 = vunpack.i.h.bf16 %v3383_v50  ;;  %v3384_v30 = vunpack.i.l.bf16 %v3383_v50  ;;  %2746 = vmatpush3.msra.mxu0 %v1210_v60  ;;  %v1658_v60 = vunpack.c.h.bf16 %v4654_v8  ;;  %v3601_v50 = vpack.i.bf16 %v3355_v37, %v4660_v38 }
 0x1b7   : > { %3552 = vrot.lane.b32.xlu1 %v4498_v16, %s3723_s5  ;;  %2747 = vmatprep.subr.mxu0 %v1209_v21  ;;  %v3566_v16 = vpack.i.bf16 %v3335_v29, %v4622_v13  ;;  %v1232_v29 = vunpack.c.h.bf16 %v4361_v32  ;;  %v4887_v32 = vld [vmem:[#allocation16_spill] sm:$0xff] }
 0x1b8   : > { %3547 = vrot.lane.b32.xlu0 %v4609_v20, %s3723_s5  ;;  %2748 = vmatpush3.msra.mxu0 %v1209_v21  ;;  %v1208_v9 = vsel %vm765_vm9, %v3384_v30, %v3385_v22  ;;  %v4888_v22 = vld [vmem:[#allocation18_spill] sm:$0xff]  ;;  %v1663_v30 = vld [vmem:[%s3869_s7 + $0x20] sm:$0xff]  ;;  %v1234_v21 = vld [vmem:[%s3869_s7 + $0x18] sm:$0xff] }
 0x1b9   : > { %v3393_v15 = vpop.permute.xlu1 %3392  ;;  %2749 = vmatprep.subr.mxu0 %v1208_v9 }
 0x1ba   : > { %v3395_v62 = vunpack.i.h.bf16 %v3393_v15  ;;  %v3394_v56 = vunpack.i.l.bf16 %v3393_v15  ;;  %2750 = vmatpush3.msra.mxu0 %v1208_v9 }
 0x1bb   : > { %3562 = vrot.lane.b32.xlu1 %v4884_v28, %s3723_s5  ;;  %v3581_v28 = vpack.i.bf16 %v3345_v14, %v4636_v59  ;;  %v2102_v14 = vld [vmem:[%s3869_s7 + $0x38] sm:$0xff] }
 0x1bc   : > { %3557 = vrot.lane.b32.xlu0 %v3556_v18, %s3723_s5  ;;  %v1207_v11 = vsel %vm765_vm9, %v3394_v56, %v3395_v62 }
 0x1bd   : > { %v3403_v34 = vpop.permute.xlu1 %3402  ;;  %2751 = vmatprep.subr.mxu0 %v1207_v11 }
 0x1be   : > { %v3405_v51 = vunpack.i.h.bf16 %v3403_v34  ;;  %v3404_v10 = vunpack.i.l.bf16 %v3403_v34  ;;  %2752 = vmatpush3.msra.mxu0 %v1207_v11 }
 0x1bf   : > { %3572 = vrot.lane.b32.xlu1 %v4886_v27, %s3723_s5  ;;  %v3591_v27 = vpack.i.bf16 %v3350_v48, %v4647_v23 }
 0x1c0   : > { %3567 = vrot.lane.b32.xlu0 %v3566_v16, %s3723_s5  ;;  %v1206_v58 = vsel %vm765_vm9, %v3404_v10, %v3405_v51 }
 0x1c1   : > { %v3413_v24 = vpop.permute.xlu1 %3412  ;;  %2753 = vmatprep.subr.mxu0 %v1206_v58 }
 0x1c2   : > { %v3415_v6 = vunpack.i.h.bf16 %v3413_v24  ;;  %v3414_v44 = vunpack.i.l.bf16 %v3413_v24  ;;  %2754 = vmatpush3.msra.mxu0 %v1206_v58 }
 0x1c3   : > { %3582 = vrot.lane.b32.xlu1 %v3581_v28, %s3723_s5 }
 0x1c4   : > { %3577 = vrot.lane.b32.xlu0 %v3576_v52, %s3723_s5  ;;  %v1205_v2 = vsel %vm765_vm9, %v3414_v44, %v3415_v6 }
 0x1c5   : > { %2755 = vmatprep.subr.mxu0 %v1205_v2 }
 0x1c6   : > { %2756 = vmatpush3.msra.mxu0 %v1205_v2 }
 0x1c7   : > { %3592 = vrot.lane.b32.xlu1 %v3591_v27, %s3723_s5  ;;  %2758 = vmatmul.mubr.msk.f32.vlgmr.msra.gmra.mxu0 %vm806_vm7, %v1232_v29 }
 0x1c8   : > { %3587 = vrot.lane.b32.xlu0 %v4609_v20, %s3724_s8  ;;  %1745 = vmatprep.mubr.f32.mxu0 %v1658_v60  ;;  %v1233_v20 = vld [vmem:[%s3869_s7 + $0x10] sm:$0xff] }
 0x1cb   : > { %3602 = vrot.lane.b32.xlu1 %v3601_v50, %s3723_s5 }
 0x1cc   : > { %3597 = vrot.lane.b32.xlu0 %v3556_v18, %s3724_s8  ;;  %v2101_v18 = vld [vmem:[%s3869_s7 + $0x30] sm:$0xff] }
 0x1cf   : > { %3612 = vrot.lane.b32.xlu1 %v4887_v32, %s3723_s5 }
 0x1d0   : > { %3607 = vrot.lane.b32.xlu0 %v3566_v16, %s3724_s8 }
 0x1d3   : > { %3622 = vrot.lane.b32.xlu1 %v4888_v22, %s3723_s5 }
 0x1d4   : > { %3617 = vrot.lane.b32.xlu0 %v3576_v52, %s3724_s8 }
 0x1d7   : > { %3632 = vrot.lane.b32.xlu1 %v3591_v27, %s3724_s8 }
 0x1d8   : > { %3627 = vrot.lane.b32.xlu0 %v3581_v28, %s3724_s8 }
 0x1db   : > { %3642 = vrot.lane.b32.xlu1 %v4887_v32, %s3724_s8 }
 0x1dc   : > { %3637 = vrot.lane.b32.xlu0 %v3601_v50, %s3724_s8 }
 0x1df   : > { %1237 = vperm.xlu1 %2959, %v1233_v20  }
 0x1e0   : > { %3647 = vrot.lane.b32.xlu0 %v4888_v22, %s3724_s8 }
 0x1e3   : > { %1667 = vperm.xlu1 %2959, %v1663_v30  }
 0x1e4   : > { %1242 = vperm.xlu0 %2960, %v1234_v21  }
 0x1e7   : > { %2105 = vperm.xlu1 %2959, %v2101_v18  }
 0x1e8   : > { %1672 = vperm.xlu0 %2960, %v1664_v57  }
 0x1e9   : > { %v3388_v4 = vpop.permute.xlu0 %3387 }
 0x1ea   : > { %v3390_v31 = vunpack.i.h.bf16 %v3388_v4  ;;  %v3389_v9 = vunpack.i.l.bf16 %v3388_v4 }
 0x1ec   : > { %2110 = vperm.xlu0 %2960, %v2102_v14   ;;  %v1643_v15 = vsel %vm765_vm9, %v3389_v9, %v3390_v31 }
 0x1ed   : > { %v3398_v62 = vpop.permute.xlu0 %3397  ;;  %2760 = vmatprep.subr.mxu1 %v1643_v15 }
 0x1ee   : > { %v3400_v56 = vunpack.i.h.bf16 %v3398_v62  ;;  %v3399_v16 = vunpack.i.l.bf16 %v3398_v62  ;;  %2761 = vmatpush3.msra.mxu1 %v1643_v15 }
 0x1f0   : > { %v1642_v48 = vsel %vm765_vm9, %v3399_v16, %v3400_v56 }
 0x1f1   : > { %v3408_v39 = vpop.permute.xlu0 %3407  ;;  %2762 = vmatprep.subr.mxu1 %v1642_v48 }
 0x1f2   : > { %v3410_v11 = vunpack.i.h.bf16 %v3408_v39  ;;  %v3409_v34 = vunpack.i.l.bf16 %v3408_v39  ;;  %2763 = vmatpush3.msra.mxu1 %v1642_v48 }
 0x1f4   : > { %v1641_v51 = vsel %vm765_vm9, %v3409_v34, %v3410_v11 }
 0x1f5   : > { %v3423_v10 = vpop.permute.xlu1 %3422  ;;  %v3418_v52 = vpop.permute.xlu0 %3417  ;;  %2764 = vmatprep.subr.mxu1 %v1641_v51 }
 0x1f6   : > { %v3425_v28 = vunpack.i.h.bf16 %v3423_v10  ;;  %v3424_v37 = vunpack.i.l.bf16 %v3423_v10  ;;  %v3420_v26 = vunpack.i.h.bf16 %v3418_v52  ;;  %v3419_v58 = vunpack.i.l.bf16 %v3418_v52  ;;  %2765 = vmatpush3.msra.mxu1 %v1641_v51 }
 0x1f8   : > { %v1582_v24 = vsel %vm696_vm8, %v3424_v37, %v3425_v28  ;;  %v1640_v6 = vsel %vm765_vm9, %v3419_v58, %v3420_v26 }
 0x1f9   : > { %v3433_v44 = vpop.permute.xlu1 %3432  ;;  %2620 = vmatprep.subr.mxu0 %v1582_v24  ;;  %2766 = vmatprep.subr.mxu1 %v1640_v6 }
 0x1fa   : > { %v3435_v27 = vunpack.i.h.bf16 %v3433_v44  ;;  %v3434_v29 = vunpack.i.l.bf16 %v3433_v44  ;;  %v3428_v2 = vpop.permute.xlu0 %3427  ;;  %2621 = vmatpush3.msra.mxu0 %v4418_v17  ;;  %2767 = vmatpush3.msra.mxu1 %v1640_v6  ;;  %v4710_v6 = vld [vmem:[%s4031_s17 + $0x48] sm:$0xff] }
 0x1fb   : > { %v3430_v60 = vunpack.i.h.bf16 %v3428_v2  ;;  %v3429_v50 = vunpack.i.l.bf16 %v3428_v2 }
 0x1fc   : > { %v1581_v32 = vsel %vm696_vm8, %v3434_v29, %v3435_v27  ;;  %v1662_v29 = vunpack.c.h.bf16 %v4525_v45 }
 0x1fd   : > { %v3443_v22 = vpop.permute.xlu1 %3442  ;;  %2622 = vmatprep.subr.mxu0 %v1581_v32  ;;  %v1639_v20 = vsel %vm765_vm9, %v3429_v50, %v3430_v60  ;;  %v2096_v50 = vunpack.c.h.bf16 %v4710_v6 }
 0x1fe   : > { %v3445_v30 = vunpack.i.h.bf16 %v3443_v22  ;;  %v3444_v21 = vunpack.i.l.bf16 %v3443_v22  ;;  %v3438_v18 = vpop.permute.xlu0 %3437  ;;  %2768 = vmatprep.subr.mxu1 %v1639_v20  ;;  %2623 = vmatpush3.msra.mxu0 %v4446_v33 }
 0x1ff   : > { %v3440_v57 = vunpack.i.h.bf16 %v3438_v18  ;;  %v3439_v4 = vunpack.i.l.bf16 %v3438_v18  ;;  %2769 = vmatpush3.msra.mxu1 %v1639_v20 }
 0x200   : > { %v1580_v17 = vsel %vm696_vm8, %v3444_v21, %v3445_v30 }
 0x201   : > { %v3453_v14 = vpop.permute.xlu1 %3452  ;;  %2624 = vmatprep.subr.mxu0 %v1580_v17  ;;  %v1638_v31 = vsel %vm765_vm9, %v3439_v4, %v3440_v57 }
 0x202   : > { %v3455_v9 = vunpack.i.h.bf16 %v3453_v14  ;;  %v3454_v15 = vunpack.i.l.bf16 %v3453_v14  ;;  %v3448_v62 = vpop.permute.xlu0 %3447  ;;  %2770 = vmatprep.subr.mxu1 %v1638_v31  ;;  %2625 = vmatpush3.msra.mxu0 %v4464_v54 }
 0x203   : > { %v3450_v56 = vunpack.i.h.bf16 %v3448_v62  ;;  %v3449_v16 = vunpack.i.l.bf16 %v3448_v62  ;;  %2771 = vmatpush3.msra.mxu1 %v1638_v31 }
 0x204   : > { %v1579_v33 = vsel %vm696_vm8, %v3454_v15, %v3455_v9 }
 0x205   : > { %v3463_v48 = vpop.permute.xlu1 %3462  ;;  %2626 = vmatprep.subr.mxu0 %v1579_v33  ;;  %v1637_v39 = vsel %vm765_vm9, %v3449_v16, %v3450_v56 }
 0x206   : > { %v3465_v11 = vunpack.i.h.bf16 %v3463_v48  ;;  %v3464_v34 = vunpack.i.l.bf16 %v3463_v48  ;;  %v3458_v51 = vpop.permute.xlu0 %3457  ;;  %2772 = vmatprep.subr.mxu1 %v1637_v39  ;;  %2627 = vmatpush3.msra.mxu0 %v4467_v36 }
 0x207   : > { %v3460_v10 = vunpack.i.h.bf16 %v3458_v51  ;;  %v3459_v52 = vunpack.i.l.bf16 %v3458_v51  ;;  %2773 = vmatpush3.msra.mxu1 %v1637_v39 }
 0x208   : > { %v1578_v54 = vsel %vm696_vm8, %v3464_v34, %v3465_v11 }
 0x209   : > { %v3473_v28 = vpop.permute.xlu1 %3472  ;;  %2628 = vmatprep.subr.mxu0 %v1578_v54  ;;  %v1636_v37 = vsel %vm765_vm9, %v3459_v52, %v3460_v10 }
 0x20a   : > { %v3475_v26 = vunpack.i.h.bf16 %v3473_v28  ;;  %v3474_v58 = vunpack.i.l.bf16 %v3473_v28  ;;  %v3468_v24 = vpop.permute.xlu0 %3467  ;;  %2774 = vmatprep.subr.mxu1 %v1636_v37  ;;  %2629 = vmatpush3.msra.mxu0 %v4489_v41 }
 0x20b   : > { %v3470_v44 = vunpack.i.h.bf16 %v3468_v24  ;;  %v3469_v27 = vunpack.i.l.bf16 %v3468_v24  ;;  %2775 = vmatpush3.msra.mxu1 %v1636_v37 }
 0x20c   : > { %v1577_v36 = vsel %vm696_vm8, %v3474_v58, %v3475_v26 }
 0x20d   : > { %v3483_v2 = vpop.permute.xlu1 %3482  ;;  %2630 = vmatprep.subr.mxu0 %v1577_v36  ;;  %v1635_v60 = vsel %vm765_vm9, %v3469_v27, %v3470_v44 }
 0x20e   : > { %v3485_v32 = vunpack.i.h.bf16 %v3483_v2  ;;  %v3484_v22 = vunpack.i.l.bf16 %v3483_v2  ;;  %v3478_v20 = vpop.permute.xlu0 %3477  ;;  %2776 = vmatprep.subr.mxu1 %v1635_v60  ;;  %2631 = vmatpush3.msra.mxu0 %v4507_v19 }
 0x20f   : > { %v3480_v41 = vunpack.i.h.bf16 %v3478_v20  ;;  %v3479_v30 = vunpack.i.l.bf16 %v3478_v20  ;;  %2777 = vmatpush3.msra.mxu1 %v1635_v60 }
 0x210   : > { %v1576_v21 = vsel %vm696_vm8, %v3484_v22, %v3485_v32  ;;  %2779 = vmatmul.mubr.msk.f32.vlgmr.msra.gmra.mxu1 %vm806_vm7, %v1662_v29 }
 0x211   : > { %v3493_v45 = vpop.permute.xlu1 %3492  ;;  %2632 = vmatprep.subr.mxu0 %v1576_v21  ;;  %v2020_v18 = vsel %vm696_vm8, %v3479_v30, %v3480_v41  ;;  %2183 = vmatprep.mubr.f32.mxu1 %v2096_v50 }
 0x212   : > { %v3495_v57 = vunpack.i.h.bf16 %v3493_v45  ;;  %v3494_v4 = vunpack.i.l.bf16 %v3493_v45  ;;  %v3488_v17 = vpop.permute.xlu0 %3487  ;;  %2669 = vmatprep.subr.mxu1 %v2020_v18  ;;  %2633 = vmatpush3.msra.mxu0 %v4520_v47 }
 0x213   : > { %v3490_v14 = vunpack.i.h.bf16 %v3488_v17  ;;  %v3489_v19 = vunpack.i.l.bf16 %v3488_v17  ;;  %2670 = vmatpush3.msra.mxu1 %v4528_v25 }
 0x214   : > { %v1575_v31 = vsel %vm696_vm8, %v3494_v4, %v3495_v57 }
 0x215   : > { %v3503_v9 = vpop.permute.xlu1 %3502  ;;  %2634 = vmatprep.subr.mxu0 %v1575_v31  ;;  %v2019_v15 = vsel %vm696_vm8, %v3489_v19, %v3490_v14 }
 0x216   : > { %v3505_v62 = vunpack.i.h.bf16 %v3503_v9  ;;  %v3504_v56 = vunpack.i.l.bf16 %v3503_v9  ;;  %v3498_v16 = vpop.permute.xlu0 %3497  ;;  %2671 = vmatprep.subr.mxu1 %v2019_v15  ;;  %2635 = vmatpush3.msra.mxu0 %v4372_v43 }
 0x217   : > { %v3500_v33 = vunpack.i.h.bf16 %v3498_v16  ;;  %v3499_v48 = vunpack.i.l.bf16 %v3498_v16  ;;  %2672 = vmatpush3.msra.mxu1 %v4538_v42 }
 0x218   : > { %v1574_v47 = vsel %vm696_vm8, %v3504_v56, %v3505_v62  ;;  %v4889_v62 = vld [vmem:[#allocation6_spill] sm:$0xff] }
 0x219   : > { %v3513_v39 = vpop.permute.xlu1 %3512  ;;  %2636 = vmatprep.subr.mxu0 %v1574_v47  ;;  %v2018_v25 = vsel %vm696_vm8, %v3499_v48, %v3500_v33  ;;  %v4890_v48 = vld [vmem:[#allocation7_spill] sm:$0xff] }
 0x21a   : > { %v3515_v11 = vunpack.i.h.bf16 %v3513_v39  ;;  %v3514_v34 = vunpack.i.l.bf16 %v3513_v39  ;;  %v3508_v51 = vpop.permute.xlu0 %3507  ;;  %2673 = vmatprep.subr.mxu1 %v2018_v25  ;;  %2637 = vmatpush3.msra.mxu0 %v4383_v49 }
 0x21b   : > { %v3510_v10 = vunpack.i.h.bf16 %v3508_v51  ;;  %v3509_v52 = vunpack.i.l.bf16 %v3508_v51  ;;  %2674 = vmatpush3.msra.mxu1 %v4545_v46 }
 0x21c   : > { %v1573_v43 = vsel %vm696_vm8, %v3514_v34, %v3515_v11 }
 0x21d   : > { %v3523_v42 = vpop.permute.xlu1 %3522  ;;  %2638 = vmatprep.subr.mxu0 %v1573_v43  ;;  %v2017_v54 = vsel %vm696_vm8, %v3509_v52, %v3510_v10 }
 0x21e   : > { %v3525_v28 = vunpack.i.h.bf16 %v3523_v42  ;;  %v3524_v37 = vunpack.i.l.bf16 %v3523_v42  ;;  %v3518_v26 = vpop.permute.xlu0 %3517  ;;  %2675 = vmatprep.subr.mxu1 %v2017_v54  ;;  %2639 = vmatpush3.msra.mxu0 %v4386_v63 }
 0x21f   : > { %v3520_v58 = vunpack.i.h.bf16 %v3518_v26  ;;  %v3519_v49 = vunpack.i.l.bf16 %v3518_v26  ;;  %2676 = vmatpush3.msra.mxu1 %v4556_v35 }
 0x220   : > { %v1572_v46 = vsel %vm696_vm8, %v3524_v37, %v3525_v28 }
 0x221   : > { %v3533_v24 = vpop.permute.xlu1 %3532  ;;  %2640 = vmatprep.subr.mxu0 %v1572_v46  ;;  %v2016_v44 = vsel %vm696_vm8, %v3519_v49, %v3520_v58 }
 0x222   : > { %v3535_v27 = vunpack.i.h.bf16 %v3533_v24  ;;  %v3534_v36 = vunpack.i.l.bf16 %v3533_v24  ;;  %v3528_v29 = vpop.permute.xlu0 %3527  ;;  %2677 = vmatprep.subr.mxu1 %v2016_v44  ;;  %2641 = vmatpush3.msra.mxu0 %v4410_v55  ;;  %v2738_v18 = vpop.f32.mrf.mxu1  ;;  %v1657_v44 = vunpack.c.l.bf16 %v4654_v8 }
 0x223   : > { %v3530_v2 = vunpack.i.h.bf16 %v3528_v29  ;;  %v3529_v63 = vunpack.i.l.bf16 %v3528_v29  ;;  %2678 = vmatpush3.msra.mxu1 %v4567_v0 }
 0x224   : > { %v2554_v35 = vpop.f32.mrf.mxu0  ;;  %v1571_v60 = vsel %vm696_vm8, %v3534_v36, %v3535_v27  ;;  %v954_v16 = vpop.f32.mrf.mxu1 }
 0x225   : > { %v3543_v50 = vpop.permute.xlu1 %3542  ;;  %2642 = vmatprep.subr.mxu0 %v1571_v60  ;;  %v2015_v32 = vsel %vm696_vm8, %v3529_v63, %v3530_v2  ;;  %v4774_v63 = vld [vmem:[%s4031_s17 + $0x50] ss:$12 sps:$4 sm:$0xff]  }
 0x226   : > { %v3545_v22 = vunpack.i.h.bf16 %v3543_v50  ;;  %v3544_v20 = vunpack.i.l.bf16 %v3543_v50  ;;  %v3538_v41 = vpop.permute.xlu0 %3537  ;;  %2679 = vmatprep.subr.mxu1 %v2015_v32  ;;  %v2555_v30 = vpop.f32.mrf.mxu0  ;;  %2643 = vmatpush3.msra.mxu0 %v4432_v5  ;;  %v4893_v32 = vld [vmem:[#allocation11_spill] sm:$0xff] }
 0x227   : > { %v3540_v55 = vunpack.i.h.bf16 %v3538_v41  ;;  %v3539_v0 = vunpack.i.l.bf16 %v3538_v41  ;;  %v2556_v21 = vadd.f32 %v2555_v30, %v2554_v35  ;;  %2680 = vmatpush3.msra.mxu1 %v4578_v61  ;;  %v2097_v41 = vunpack.c.l.bf16 %v4774_v63 }
 0x228   : > { %v2557_v45 = vpop.f32.mrf.mxu0  ;;  %v1570_v57 = vsel %vm696_vm8, %v3544_v20, %v3545_v22  ;;  %v4894_v22 = vunpack.c.l.bf16 %v4893_v32 }
 0x229   : > { %v3553_v4 = vpop.permute.xlu1 %3552  ;;  %2644 = vmatprep.subr.mxu0 %v1570_v57  ;;  %v2014_v17 = vsel %vm696_vm8, %v3539_v0, %v3540_v55  ;;  %v880_v56 = vadd.f32 %v2556_v21, %v4889_v62 }
 0x22a   : > { %v3555_v14 = vunpack.i.h.bf16 %v3553_v4  ;;  %v3554_v19 = vunpack.i.l.bf16 %v3553_v4  ;;  %v3548_v31 = vpop.permute.xlu0 %3547  ;;  %2681 = vmatprep.subr.mxu1 %v2014_v17  ;;  %v2558_v5 = vpop.f32.mrf.mxu0  ;;  %2645 = vmatpush3.msra.mxu0 %v4456_v1 }
 0x22b   : > { %v3550_v9 = vunpack.i.h.bf16 %v3548_v31  ;;  %v3549_v15 = vunpack.i.l.bf16 %v3548_v31  ;;  %v2559_v61 = vadd.f32 %v2558_v5, %v2557_v45  ;;  %2682 = vmatpush3.msra.mxu1 %v4588_v7  ;;  %v955_v51 = vadd.f32 %v954_v16, %v880_v56 }
 0x22c   : > { %v1569_v33 = vsel %vm696_vm8, %v3554_v19, %v3555_v14 }
 0x22d   : > { %v885_v47 = vadd.f32 %v2559_v61, %v4890_v48  ;;  %v3563_v39 = vpop.permute.xlu1 %3562  ;;  %2646 = vmatprep.subr.mxu0 %v1569_v33  ;;  %v2013_v25 = vsel %vm696_vm8, %v3549_v15, %v3550_v9 }
 0x22e   : > { %v3565_v11 = vunpack.i.h.bf16 %v3563_v39  ;;  %v3564_v1 = vunpack.i.l.bf16 %v3563_v39  ;;  %v3558_v34 = vpop.permute.xlu0 %3557  ;;  %2683 = vmatprep.subr.mxu1 %v2013_v25  ;;  %2647 = vmatpush3.msra.mxu0 %v4482_v3  ;;  %v1655_v3 = vld [vmem:[%s4031_s17 + $0x3c] sm:$0xff]  ;;  %v2093_v25 = vld [vmem:[%s4031_s17 + $0x54] sm:$0xff] }
 0x22f   : > { %v960_v10 = vadd.f32 %v2738_v18, %v885_v47  ;;  %v3560_v7 = vunpack.i.h.bf16 %v3558_v34  ;;  %v3559_v52 = vunpack.i.l.bf16 %v3558_v34  ;;  %2684 = vmatpush3.msra.mxu1 %v4600_v12  ;;  %v4891_v12 = vld [vmem:[#allocation12_spill] sm:$0xff]  ;;  %v1661_v36 = vunpack.c.h.bf16 %v1655_v3 }
 0x230   : > { %v1568_v43 = vsel %vm696_vm8, %v3564_v1, %v3565_v11  ;;  %v4892_v49 = vunpack.c.l.bf16 %v4891_v12  ;;  %v1660_v8 = vunpack.c.l.bf16 %v1655_v3  ;;  %v4896_v3 = vld [vmem:[#allocation17_spill] sm:$0xff] }
 0x231   : > { %v2502_v42 = vpack.c.bf16 %v960_v10, %v955_v51  ;;  %v3573_v54 = vpop.permute.xlu1 %3572  ;;  %v2012_v28 = vsel %vm696_vm8, %v3559_v52, %v3560_v7  ;;  %2648 = vmatprep.subr.mxu0 %v1568_v43  ;;  %v4895_v51 = vld [vmem:[#allocation15_spill] sm:$0xff]  ;;  %v2099_v43 = vunpack.c.h.bf16 %v2093_v25 }
 0x232   : > { %v3575_v37 = vunpack.i.h.bf16 %v3573_v54  ;;  %v3574_v26 = vunpack.i.l.bf16 %v3573_v54  ;;  %v3568_v58 = vpop.permute.xlu0 %3567  ;;  %2685 = vmatprep.subr.mxu1 %v2012_v28  ;;  %2649 = vmatpush3.msra.mxu0 %v4892_v49 }
 0x233   : > { %2503 = vst [vmem:[%s4761_s13] sm:$0xff] %v2502_v42   ;;  %v3570_v46 = vunpack.i.h.bf16 %v3568_v58  ;;  %v3569_v24 = vunpack.i.l.bf16 %v3568_v58  ;;  %2686 = vmatpush3.msra.mxu1 %v4604_v40 }
 0x234   : > { %v1567_v27 = vsel %vm696_vm8, %v3574_v26, %v3575_v37  ;;  %v2098_v37 = vunpack.c.l.bf16 %v2093_v25 }
 0x235   : > { %v3583_v29 = vpop.permute.xlu1 %3582  ;;  %2650 = vmatprep.subr.mxu0 %v1567_v27  ;;  %v2011_v2 = vsel %vm696_vm8, %v3569_v24, %v3570_v46 }
 0x236   : > { %v3585_v35 = vunpack.i.h.bf16 %v3583_v29  ;;  %v3584_v60 = vunpack.i.l.bf16 %v3583_v29  ;;  %v3578_v50 = vpop.permute.xlu0 %3577  ;;  %2687 = vmatprep.subr.mxu1 %v2011_v2  ;;  %2651 = vmatpush3.msra.mxu0 %v4894_v22 }
 0x237   : > { %v3580_v20 = vunpack.i.h.bf16 %v3578_v50  ;;  %v3579_v40 = vunpack.i.l.bf16 %v3578_v50  ;;  %2688 = vmatpush3.msra.mxu1 %v4622_v13  ;;  %1746 = vmatmul.mubr.f32.vlgmr.msra.gmra.mxu0 %v1657_v44 }
 0x238   : > { %1750 = vmatprep.mubr.f32.mxu0 %v1661_v36  ;;  %v2009_v0 = vsel %vm696_vm8, %v3584_v60, %v3585_v35 }
 0x239   : > { %v3593_v30 = vpop.permute.xlu1 %3592  ;;  %v2010_v55 = vsel %vm696_vm8, %v3579_v40, %v3580_v20  ;;  %v2100_v20 = vunpack.c.h.bf16 %v4774_v63 }
 0x23a   : > { %v3595_v21 = vunpack.i.h.bf16 %v3593_v30  ;;  %v3594_v45 = vunpack.i.l.bf16 %v3593_v30  ;;  %v3588_v18 = vpop.permute.xlu0 %3587  ;;  %2689 = vmatprep.subr.mxu1 %v2010_v55 }
 0x23b   : > { %v3590_v57 = vunpack.i.h.bf16 %v3588_v18  ;;  %v3589_v4 = vunpack.i.l.bf16 %v3588_v18  ;;  %2690 = vmatpush3.msra.mxu1 %v4631_v53  ;;  %1751 = vmatmul.mubr.f32.gmra.mxu0 %v1660_v8 }
 0x23c   : > { %2691 = vmatprep.subr.mxu1 %v2009_v0  ;;  %v2008_v13 = vsel %vm696_vm8, %v3594_v45, %v3595_v21  ;;  %2799 = vmatprep.mubr.msk.f32.mxu0 %vm806_vm7, %v2097_v41 }
 0x23d   : > { %2692 = vmatpush3.msra.mxu1 %v4636_v59  ;;  %v3603_v17 = vpop.permute.xlu1 %3602  ;;  %v2081_v14 = vsel %vm765_vm9, %v3589_v4, %v3590_v57 }
 0x23e   : > { %v3605_v19 = vunpack.i.h.bf16 %v3603_v17  ;;  %v3604_v31 = vunpack.i.l.bf16 %v3603_v17  ;;  %v3598_v5 = vpop.permute.xlu0 %3597  ;;  %2693 = vmatprep.subr.mxu1 %v2008_v13  ;;  %2781 = vmatprep.subr.mxu0 %v2081_v14 }
 0x23f   : > { %v3600_v9 = vunpack.i.h.bf16 %v3598_v5  ;;  %v3599_v15 = vunpack.i.l.bf16 %v3598_v5  ;;  %2694 = vmatpush3.msra.mxu1 %v4647_v23  ;;  %2782 = vmatpush3.msra.mxu0 %v2081_v14 }
 0x240   : > { %v2007_v53 = vsel %vm696_vm8, %v3604_v31, %v3605_v19 }
 0x241   : > { %v3613_v61 = vpop.permute.xlu1 %3612  ;;  %2695 = vmatprep.subr.mxu1 %v2007_v53  ;;  %v2080_v59 = vsel %vm765_vm9, %v3599_v15, %v3600_v9 }
 0x242   : > { %v3615_v62 = vunpack.i.h.bf16 %v3613_v61  ;;  %v3614_v56 = vunpack.i.l.bf16 %v3613_v61  ;;  %v3608_v16 = vpop.permute.xlu0 %3607  ;;  %2783 = vmatprep.subr.mxu0 %v2080_v59  ;;  %2696 = vmatpush3.msra.mxu1 %v4660_v38  ;;  %v2095_v38 = vunpack.c.l.bf16 %v4710_v6 }
 0x243   : > { %v3610_v33 = vunpack.i.h.bf16 %v3608_v16  ;;  %v3609_v48 = vunpack.i.l.bf16 %v3608_v16  ;;  %2784 = vmatpush3.msra.mxu0 %v2080_v59 }
 0x244   : > { %v2006_v47 = vsel %vm696_vm8, %v3614_v56, %v3615_v62 }
 0x245   : > { %v3623_v23 = vpop.permute.xlu1 %3622  ;;  %v2079_v39 = vsel %vm765_vm9, %v3609_v48, %v3610_v33  ;;  %2697 = vmatprep.subr.mxu1 %v2006_v47 }
 0x246   : > { %v3625_v11 = vunpack.i.h.bf16 %v3623_v23  ;;  %v3624_v1 = vunpack.i.l.bf16 %v3623_v23  ;;  %v3618_v34 = vpop.permute.xlu0 %3617  ;;  %2785 = vmatprep.subr.mxu0 %v2079_v39  ;;  %2698 = vmatpush3.msra.mxu1 %v4895_v51 }
 0x247   : > { %v3620_v10 = vunpack.i.h.bf16 %v3618_v34  ;;  %v3619_v7 = vunpack.i.l.bf16 %v3618_v34  ;;  %2786 = vmatpush3.msra.mxu0 %v2079_v39 }
 0x248   : > { %v2005_v52 = vsel %vm696_vm8, %v3624_v1, %v3625_v11 }
 0x249   : > { %v3633_v42 = vpop.permute.xlu1 %3632  ;;  %2699 = vmatprep.subr.mxu1 %v2005_v52  ;;  %v2078_v54 = vsel %vm765_vm9, %v3619_v7, %v3620_v10 }
 0x24a   : > { %v3628_v28 = vpop.permute.xlu0 %3627  ;;  %2787 = vmatprep.subr.mxu0 %v2078_v54  ;;  %2700 = vmatpush3.msra.mxu1 %v4896_v3  ;;  %v3635_v26 = vunpack.i.h.bf16 %v3633_v42  ;;  %v3634_v58 = vunpack.i.l.bf16 %v3633_v42 }
 0x24b   : > { %v3630_v12 = vunpack.i.h.bf16 %v3628_v28  ;;  %v3629_v49 = vunpack.i.l.bf16 %v3628_v28  ;;  %2788 = vmatpush3.msra.mxu0 %v2078_v54  ;;  %2184 = vmatmul.mubr.f32.vlgmr.msra.gmra.mxu1 %v2095_v38 }
 0x24c   : > { %2188 = vmatprep.mubr.f32.mxu1 %v2099_v43  ;;  %v2076_v2 = vsel %vm765_vm9, %v3634_v58, %v3635_v26 }
 0x24d   : > { %v2077_v6 = vsel %vm765_vm9, %v3629_v49, %v3630_v12  ;;  %v3643_v46 = vpop.permute.xlu1 %3642 }
 0x24e   : > { %v3638_v24 = vpop.permute.xlu0 %3637  ;;  %2789 = vmatprep.subr.mxu0 %v2077_v6  ;;  %v3645_v44 = vunpack.i.h.bf16 %v3643_v46  ;;  %v3644_v27 = vunpack.i.l.bf16 %v3643_v46 }
 0x24f   : > { %v3640_v36 = vunpack.i.h.bf16 %v3638_v24  ;;  %v3639_v29 = vunpack.i.l.bf16 %v3638_v24  ;;  %2790 = vmatpush3.msra.mxu0 %v2077_v6  ;;  %2189 = vmatmul.mubr.f32.gmra.mxu1 %v2098_v37 }
 0x250   : > { %2791 = vmatprep.subr.mxu0 %v2076_v2  ;;  %v2074_v60 = vsel %vm765_vm9, %v3644_v27, %v3645_v44 }
 0x251   : > { %2792 = vmatpush3.msra.mxu0 %v2076_v2  ;;  %v2075_v35 = vsel %vm765_vm9, %v3639_v29, %v3640_v36 }
 0x252   : > { %v3648_v50 = vpop.permute.xlu0 %3647  ;;  %2793 = vmatprep.subr.mxu0 %v2075_v35 }
 0x253   : > { %v3650_v32 = vunpack.i.h.bf16 %v3648_v50  ;;  %v3649_v22 = vunpack.i.l.bf16 %v3648_v50  ;;  %2794 = vmatpush3.msra.mxu0 %v2075_v35 }
 0x254   : > { %2795 = vmatprep.subr.mxu0 %v2074_v60 }
 0x255   : > { %2796 = vmatpush3.msra.mxu0 %v2074_v60  ;;  %v2073_v40 = vsel %vm765_vm9, %v3649_v22, %v3650_v32 }
 0x256   : > { %2797 = vmatprep.subr.mxu0 %v2073_v40  ;;  %v2603_v8 = vpop.f32.mrf.mxu1 }
 0x257   : > { %2798 = vmatpush3.msra.mxu0 %v2073_v40 }
 0x258   : > { %2800 = vmatmul.mubr.msk.f32.vlgmr.msra.gmra.mxu0 %vm806_vm7, %v2100_v20  ;;  %v2604_v41 = vpop.f32.mrf.mxu1 }
 0x259   : > { %v2605_v0 = vadd.f32 %v2604_v41, %v2603_v8 }
 0x25a   : > { %v2606_v30 = vpop.f32.mrf.mxu1  ;;  %v1238_v45 = vpop.permute.xlu1 %1237 }
 0x25b   : > { %v1318_v4 = vadd.f32 %v2605_v0, %v1238_v45 }
 0x25c   : > { %v2607_v55 = vpop.f32.mrf.mxu1 }
 0x25d   : > { %v2608_v21 = vadd.f32 %v2607_v55, %v2606_v30 }
 0x25e   : > { %v1668_v53 = vpop.permute.xlu1 %1667 }
 0x25f   : > { %v1243_v18 = vpop.permute.xlu0 %1242 }
 0x260   : > { %v1323_v13 = vadd.f32 %v2608_v21, %v1243_v18 }
 0x262   : > { %v2106_v7 = vpop.permute.xlu1 %2105 }
 0x263   : > { %v1673_v16 = vpop.permute.xlu0 %1672 }
 0x267   : > { %v2111_v38 = vpop.permute.xlu0 %2110 }
 0x287   : > { %v2759_v57 = vpop.f32.mrf.mxu0 }
 0x288   : > { %v1398_v17 = vadd.f32 %v2759_v57, %v1323_v13 }
 0x289   : > { %v1392_v63 = vpop.f32.mrf.mxu0 }
 0x28a   : > { %v1393_v14 = vadd.f32 %v1392_v63, %v1318_v4 }
 0x28c   : > { %v2507_v19 = vpack.c.bf16 %v1398_v17, %v1393_v14 }
 0x28e   : > { %2519 = vst [vmem:[%s4761_s13 + $0x8] sm:$0xff] %v2507_v19  }
 0x2d0   : > { %v2780_v61 = vpop.f32.mrf.mxu1 }
 0x2d2   : > { %v1822_v48 = vpop.f32.mrf.mxu1 }
 0x2f7   : > { %v2652_v31 = vpop.f32.mrf.mxu0 }
 0x2f9   : > { %v2653_v5 = vpop.f32.mrf.mxu0 }
 0x2fa   : > { %v2654_v9 = vadd.f32 %v2653_v5, %v2652_v31 }
 0x2fb   : > { %v2655_v15 = vpop.f32.mrf.mxu0 }
 0x2fc   : > { %v1748_v62 = vadd.f32 %v2654_v9, %v1668_v53 }
 0x2fd   : > { %v2656_v59 = vpop.f32.mrf.mxu0 }
 0x2fe   : > { %v2657_v56 = vadd.f32 %v2656_v59, %v2655_v15  ;;  %v1823_v47 = vadd.f32 %v1822_v48, %v1748_v62 }
 0x300   : > { %v1753_v33 = vadd.f32 %v2657_v56, %v1673_v16 }
 0x302   : > { %v1828_v23 = vadd.f32 %v2780_v61, %v1753_v33 }
 0x304   : > { %v2512_v39 = vpack.c.bf16 %v1828_v23, %v1823_v47 }
 0x306   : > { %2520 = vst [vmem:[%s4761_s13 + $0x10] sm:$0xff] %v2512_v39  }
 0x30b   : > { %v2701_v25 = vpop.f32.mrf.mxu1 }
 0x30d   : > { %v2702_v11 = vpop.f32.mrf.mxu1 }
 0x30e   : > { %v2703_v51 = vadd.f32 %v2702_v11, %v2701_v25 }
 0x30f   : > { %v2704_v1 = vpop.f32.mrf.mxu1 }
 0x310   : > { %v2186_v42 = vadd.f32 %v2703_v51, %v2106_v7 }
 0x311   : > { %v2705_v34 = vpop.f32.mrf.mxu1 }
 0x312   : > { %v2706_v10 = vadd.f32 %v2705_v34, %v2704_v1 }
 0x314   : > { %v2191_v43 = vadd.f32 %v2706_v10, %v2111_v38 }
 0x318   : > { %v2801_v52 = vpop.f32.mrf.mxu0 }
 0x319   : > { %v2266_v28 = vadd.f32 %v2801_v52, %v2191_v43 }
 0x31a   : > { %v2260_v54 = vpop.f32.mrf.mxu0 }
 0x31b   : > { %v2261_v3 = vadd.f32 %v2260_v54, %v2186_v42 }
 0x31d   : > { %v2517_v37 = vpack.c.bf16 %v2266_v28, %v2261_v3 }
 0x31f   : > { %2521 = vst [vmem:[%s4761_s13 + $0x18] sm:$0xff] %v2517_v37  }
 0x320 PF: > { %s14_s21 = sadd.s32 1, %s3713_s21   ;;  %s4897_s15 = smov %s3693_s16 }
 0x321   : > { %p11_p12 = scmp.ge.s32.totalorder %s14_s21, 10   ;;  %s4898_s16 = smov %s3805_s29 }
 0x322   : > { %s4899_s17 = smov %s3705_s19  ;;  %s4900_s18 = smov %s3709_s20 }
 0x323   : > { %s4901_s19 = smov %s4904_s22  ;;  %s4902_s20 = smov %s4908_s23 }
 0x324   :  { %13 = sbr.rel (!%p11_p12) target bundleno = 4 (0x4), region = 167 }

</bundles_post_ra>
